<compile_context>
chip_gen: v7x
topology: tpu7x:2x2x1
jax: 0.10.0
libtpu: 0.0.40
codegen_flags: <defaults>
</compile_context>

<pallas_src>
import jax
import jax.numpy as jnp
from jax.experimental import pallas as pl
from jax.experimental.pallas import tpu as pltpu

BN_EPS = 50.0  # the module passes num_epochs=50 as the BatchNorm eps


def _pick_tile(total, cap):
    """Largest divisor of `total` that is <= cap (>= 1)."""
    cap = max(1, min(int(cap), int(total)))
    for t in range(cap, 0, -1):
        if total % t == 0:
            return t
    return 1


def _row_budget():
    """Per-generation row budget for conv2 tiles: v5e/v6e have 128 MiB VMEM,
    v7x only 64 MiB, so gate the tile size on the reported capacity."""
    try:
        info = pltpu.get_tpu_info()
        if getattr(info, "vmem_capacity_bytes", 0) >= 100 * (1 << 20):
            return 8192
    except Exception:
        pass
    return 4096


# ------------- layer-1 conv (Cin=1): plane-layout VPU kernel + fused BN stats -------------
def conv1_plane(x, w, b, *, k, pad):
    """x: (N, H, W) f32 single-channel; w: (Cout, 1, k, k); b: (Cout,); stride 1.

    Returns (y, ssum, ssq):
      y    : (N, Cout, Ho, Wo) bf16   conv output (+bias), per-channel planes
      ssum : (N, Cout, 1, Wo) f32     per-(image,channel) column sums of y
      ssq  : (N, Cout, 1, Wo) f32     per-(image,channel) column sums of y*y
    """
    N, H, W = x.shape
    Cout = w.shape[0]
    Hp, Wp = H + 2 * pad, W + 2 * pad
    Ho, Wo = Hp - k + 1, Wp - k + 1

    xp = jnp.pad(x.astype(jnp.float32), ((0, 0), (pad, pad), (pad, pad)))
    wflat = w.reshape(Cout * k * k).astype(jnp.float32)   # idx = co*k*k + di*k + dj
    bflat = b.astype(jnp.float32)

    def kernel(w_ref, b_ref, x_ref, o_ref, s_ref, q_ref):
        # 9 shifted windows of the resident padded plane (W in lanes, fully dense).
        taps = [x_ref[0, di:di + Ho, dj:dj + Wo] for di in range(k) for dj in range(k)]
        for co in range(Cout):
            acc = taps[0] * w_ref[co * k * k]
            for t in range(1, k * k):
                acc = acc + taps[t] * w_ref[co * k * k + t]
            y = acc + b_ref[co]
            o_ref[0, co] = y.astype(o_ref.dtype)
            # BN partials: one cross-sublane reduce per channel (no unrolled row loop).
            s_ref[0, co] = jnp.sum(y, axis=0, keepdims=True)
            q_ref[0, co] = jnp.sum(y * y, axis=0, keepdims=True)

    y, ssum, ssq = pl.pallas_call(
        kernel,
        out_shape=(jax.ShapeDtypeStruct((N, Cout, Ho, Wo), jnp.bfloat16),
                   jax.ShapeDtypeStruct((N, Cout, 1, Wo), jnp.float32),
                   jax.ShapeDtypeStruct((N, Cout, 1, Wo), jnp.float32)),
        grid_spec=pltpu.PrefetchScalarGridSpec(
            num_scalar_prefetch=0,
            grid=(N,),
            in_specs=[
                pl.BlockSpec(memory_space=pltpu.MemorySpace.SMEM),   # conv weights (scalars)
                pl.BlockSpec(memory_space=pltpu.MemorySpace.SMEM),   # bias (scalars)
                pl.BlockSpec((1, Hp, Wp), lambda n: (n, 0, 0)),
            ],
            out_specs=(
                pl.BlockSpec((1, Cout, Ho, Wo), lambda n: (n, 0, 0, 0)),
                pl.BlockSpec((1, Cout, 1, Wo), lambda n: (n, 0, 0, 0)),
                pl.BlockSpec((1, Cout, 1, Wo), lambda n: (n, 0, 0, 0)),
            )),
        compiler_params=pltpu.CompilerParams(dimension_semantics=("parallel",)),
    )(wflat, bflat, xp)
    return y, ssum, ssq


# ------------- layer-2 conv (Cin=16): row-tiled MXU kernel, one K=k*k*Cin dot -------------
def conv2_rows(x_nhwc, w, b, *, k, pad):
    """x: (N, H, W, Cin) NHWC; w: (Cout, Cin, k, k) OIHW; stride 1.

    Returns (y2, ssum, ssq, dims):
      y2   : (N, Ho*Wo, Cout) bf16  conv output (+bias), rows in (ho, wo) order
      ssum : (N, T, 1, Cout) f32    per-(image,row-tile) partial sums of y
      ssq  : (N, T, 1, Cout) f32    per-(image,row-tile) partial sums of y*y
    """
    N, H, W, Cin = x_nhwc.shape
    Cout = w.shape[0]
    Hp, Wp = H + 2 * pad, W + 2 * pad
    Ho, Wo = Hp - k + 1, Wp - k + 1
    kc, kk = k * Cin, k * k * Cin

    xp = jnp.pad(x_nhwc.astype(jnp.bfloat16), ((0, 0), (pad, pad), (pad, pad), (0, 0)))
    # width-only unfold (k-x HBM, not k*k-x): A[n, h*Wo+wo, dj*Cin+ci] = xp[n, h, wo+dj, ci]
    A = jnp.stack([xp[:, :, dj:dj + Wo, :] for dj in range(k)], axis=3)
    A = A.reshape(N, Hp * Wo, kc)

    TH = _pick_tile(Ho, max(1, _row_budget() // max(Wo, 1)))   # output rows per tile
    T = Ho // TH
    blk = TH * Wo
    halo_rows = (k - 1) * Wo
    # (k-1)-row halo per tile so auto-pipelined input blocks never need to overlap.
    halo = jnp.stack(
        [A[:, (t + 1) * blk:(t + 1) * blk + halo_rows, :] for t in range(T)], axis=1)

    Wm = jnp.transpose(w, (2, 3, 1, 0)).reshape(kk, Cout).astype(jnp.bfloat16)  # [(di,dj,ci), co]
    bias = b.astype(jnp.float32).reshape(1, Cout)

    def kernel(a_ref, h_ref, w_ref, b_ref, o_ref, s_ref, q_ref):
        window = jnp.concatenate([a_ref[0], h_ref[0, 0]], axis=0)       # (blk+halo, k*Cin) bf16
        # kh taps concatenated along K -> ONE K = k*k*Cin MXU contraction.
        big = jnp.concatenate(
            [window[di * Wo:di * Wo + blk, :] for di in range(k)], axis=1)
        y = jnp.dot(big, w_ref[...], preferred_element_type=jnp.float32) + b_ref[...]
        o_ref[0] = y.astype(o_ref.dtype)
        # BN partials via vector reductions (no trace-time unrolled row loop).
        s_ref[0, 0] = jnp.sum(y, axis=0, keepdims=True)
        q_ref[0, 0] = jnp.sum(y * y, axis=0, keepdims=True)

    y2, ssum, ssq = pl.pallas_call(
        kernel,
        out_shape=(jax.ShapeDtypeStruct((N, Ho * Wo, Cout), jnp.bfloat16),
                   jax.ShapeDtypeStruct((N, T, 1, Cout), jnp.float32),
                   jax.ShapeDtypeStruct((N, T, 1, Cout), jnp.float32)),
        grid_spec=pltpu.PrefetchScalarGridSpec(
            num_scalar_prefetch=0,
            grid=(N, T),
            in_specs=[
                pl.BlockSpec((1, blk, kc), lambda n, t: (n, t, 0)),
                pl.BlockSpec((1, 1, halo_rows, kc), lambda n, t: (n, t, 0, 0)),
                pl.BlockSpec((kk, Cout), lambda n, t: (0, 0)),
                pl.BlockSpec((1, Cout), lambda n, t: (0, 0)),
            ],
            out_specs=(
                pl.BlockSpec((1, blk, Cout), lambda n, t: (n, t, 0)),
                pl.BlockSpec((1, 1, 1, Cout), lambda n, t: (n, t, 0, 0)),
                pl.BlockSpec((1, 1, 1, Cout), lambda n, t: (n, t, 0, 0)),
            )),
        compiler_params=pltpu.CompilerParams(
            dimension_semantics=("parallel", "arbitrary")),
    )(A, halo, Wm, bias)
    return y2, ssum, ssq, (N, Ho, Wo, Cout)


# ---------------- fused BN-affine + ReLU + 2x2 max-pool (channels-last) ----------------
def bn_relu_pool(x_nhwc, mean, var, gamma, beta, eps, out_dtype=jnp.bfloat16):
    """Training-mode BN (batch stats, biased var) + ReLU + 2x2/2 max-pool."""
    N, Ho, Wo, C = x_nhwc.shape
    assert Ho % 2 == 0 and Wo % 2 == 0
    scale = gamma.astype(jnp.float32) / jnp.sqrt(var + eps)
    shift = beta.astype(jnp.float32) - mean * scale

    Ho2, Wo2 = Ho // 2, Wo // 2
    R = N * Ho2
    # lane-folded, free row-major view: last dim packs [w-even C | w-odd C]
    x4 = x_nhwc.reshape(R, 2, Wo2, 2 * C)
    scale4 = jnp.tile(scale, 2).reshape(1, 1, 1, 2 * C)
    shift4 = jnp.tile(shift, 2).reshape(1, 1, 1, 2 * C)
    # keep blocks a few thousand rows and >=2 programs for megacore
    TB = _pick_tile(R, min(max(R // 2, 1), max(1, 2048 // max(Wo2, 1))))

    def kernel(x_ref, s_ref, t_ref, o_ref):
        z = jnp.maximum(x_ref[...].astype(jnp.float32) * s_ref[...] + t_ref[...], 0.0)
        v = jnp.maximum(z[:, 0], z[:, 1])                       # vertical pool
        o_ref[...] = jnp.maximum(v[:, :, :C], v[:, :, C:]).astype(o_ref.dtype)  # horizontal

    out = pl.pallas_call(
        kernel,
        out_shape=jax.ShapeDtypeStruct((R, Wo2, C), out_dtype),
        grid_spec=pltpu.PrefetchScalarGridSpec(
            num_scalar_prefetch=0,
            grid=(R // TB,),
            in_specs=[
                pl.BlockSpec((TB, 2, Wo2, 2 * C), lambda i: (i, 0, 0, 0)),
                pl.BlockSpec((1, 1, 1, 2 * C), lambda i: (0, 0, 0, 0)),
                pl.BlockSpec((1, 1, 1, 2 * C), lambda i: (0, 0, 0, 0)),
            ],
            out_specs=pl.BlockSpec((TB, Wo2, C), lambda i: (i, 0, 0))),
        compiler_params=pltpu.CompilerParams(dimension_semantics=("parallel",)),
    )(x4, scale4, shift4)
    return out.reshape(N, Ho2, Wo2, C)


# ---------------- FC: bf16 MXU matmul + bias (weight kept (Nc, K), K in lanes) ----------------
def linear(x, w_nk, b, *, tk=16384):
    """(M, K) @ (Nc, K)^T + b; bf16 operands, f32 accumulation."""
    M, K = x.shape
    Nc = w_nk.shape[0]
    xb = x.astype(jnp.bfloat16)
    wb = w_nk.astype(jnp.bfloat16)
    bias = b.astype(jnp.float32).reshape(1, Nc)

    if K <= tk:
        # single K step: no accumulator scratch, no init/finalize branches
        def kernel(a_ref, w_ref, b_ref, o_ref):
            o_ref[...] = jnp.dot(a_ref[...], w_ref[...].T,
                                 preferred_element_type=jnp.float32) + b_ref[...]

        return pl.pallas_call(
            kernel,
            out_shape=jax.ShapeDtypeStruct((M, Nc), jnp.float32),
            grid_spec=pltpu.PrefetchScalarGridSpec(
                num_scalar_prefetch=0,
                grid=(1,),
                in_specs=[pl.BlockSpec((M, K), lambda i: (0, 0)),
                          pl.BlockSpec((Nc, K), lambda i: (0, 0)),
                          pl.BlockSpec((1, Nc), lambda i: (0, 0))],
                out_specs=pl.BlockSpec((M, Nc), lambda i: (0, 0))),
            compiler_params=pltpu.CompilerParams(dimension_semantics=("arbitrary",)),
        )(xb, wb, bias)

    # K-tiled accumulating path for the real-size fc (fc_in = 75*75*32 = 180000).
    Kp = ((K + tk - 1) // tk) * tk
    if Kp != K:
        xb = jnp.pad(xb, ((0, 0), (0, Kp - K)))
        wb = jnp.pad(wb, ((0, 0), (0, Kp - K)))

    def kernel(a_ref, w_ref, b_ref, o_ref):
        @pl.when(pl.program_id(0) == 0)
        def _():
            o_ref[...] = jnp.zeros((M, Nc), jnp.float32) + b_ref[...]
        o_ref[...] += jnp.dot(a_ref[...], w_ref[...].T,
                              preferred_element_type=jnp.float32)

    return pl.pallas_call(
        kernel,
        out_shape=jax.ShapeDtypeStruct((M, Nc), jnp.float32),
        grid_spec=pltpu.PrefetchScalarGridSpec(
            num_scalar_prefetch=0,
            grid=(Kp // tk,),
            in_specs=[pl.BlockSpec((M, tk), lambda kk_: (0, kk_)),
                      pl.BlockSpec((Nc, tk), lambda kk_: (0, kk_)),
                      pl.BlockSpec((1, Nc), lambda kk_: (0, 0))],
            out_specs=pl.BlockSpec((M, Nc), lambda kk_: (0, 0))),
        compiler_params=pltpu.CompilerParams(dimension_semantics=("arbitrary",)),
    )(xb, wb, bias)


# ---------------- full forward ----------------
def cnn_bn_forward(x_nchw, p):
    xf = x_nchw.astype(jnp.float32)
    assert xf.shape[1] == 1, "layer1 expects a single input channel"

    # layer 1: conv(1->16, k3, pad2) with fused BN-stat partials
    y1, s1, q1 = conv1_plane(xf[:, 0], p["w1"], p["b1"], k=3, pad=2)
    N, C1, Ho1, Wo1 = y1.shape
    m1 = jnp.sum(s1, axis=(0, 2, 3)) / (N * Ho1 * Wo1)
    v1 = jnp.sum(q1, axis=(0, 2, 3)) / (N * Ho1 * Wo1) - m1 * m1   # biased var; eps=50 >> cancellation
    x1 = bn_relu_pool(jnp.transpose(y1, (0, 2, 3, 1)), m1, v1, p["g1"], p["be1"], BN_EPS)

    # layer 2: conv(16->32, k5, pad2), one K=400 MXU contraction per row tile
    y2, s2, q2, d2 = conv2_rows(x1, p["w2"], p["b2"], k=5, pad=2)
    _, Ho2, Wo2, C2 = d2
    m2 = jnp.sum(s2, axis=(0, 1, 2)) / (N * Ho2 * Wo2)
    v2 = jnp.sum(q2, axis=(0, 1, 2)) / (N * Ho2 * Wo2) - m2 * m2
    x2 = bn_relu_pool(y2.reshape(N, Ho2, Wo2, C2), m2, v2, p["g2"], p["be2"], BN_EPS)

    # FC: fold PyTorch's (N, C*H*W) flatten order into the weight permutation so
    # the activation is never transposed; weight kept (Nc, K) with K in lanes.
    N_, H2, W2, C2_ = x2.shape
    ncls = p["wfc"].shape[0]
    w_nk = p["wfc"].reshape(ncls, C2_, H2, W2).transpose(0, 2, 3, 1).reshape(ncls, H2 * W2 * C2_)
    flat = x2.reshape(N_, H2 * W2 * C2_)
    return linear(flat, w_nk, p["bfc"])


# ---------------- pure-JAX reference for validation ----------------
def cnn_bn_reference(x_nchw, p):
    def conv(x, w, b, pad):
        y = jax.lax.conv_general_dilated(
            x, w, (1, 1), [(pad, pad), (pad, pad)],
            dimension_numbers=("NCHW", "OIHW", "NCHW"))
        return y + b.reshape(1, -1, 1, 1)

    def bn_relu(x, g, be):
        mean = jnp.mean(x, axis=(0, 2, 3), keepdims=True)
        var = jnp.mean((x - mean) ** 2, axis=(0, 2, 3), keepdims=True)
        xh = (x - mean) / jnp.sqrt(var + BN_EPS)
        return jnp.maximum(xh * g.reshape(1, -1, 1, 1) + be.reshape(1, -1, 1, 1), 0.0)

    def pool(x):
        N, C, H, W = x.shape
        return jnp.max(x.reshape(N, C, H // 2, 2, W // 2, 2), axis=(3, 5))

    x = x_nchw.astype(jnp.float32)
    y = pool(bn_relu(conv(x, p["w1"], p["b1"], 2), p["g1"], p["be1"]))
    y = pool(bn_relu(conv(y, p["w2"], p["b2"], 2), p["g2"], p["be2"]))
    y = y.reshape(y.shape[0], -1)
    return y @ p["wfc"].T + p["bfc"]


def init_params(key, num_classes, fc_in):
    k = jax.random.split(key, 6)
    return {
        "w1": jax.random.normal(k[0], (16, 1, 3, 3), jnp.float32) * 0.2,
        "b1": jax.random.normal(k[1], (16,), jnp.float32) * 0.1,
        "g1": jnp.ones((16,), jnp.float32),
        "be1": jnp.zeros((16,), jnp.float32),
        "w2": jax.random.normal(k[2], (32, 16, 5, 5), jnp.float32) * 0.05,
        "b2": jax.random.normal(k[3], (32,), jnp.float32) * 0.1,
        "g2": jnp.ones((32,), jnp.float32),
        "be2": jnp.zeros((32,), jnp.float32),
        "wfc": jax.random.normal(k[4], (num_classes, fc_in), jnp.float32) * 0.02,
        "bfc": jax.random.normal(k[5], (num_classes,), jnp.float32) * 0.1,
    }


if __name__ == "__main__":
    num_classes = 4
    N, H, W = 2, 14, 14                      # small spatial size for the demo
    # conv1(pad=2,k=3): 16x16 -> pool: 8x8 -> conv2(pad=2,k=5): 8x8 -> pool: 4x4
    fc_in = 32 * (((H + 2) // 2) // 2) * (((W + 2) // 2) // 2)

    key = jax.random.PRNGKey(0)
    kx, kp = jax.random.split(key)
    x = jax.random.normal(kx, (N, 1, H, W), jnp.float32)
    params = init_params(kp, num_classes, fc_in)

    out = jax.jit(cnn_bn_forward)(x, params)
    out = jax.block_until_ready(out)

    ref = cnn_bn_reference(x, params)
    assert out.shape == (N, num_classes), out.shape
    assert bool(jnp.all(jnp.isfinite(out)))
    rel_err = float(jnp.max(jnp.abs(out - ref)) / (jnp.max(jnp.abs(ref)) + 1e-8))
    assert rel_err < 5e-2, f"mismatch vs reference, rel_err={rel_err}"

    print("KERNEL_OK")
</pallas_src>

<mosaic_0001>
module attributes {stable_mosaic.version = 11 : i64} {
  func.func @kernel(%arg0: i32, %arg1: memref<144xf32, #tpu.memory_space<smem>>, %arg2: memref<16xf32, #tpu.memory_space<smem>>, %arg3: memref<1x18x18xf32, #tpu.memory_space<vmem>>, %arg4: memref<1x16x16x16xbf16, #tpu.memory_space<vmem>>, %arg5: memref<1x16x1x16xf32, #tpu.memory_space<vmem>>, %arg6: memref<1x16x1x16xf32, #tpu.memory_space<vmem>>) attributes {dimension_semantics = [#tpu.dimension_semantics<parallel>], iteration_bounds = array<i64: 2>, scalar_prefetch = 0 : i64, scratch_operands = 0 : i64, tpu.core_type = #tpu.core_type<tc>, window_params = [{transform_indices = @transform_0, window_bounds = array<i64: 144>}, {transform_indices = @transform_1, window_bounds = array<i64: 16>}, {transform_indices = @transform_2, window_bounds = array<i64: 1, 18, 18>}, {transform_indices = @transform_3, window_bounds = array<i64: 1, 16, 16, 16>}, {transform_indices = @transform_4, window_bounds = array<i64: 1, 16, 1, 16>}, {transform_indices = @transform_5, window_bounds = array<i64: 1, 16, 1, 16>}]} {
    %c0 = arith.constant 0 : index
    %c0_0 = arith.constant 0 : index
    %c0_1 = arith.constant 0 : index
    %0 = vector.load %arg3[%c0, %c0_0, %c0_1] : memref<1x18x18xf32, #tpu.memory_space<vmem>>, vector<1x16x16xf32>
    %1 = vector.shape_cast %0 : vector<1x16x16xf32> to vector<16x16xf32>
    %c0_2 = arith.constant 0 : index
    %c0_3 = arith.constant 0 : index
    %c1 = arith.constant 1 : index
    %2 = vector.load %arg3[%c0_2, %c0_3, %c1] : memref<1x18x18xf32, #tpu.memory_space<vmem>>, vector<1x16x16xf32>
    %3 = vector.shape_cast %2 : vector<1x16x16xf32> to vector<16x16xf32>
    %c0_4 = arith.constant 0 : index
    %c0_5 = arith.constant 0 : index
    %c2 = arith.constant 2 : index
    %4 = vector.load %arg3[%c0_4, %c0_5, %c2] : memref<1x18x18xf32, #tpu.memory_space<vmem>>, vector<1x16x16xf32>
    %5 = vector.shape_cast %4 : vector<1x16x16xf32> to vector<16x16xf32>
    %c0_6 = arith.constant 0 : index
    %c1_7 = arith.constant 1 : index
    %c0_8 = arith.constant 0 : index
    %6 = vector.load %arg3[%c0_6, %c1_7, %c0_8] : memref<1x18x18xf32, #tpu.memory_space<vmem>>, vector<1x16x16xf32>
    %7 = vector.shape_cast %6 : vector<1x16x16xf32> to vector<16x16xf32>
    %c0_9 = arith.constant 0 : index
    %c1_10 = arith.constant 1 : index
    %c1_11 = arith.constant 1 : index
    %8 = vector.load %arg3[%c0_9, %c1_10, %c1_11] : memref<1x18x18xf32, #tpu.memory_space<vmem>>, vector<1x16x16xf32>
    %9 = vector.shape_cast %8 : vector<1x16x16xf32> to vector<16x16xf32>
    %c0_12 = arith.constant 0 : index
    %c1_13 = arith.constant 1 : index
    %c2_14 = arith.constant 2 : index
    %10 = vector.load %arg3[%c0_12, %c1_13, %c2_14] : memref<1x18x18xf32, #tpu.memory_space<vmem>>, vector<1x16x16xf32>
    %11 = vector.shape_cast %10 : vector<1x16x16xf32> to vector<16x16xf32>
    %c0_15 = arith.constant 0 : index
    %c2_16 = arith.constant 2 : index
    %c0_17 = arith.constant 0 : index
    %12 = vector.load %arg3[%c0_15, %c2_16, %c0_17] : memref<1x18x18xf32, #tpu.memory_space<vmem>>, vector<1x16x16xf32>
    %13 = vector.shape_cast %12 : vector<1x16x16xf32> to vector<16x16xf32>
    %c0_18 = arith.constant 0 : index
    %c2_19 = arith.constant 2 : index
    %c1_20 = arith.constant 1 : index
    %14 = vector.load %arg3[%c0_18, %c2_19, %c1_20] : memref<1x18x18xf32, #tpu.memory_space<vmem>>, vector<1x16x16xf32>
    %15 = vector.shape_cast %14 : vector<1x16x16xf32> to vector<16x16xf32>
    %c0_21 = arith.constant 0 : index
    %c2_22 = arith.constant 2 : index
    %c2_23 = arith.constant 2 : index
    %16 = vector.load %arg3[%c0_21, %c2_22, %c2_23] : memref<1x18x18xf32, #tpu.memory_space<vmem>>, vector<1x16x16xf32>
    %17 = vector.shape_cast %16 : vector<1x16x16xf32> to vector<16x16xf32>
    %c0_24 = arith.constant 0 : index
    %18 = memref.load %arg1[%c0_24] : memref<144xf32, #tpu.memory_space<smem>>
    %19 = vector.broadcast %18 : f32 to vector<16x16xf32>
    %20 = arith.mulf %1, %19 : vector<16x16xf32>
    %c1_25 = arith.constant 1 : index
    %21 = memref.load %arg1[%c1_25] : memref<144xf32, #tpu.memory_space<smem>>
    %22 = vector.broadcast %21 : f32 to vector<16x16xf32>
    %23 = arith.mulf %3, %22 : vector<16x16xf32>
    %24 = arith.addf %20, %23 : vector<16x16xf32>
    %c2_26 = arith.constant 2 : index
    %25 = memref.load %arg1[%c2_26] : memref<144xf32, #tpu.memory_space<smem>>
    %26 = vector.broadcast %25 : f32 to vector<16x16xf32>
    %27 = arith.mulf %5, %26 : vector<16x16xf32>
    %28 = arith.addf %24, %27 : vector<16x16xf32>
    %c3 = arith.constant 3 : index
    %29 = memref.load %arg1[%c3] : memref<144xf32, #tpu.memory_space<smem>>
    %30 = vector.broadcast %29 : f32 to vector<16x16xf32>
    %31 = arith.mulf %7, %30 : vector<16x16xf32>
    %32 = arith.addf %28, %31 : vector<16x16xf32>
    %c4 = arith.constant 4 : index
    %33 = memref.load %arg1[%c4] : memref<144xf32, #tpu.memory_space<smem>>
    %34 = vector.broadcast %33 : f32 to vector<16x16xf32>
    %35 = arith.mulf %9, %34 : vector<16x16xf32>
    %36 = arith.addf %32, %35 : vector<16x16xf32>
    %c5 = arith.constant 5 : index
    %37 = memref.load %arg1[%c5] : memref<144xf32, #tpu.memory_space<smem>>
    %38 = vector.broadcast %37 : f32 to vector<16x16xf32>
    %39 = arith.mulf %11, %38 : vector<16x16xf32>
    %40 = arith.addf %36, %39 : vector<16x16xf32>
    %c6 = arith.constant 6 : index
    %41 = memref.load %arg1[%c6] : memref<144xf32, #tpu.memory_space<smem>>
    %42 = vector.broadcast %41 : f32 to vector<16x16xf32>
    %43 = arith.mulf %13, %42 : vector<16x16xf32>
    %44 = arith.addf %40, %43 : vector<16x16xf32>
    %c7 = arith.constant 7 : index
    %45 = memref.load %arg1[%c7] : memref<144xf32, #tpu.memory_space<smem>>
    %46 = vector.broadcast %45 : f32 to vector<16x16xf32>
    %47 = arith.mulf %15, %46 : vector<16x16xf32>
    %48 = arith.addf %44, %47 : vector<16x16xf32>
    %c8 = arith.constant 8 : index
    %49 = memref.load %arg1[%c8] : memref<144xf32, #tpu.memory_space<smem>>
    %50 = vector.broadcast %49 : f32 to vector<16x16xf32>
    %51 = arith.mulf %17, %50 : vector<16x16xf32>
    %52 = arith.addf %48, %51 : vector<16x16xf32>
    %c0_27 = arith.constant 0 : index
    %53 = memref.load %arg2[%c0_27] : memref<16xf32, #tpu.memory_space<smem>>
    %54 = vector.broadcast %53 : f32 to vector<16x16xf32>
    %55 = arith.addf %52, %54 : vector<16x16xf32>
    %56 = arith.truncf %55 : vector<16x16xf32> to vector<16x16xbf16>
    %c0_28 = arith.constant 0 : index
    %c0_29 = arith.constant 0 : index
    %c0_30 = arith.constant 0 : index
    %c0_31 = arith.constant 0 : index
    %57 = vector.load %arg4[%c0_28, %c0_29, %c0_30, %c0_31] : memref<1x16x16x16xbf16, #tpu.memory_space<vmem>>, vector<1x1x16x16xbf16>
    %58 = vector.shape_cast %57 : vector<1x1x16x16xbf16> to vector<16x16xbf16>
    %59 = vector.shape_cast %56 : vector<16x16xbf16> to vector<1x1x16x16xbf16>
    tpu.vector_store %arg4[%c0_28, %c0_29, %c0_30, %c0_31], %59 {strides = array<i32>} : memref<1x16x16x16xbf16, #tpu.memory_space<vmem>>, vector<1x1x16x16xbf16>,
    %cst = arith.constant dense<0.000000e+00> : vector<16xf32>
    %60 = vector.multi_reduction <add>, %55, %cst [0] : vector<16x16xf32> to vector<16xf32>
    %61 = vector.shape_cast %60 : vector<16xf32> to vector<1x16xf32>
    %c0_32 = arith.constant 0 : index
    %c0_33 = arith.constant 0 : index
    %c0_34 = arith.constant 0 : index
    %c0_35 = arith.constant 0 : index
    %62 = vector.load %arg5[%c0_32, %c0_33, %c0_34, %c0_35] : memref<1x16x1x16xf32, #tpu.memory_space<vmem>>, vector<1x1x1x16xf32>
    %63 = vector.shape_cast %62 : vector<1x1x1x16xf32> to vector<1x16xf32>
    %64 = vector.shape_cast %61 : vector<1x16xf32> to vector<1x1x1x16xf32>
    tpu.vector_store %arg5[%c0_32, %c0_33, %c0_34, %c0_35], %64 {strides = array<i32>} : memref<1x16x1x16xf32, #tpu.memory_space<vmem>>, vector<1x1x1x16xf32>,
    %65 = arith.mulf %55, %55 : vector<16x16xf32>
    %cst_36 = arith.constant dense<0.000000e+00> : vector<16xf32>
    %66 = vector.multi_reduction <add>, %65, %cst_36 [0] : vector<16x16xf32> to vector<16xf32>
    %67 = vector.shape_cast %66 : vector<16xf32> to vector<1x16xf32>
    %c0_37 = arith.constant 0 : index
    %c0_38 = arith.constant 0 : index
    %c0_39 = arith.constant 0 : index
    %c0_40 = arith.constant 0 : index
    %68 = vector.load %arg6[%c0_37, %c0_38, %c0_39, %c0_40] : memref<1x16x1x16xf32, #tpu.memory_space<vmem>>, vector<1x1x1x16xf32>
    %69 = vector.shape_cast %68 : vector<1x1x1x16xf32> to vector<1x16xf32>
    %70 = vector.shape_cast %67 : vector<1x16xf32> to vector<1x1x1x16xf32>
    tpu.vector_store %arg6[%c0_37, %c0_38, %c0_39, %c0_40], %70 {strides = array<i32>} : memref<1x16x1x16xf32, #tpu.memory_space<vmem>>, vector<1x1x1x16xf32>,
    %c9 = arith.constant 9 : index
    %71 = memref.load %arg1[%c9] : memref<144xf32, #tpu.memory_space<smem>>
    %72 = vector.broadcast %71 : f32 to vector<16x16xf32>
    %73 = arith.mulf %1, %72 : vector<16x16xf32>
    %c10 = arith.constant 10 : index
    %74 = memref.load %arg1[%c10] : memref<144xf32, #tpu.memory_space<smem>>
    %75 = vector.broadcast %74 : f32 to vector<16x16xf32>
    %76 = arith.mulf %3, %75 : vector<16x16xf32>
    %77 = arith.addf %73, %76 : vector<16x16xf32>
    %c11 = arith.constant 11 : index
    %78 = memref.load %arg1[%c11] : memref<144xf32, #tpu.memory_space<smem>>
    %79 = vector.broadcast %78 : f32 to vector<16x16xf32>
    %80 = arith.mulf %5, %79 : vector<16x16xf32>
    %81 = arith.addf %77, %80 : vector<16x16xf32>
    %c12 = arith.constant 12 : index
    %82 = memref.load %arg1[%c12] : memref<144xf32, #tpu.memory_space<smem>>
    %83 = vector.broadcast %82 : f32 to vector<16x16xf32>
    %84 = arith.mulf %7, %83 : vector<16x16xf32>
    %85 = arith.addf %81, %84 : vector<16x16xf32>
    %c13 = arith.constant 13 : index
    %86 = memref.load %arg1[%c13] : memref<144xf32, #tpu.memory_space<smem>>
    %87 = vector.broadcast %86 : f32 to vector<16x16xf32>
    %88 = arith.mulf %9, %87 : vector<16x16xf32>
    %89 = arith.addf %85, %88 : vector<16x16xf32>
    %c14 = arith.constant 14 : index
    %90 = memref.load %arg1[%c14] : memref<144xf32, #tpu.memory_space<smem>>
    %91 = vector.broadcast %90 : f32 to vector<16x16xf32>
    %92 = arith.mulf %11, %91 : vector<16x16xf32>
    %93 = arith.addf %89, %92 : vector<16x16xf32>
    %c15 = arith.constant 15 : index
    %94 = memref.load %arg1[%c15] : memref<144xf32, #tpu.memory_space<smem>>
    %95 = vector.broadcast %94 : f32 to vector<16x16xf32>
    %96 = arith.mulf %13, %95 : vector<16x16xf32>
    %97 = arith.addf %93, %96 : vector<16x16xf32>
    %c16 = arith.constant 16 : index
    %98 = memref.load %arg1[%c16] : memref<144xf32, #tpu.memory_space<smem>>
    %99 = vector.broadcast %98 : f32 to vector<16x16xf32>
    %100 = arith.mulf %15, %99 : vector<16x16xf32>
    %101 = arith.addf %97, %100 : vector<16x16xf32>
    %c17 = arith.constant 17 : index
    %102 = memref.load %arg1[%c17] : memref<144xf32, #tpu.memory_space<smem>>
    %103 = vector.broadcast %102 : f32 to vector<16x16xf32>
    %104 = arith.mulf %17, %103 : vector<16x16xf32>
    %105 = arith.addf %101, %104 : vector<16x16xf32>
    %c1_41 = arith.constant 1 : index
    %106 = memref.load %arg2[%c1_41] : memref<16xf32, #tpu.memory_space<smem>>
    %107 = vector.broadcast %106 : f32 to vector<16x16xf32>
    %108 = arith.addf %105, %107 : vector<16x16xf32>
    %109 = arith.truncf %108 : vector<16x16xf32> to vector<16x16xbf16>
    %c0_42 = arith.constant 0 : index
    %c1_43 = arith.constant 1 : index
    %c0_44 = arith.constant 0 : index
    %c0_45 = arith.constant 0 : index
    %110 = vector.load %arg4[%c0_42, %c1_43, %c0_44, %c0_45] : memref<1x16x16x16xbf16, #tpu.memory_space<vmem>>, vector<1x1x16x16xbf16>
    %111 = vector.shape_cast %110 : vector<1x1x16x16xbf16> to vector<16x16xbf16>
    %112 = vector.shape_cast %109 : vector<16x16xbf16> to vector<1x1x16x16xbf16>
    tpu.vector_store %arg4[%c0_42, %c1_43, %c0_44, %c0_45], %112 {strides = array<i32>} : memref<1x16x16x16xbf16, #tpu.memory_space<vmem>>, vector<1x1x16x16xbf16>,
    %cst_46 = arith.constant dense<0.000000e+00> : vector<16xf32>
    %113 = vector.multi_reduction <add>, %108, %cst_46 [0] : vector<16x16xf32> to vector<16xf32>
    %114 = vector.shape_cast %113 : vector<16xf32> to vector<1x16xf32>
    %c0_47 = arith.constant 0 : index
    %c1_48 = arith.constant 1 : index
    %c0_49 = arith.constant 0 : index
    %c0_50 = arith.constant 0 : index
    %115 = vector.load %arg5[%c0_47, %c1_48, %c0_49, %c0_50] : memref<1x16x1x16xf32, #tpu.memory_space<vmem>>, vector<1x1x1x16xf32>
    %116 = vector.shape_cast %115 : vector<1x1x1x16xf32> to vector<1x16xf32>
    %117 = vector.shape_cast %114 : vector<1x16xf32> to vector<1x1x1x16xf32>
    tpu.vector_store %arg5[%c0_47, %c1_48, %c0_49, %c0_50], %117 {strides = array<i32>} : memref<1x16x1x16xf32, #tpu.memory_space<vmem>>, vector<1x1x1x16xf32>,
    %118 = arith.mulf %108, %108 : vector<16x16xf32>
    %cst_51 = arith.constant dense<0.000000e+00> : vector<16xf32>
    %119 = vector.multi_reduction <add>, %118, %cst_51 [0] : vector<16x16xf32> to vector<16xf32>
    %120 = vector.shape_cast %119 : vector<16xf32> to vector<1x16xf32>
    %c0_52 = arith.constant 0 : index
    %c1_53 = arith.constant 1 : index
    %c0_54 = arith.constant 0 : index
    %c0_55 = arith.constant 0 : index
    %121 = vector.load %arg6[%c0_52, %c1_53, %c0_54, %c0_55] : memref<1x16x1x16xf32, #tpu.memory_space<vmem>>, vector<1x1x1x16xf32>
    %122 = vector.shape_cast %121 : vector<1x1x1x16xf32> to vector<1x16xf32>
    %123 = vector.shape_cast %120 : vector<1x16xf32> to vector<1x1x1x16xf32>
    tpu.vector_store %arg6[%c0_52, %c1_53, %c0_54, %c0_55], %123 {strides = array<i32>} : memref<1x16x1x16xf32, #tpu.memory_space<vmem>>, vector<1x1x1x16xf32>,
    %c18 = arith.constant 18 : index
    %124 = memref.load %arg1[%c18] : memref<144xf32, #tpu.memory_space<smem>>
    %125 = vector.broadcast %124 : f32 to vector<16x16xf32>
    %126 = arith.mulf %1, %125 : vector<16x16xf32>
    %c19 = arith.constant 19 : index
    %127 = memref.load %arg1[%c19] : memref<144xf32, #tpu.memory_space<smem>>
    %128 = vector.broadcast %127 : f32 to vector<16x16xf32>
    %129 = arith.mulf %3, %128 : vector<16x16xf32>
    %130 = arith.addf %126, %129 : vector<16x16xf32>
    %c20 = arith.constant 20 : index
    %131 = memref.load %arg1[%c20] : memref<144xf32, #tpu.memory_space<smem>>
    %132 = vector.broadcast %131 : f32 to vector<16x16xf32>
    %133 = arith.mulf %5, %132 : vector<16x16xf32>
    %134 = arith.addf %130, %133 : vector<16x16xf32>
    %c21 = arith.constant 21 : index
    %135 = memref.load %arg1[%c21] : memref<144xf32, #tpu.memory_space<smem>>
    %136 = vector.broadcast %135 : f32 to vector<16x16xf32>
    %137 = arith.mulf %7, %136 : vector<16x16xf32>
    %138 = arith.addf %134, %137 : vector<16x16xf32>
    %c22 = arith.constant 22 : index
    %139 = memref.load %arg1[%c22] : memref<144xf32, #tpu.memory_space<smem>>
    %140 = vector.broadcast %139 : f32 to vector<16x16xf32>
    %141 = arith.mulf %9, %140 : vector<16x16xf32>
    %142 = arith.addf %138, %141 : vector<16x16xf32>
    %c23 = arith.constant 23 : index
    %143 = memref.load %arg1[%c23] : memref<144xf32, #tpu.memory_space<smem>>
    %144 = vector.broadcast %143 : f32 to vector<16x16xf32>
    %145 = arith.mulf %11, %144 : vector<16x16xf32>
    %146 = arith.addf %142, %145 : vector<16x16xf32>
    %c24 = arith.constant 24 : index
    %147 = memref.load %arg1[%c24] : memref<144xf32, #tpu.memory_space<smem>>
    %148 = vector.broadcast %147 : f32 to vector<16x16xf32>
    %149 = arith.mulf %13, %148 : vector<16x16xf32>
    %150 = arith.addf %146, %149 : vector<16x16xf32>
    %c25 = arith.constant 25 : index
    %151 = memref.load %arg1[%c25] : memref<144xf32, #tpu.memory_space<smem>>
    %152 = vector.broadcast %151 : f32 to vector<16x16xf32>
    %153 = arith.mulf %15, %152 : vector<16x16xf32>
    %154 = arith.addf %150, %153 : vector<16x16xf32>
    %c26 = arith.constant 26 : index
    %155 = memref.load %arg1[%c26] : memref<144xf32, #tpu.memory_space<smem>>
    %156 = vector.broadcast %155 : f32 to vector<16x16xf32>
    %157 = arith.mulf %17, %156 : vector<16x16xf32>
    %158 = arith.addf %154, %157 : vector<16x16xf32>
    %c2_56 = arith.constant 2 : index
    %159 = memref.load %arg2[%c2_56] : memref<16xf32, #tpu.memory_space<smem>>
    %160 = vector.broadcast %159 : f32 to vector<16x16xf32>
    %161 = arith.addf %158, %160 : vector<16x16xf32>
    %162 = arith.truncf %161 : vector<16x16xf32> to vector<16x16xbf16>
    %c0_57 = arith.constant 0 : index
    %c2_58 = arith.constant 2 : index
    %c0_59 = arith.constant 0 : index
    %c0_60 = arith.constant 0 : index
    %163 = vector.load %arg4[%c0_57, %c2_58, %c0_59, %c0_60] : memref<1x16x16x16xbf16, #tpu.memory_space<vmem>>, vector<1x1x16x16xbf16>
    %164 = vector.shape_cast %163 : vector<1x1x16x16xbf16> to vector<16x16xbf16>
    %165 = vector.shape_cast %162 : vector<16x16xbf16> to vector<1x1x16x16xbf16>
    tpu.vector_store %arg4[%c0_57, %c2_58, %c0_59, %c0_60], %165 {strides = array<i32>} : memref<1x16x16x16xbf16, #tpu.memory_space<vmem>>, vector<1x1x16x16xbf16>,
    %cst_61 = arith.constant dense<0.000000e+00> : vector<16xf32>
    %166 = vector.multi_reduction <add>, %161, %cst_61 [0] : vector<16x16xf32> to vector<16xf32>
    %167 = vector.shape_cast %166 : vector<16xf32> to vector<1x16xf32>
    %c0_62 = arith.constant 0 : index
    %c2_63 = arith.constant 2 : index
    %c0_64 = arith.constant 0 : index
    %c0_65 = arith.constant 0 : index
    %168 = vector.load %arg5[%c0_62, %c2_63, %c0_64, %c0_65] : memref<1x16x1x16xf32, #tpu.memory_space<vmem>>, vector<1x1x1x16xf32>
    %169 = vector.shape_cast %168 : vector<1x1x1x16xf32> to vector<1x16xf32>
    %170 = vector.shape_cast %167 : vector<1x16xf32> to vector<1x1x1x16xf32>
    tpu.vector_store %arg5[%c0_62, %c2_63, %c0_64, %c0_65], %170 {strides = array<i32>} : memref<1x16x1x16xf32, #tpu.memory_space<vmem>>, vector<1x1x1x16xf32>,
    %171 = arith.mulf %161, %161 : vector<16x16xf32>
    %cst_66 = arith.constant dense<0.000000e+00> : vector<16xf32>
    %172 = vector.multi_reduction <add>, %171, %cst_66 [0] : vector<16x16xf32> to vector<16xf32>
    %173 = vector.shape_cast %172 : vector<16xf32> to vector<1x16xf32>
    %c0_67 = arith.constant 0 : index
    %c2_68 = arith.constant 2 : index
    %c0_69 = arith.constant 0 : index
    %c0_70 = arith.constant 0 : index
    %174 = vector.load %arg6[%c0_67, %c2_68, %c0_69, %c0_70] : memref<1x16x1x16xf32, #tpu.memory_space<vmem>>, vector<1x1x1x16xf32>
    %175 = vector.shape_cast %174 : vector<1x1x1x16xf32> to vector<1x16xf32>
    %176 = vector.shape_cast %173 : vector<1x16xf32> to vector<1x1x1x16xf32>
    tpu.vector_store %arg6[%c0_67, %c2_68, %c0_69, %c0_70], %176 {strides = array<i32>} : memref<1x16x1x16xf32, #tpu.memory_space<vmem>>, vector<1x1x1x16xf32>,
    %c27 = arith.constant 27 : index
    %177 = memref.load %arg1[%c27] : memref<144xf32, #tpu.memory_space<smem>>
    %178 = vector.broadcast %177 : f32 to vector<16x16xf32>
    %179 = arith.mulf %1, %178 : vector<16x16xf32>
    %c28 = arith.constant 28 : index
    %180 = memref.load %arg1[%c28] : memref<144xf32, #tpu.memory_space<smem>>
    %181 = vector.broadcast %180 : f32 to vector<16x16xf32>
    %182 = arith.mulf %3, %181 : vector<16x16xf32>
    %183 = arith.addf %179, %182 : vector<16x16xf32>
    %c29 = arith.constant 29 : index
    %184 = memref.load %arg1[%c29] : memref<144xf32, #tpu.memory_space<smem>>
    %185 = vector.broadcast %184 : f32 to vector<16x16xf32>
    %186 = arith.mulf %5, %185 : vector<16x16xf32>
    %187 = arith.addf %183, %186 : vector<16x16xf32>
    %c30 = arith.constant 30 : index
    %188 = memref.load %arg1[%c30] : memref<144xf32, #tpu.memory_space<smem>>
    %189 = vector.broadcast %188 : f32 to vector<16x16xf32>
    %190 = arith.mulf %7, %189 : vector<16x16xf32>
    %191 = arith.addf %187, %190 : vector<16x16xf32>
    %c31 = arith.constant 31 : index
    %192 = memref.load %arg1[%c31] : memref<144xf32, #tpu.memory_space<smem>>
    %193 = vector.broadcast %192 : f32 to vector<16x16xf32>
    %194 = arith.mulf %9, %193 : vector<16x16xf32>
    %195 = arith.addf %191, %194 : vector<16x16xf32>
    %c32 = arith.constant 32 : index
    %196 = memref.load %arg1[%c32] : memref<144xf32, #tpu.memory_space<smem>>
    %197 = vector.broadcast %196 : f32 to vector<16x16xf32>
    %198 = arith.mulf %11, %197 : vector<16x16xf32>
    %199 = arith.addf %195, %198 : vector<16x16xf32>
    %c33 = arith.constant 33 : index
    %200 = memref.load %arg1[%c33] : memref<144xf32, #tpu.memory_space<smem>>
    %201 = vector.broadcast %200 : f32 to vector<16x16xf32>
    %202 = arith.mulf %13, %201 : vector<16x16xf32>
    %203 = arith.addf %199, %202 : vector<16x16xf32>
    %c34 = arith.constant 34 : index
    %204 = memref.load %arg1[%c34] : memref<144xf32, #tpu.memory_space<smem>>
    %205 = vector.broadcast %204 : f32 to vector<16x16xf32>
    %206 = arith.mulf %15, %205 : vector<16x16xf32>
    %207 = arith.addf %203, %206 : vector<16x16xf32>
    %c35 = arith.constant 35 : index
    %208 = memref.load %arg1[%c35] : memref<144xf32, #tpu.memory_space<smem>>
    %209 = vector.broadcast %208 : f32 to vector<16x16xf32>
    %210 = arith.mulf %17, %209 : vector<16x16xf32>
    %211 = arith.addf %207, %210 : vector<16x16xf32>
    %c3_71 = arith.constant 3 : index
    %212 = memref.load %arg2[%c3_71] : memref<16xf32, #tpu.memory_space<smem>>
    %213 = vector.broadcast %212 : f32 to vector<16x16xf32>
    %214 = arith.addf %211, %213 : vector<16x16xf32>
    %215 = arith.truncf %214 : vector<16x16xf32> to vector<16x16xbf16>
    %c0_72 = arith.constant 0 : index
    %c3_73 = arith.constant 3 : index
    %c0_74 = arith.constant 0 : index
    %c0_75 = arith.constant 0 : index
    %216 = vector.load %arg4[%c0_72, %c3_73, %c0_74, %c0_75] : memref<1x16x16x16xbf16, #tpu.memory_space<vmem>>, vector<1x1x16x16xbf16>
    %217 = vector.shape_cast %216 : vector<1x1x16x16xbf16> to vector<16x16xbf16>
    %218 = vector.shape_cast %215 : vector<16x16xbf16> to vector<1x1x16x16xbf16>
    tpu.vector_store %arg4[%c0_72, %c3_73, %c0_74, %c0_75], %218 {strides = array<i32>} : memref<1x16x16x16xbf16, #tpu.memory_space<vmem>>, vector<1x1x16x16xbf16>,
    %cst_76 = arith.constant dense<0.000000e+00> : vector<16xf32>
    %219 = vector.multi_reduction <add>, %214, %cst_76 [0] : vector<16x16xf32> to vector<16xf32>
    %220 = vector.shape_cast %219 : vector<16xf32> to vector<1x16xf32>
    %c0_77 = arith.constant 0 : index
    %c3_78 = arith.constant 3 : index
    %c0_79 = arith.constant 0 : index
    %c0_80 = arith.constant 0 : index
    %221 = vector.load %arg5[%c0_77, %c3_78, %c0_79, %c0_80] : memref<1x16x1x16xf32, #tpu.memory_space<vmem>>, vector<1x1x1x16xf32>
    %222 = vector.shape_cast %221 : vector<1x1x1x16xf32> to vector<1x16xf32>
    %223 = vector.shape_cast %220 : vector<1x16xf32> to vector<1x1x1x16xf32>
    tpu.vector_store %arg5[%c0_77, %c3_78, %c0_79, %c0_80], %223 {strides = array<i32>} : memref<1x16x1x16xf32, #tpu.memory_space<vmem>>, vector<1x1x1x16xf32>,
    %224 = arith.mulf %214, %214 : vector<16x16xf32>
    %cst_81 = arith.constant dense<0.000000e+00> : vector<16xf32>
    %225 = vector.multi_reduction <add>, %224, %cst_81 [0] : vector<16x16xf32> to vector<16xf32>
    %226 = vector.shape_cast %225 : vector<16xf32> to vector<1x16xf32>
    %c0_82 = arith.constant 0 : index
    %c3_83 = arith.constant 3 : index
    %c0_84 = arith.constant 0 : index
    %c0_85 = arith.constant 0 : index
    %227 = vector.load %arg6[%c0_82, %c3_83, %c0_84, %c0_85] : memref<1x16x1x16xf32, #tpu.memory_space<vmem>>, vector<1x1x1x16xf32>
    %228 = vector.shape_cast %227 : vector<1x1x1x16xf32> to vector<1x16xf32>
    %229 = vector.shape_cast %226 : vector<1x16xf32> to vector<1x1x1x16xf32>
    tpu.vector_store %arg6[%c0_82, %c3_83, %c0_84, %c0_85], %229 {strides = array<i32>} : memref<1x16x1x16xf32, #tpu.memory_space<vmem>>, vector<1x1x1x16xf32>,
    %c36 = arith.constant 36 : index
    %230 = memref.load %arg1[%c36] : memref<144xf32, #tpu.memory_space<smem>>
    %231 = vector.broadcast %230 : f32 to vector<16x16xf32>
    %232 = arith.mulf %1, %231 : vector<16x16xf32>
    %c37 = arith.constant 37 : index
    %233 = memref.load %arg1[%c37] : memref<144xf32, #tpu.memory_space<smem>>
    %234 = vector.broadcast %233 : f32 to vector<16x16xf32>
    %235 = arith.mulf %3, %234 : vector<16x16xf32>
    %236 = arith.addf %232, %235 : vector<16x16xf32>
    %c38 = arith.constant 38 : index
    %237 = memref.load %arg1[%c38] : memref<144xf32, #tpu.memory_space<smem>>
    %238 = vector.broadcast %237 : f32 to vector<16x16xf32>
    %239 = arith.mulf %5, %238 : vector<16x16xf32>
    %240 = arith.addf %236, %239 : vector<16x16xf32>
    %c39 = arith.constant 39 : index
    %241 = memref.load %arg1[%c39] : memref<144xf32, #tpu.memory_space<smem>>
    %242 = vector.broadcast %241 : f32 to vector<16x16xf32>
    %243 = arith.mulf %7, %242 : vector<16x16xf32>
    %244 = arith.addf %240, %243 : vector<16x16xf32>
    %c40 = arith.constant 40 : index
    %245 = memref.load %arg1[%c40] : memref<144xf32, #tpu.memory_space<smem>>
    %246 = vector.broadcast %245 : f32 to vector<16x16xf32>
    %247 = arith.mulf %9, %246 : vector<16x16xf32>
    %248 = arith.addf %244, %247 : vector<16x16xf32>
    %c41 = arith.constant 41 : index
    %249 = memref.load %arg1[%c41] : memref<144xf32, #tpu.memory_space<smem>>
    %250 = vector.broadcast %249 : f32 to vector<16x16xf32>
    %251 = arith.mulf %11, %250 : vector<16x16xf32>
    %252 = arith.addf %248, %251 : vector<16x16xf32>
    %c42 = arith.constant 42 : index
    %253 = memref.load %arg1[%c42] : memref<144xf32, #tpu.memory_space<smem>>
    %254 = vector.broadcast %253 : f32 to vector<16x16xf32>
    %255 = arith.mulf %13, %254 : vector<16x16xf32>
    %256 = arith.addf %252, %255 : vector<16x16xf32>
    %c43 = arith.constant 43 : index
    %257 = memref.load %arg1[%c43] : memref<144xf32, #tpu.memory_space<smem>>
    %258 = vector.broadcast %257 : f32 to vector<16x16xf32>
    %259 = arith.mulf %15, %258 : vector<16x16xf32>
    %260 = arith.addf %256, %259 : vector<16x16xf32>
    %c44 = arith.constant 44 : index
    %261 = memref.load %arg1[%c44] : memref<144xf32, #tpu.memory_space<smem>>
    %262 = vector.broadcast %261 : f32 to vector<16x16xf32>
    %263 = arith.mulf %17, %262 : vector<16x16xf32>
    %264 = arith.addf %260, %263 : vector<16x16xf32>
    %c4_86 = arith.constant 4 : index
    %265 = memref.load %arg2[%c4_86] : memref<16xf32, #tpu.memory_space<smem>>
    %266 = vector.broadcast %265 : f32 to vector<16x16xf32>
    %267 = arith.addf %264, %266 : vector<16x16xf32>
    %268 = arith.truncf %267 : vector<16x16xf32> to vector<16x16xbf16>
    %c0_87 = arith.constant 0 : index
    %c4_88 = arith.constant 4 : index
    %c0_89 = arith.constant 0 : index
    %c0_90 = arith.constant 0 : index
    %269 = vector.load %arg4[%c0_87, %c4_88, %c0_89, %c0_90] : memref<1x16x16x16xbf16, #tpu.memory_space<vmem>>, vector<1x1x16x16xbf16>
    %270 = vector.shape_cast %269 : vector<1x1x16x16xbf16> to vector<16x16xbf16>
    %271 = vector.shape_cast %268 : vector<16x16xbf16> to vector<1x1x16x16xbf16>
    tpu.vector_store %arg4[%c0_87, %c4_88, %c0_89, %c0_90], %271 {strides = array<i32>} : memref<1x16x16x16xbf16, #tpu.memory_space<vmem>>, vector<1x1x16x16xbf16>,
    %cst_91 = arith.constant dense<0.000000e+00> : vector<16xf32>
    %272 = vector.multi_reduction <add>, %267, %cst_91 [0] : vector<16x16xf32> to vector<16xf32>
    %273 = vector.shape_cast %272 : vector<16xf32> to vector<1x16xf32>
    %c0_92 = arith.constant 0 : index
    %c4_93 = arith.constant 4 : index
    %c0_94 = arith.constant 0 : index
    %c0_95 = arith.constant 0 : index
    %274 = vector.load %arg5[%c0_92, %c4_93, %c0_94, %c0_95] : memref<1x16x1x16xf32, #tpu.memory_space<vmem>>, vector<1x1x1x16xf32>
    %275 = vector.shape_cast %274 : vector<1x1x1x16xf32> to vector<1x16xf32>
    %276 = vector.shape_cast %273 : vector<1x16xf32> to vector<1x1x1x16xf32>
    tpu.vector_store %arg5[%c0_92, %c4_93, %c0_94, %c0_95], %276 {strides = array<i32>} : memref<1x16x1x16xf32, #tpu.memory_space<vmem>>, vector<1x1x1x16xf32>,
    %277 = arith.mulf %267, %267 : vector<16x16xf32>
    %cst_96 = arith.constant dense<0.000000e+00> : vector<16xf32>
    %278 = vector.multi_reduction <add>, %277, %cst_96 [0] : vector<16x16xf32> to vector<16xf32>
    %279 = vector.shape_cast %278 : vector<16xf32> to vector<1x16xf32>
    %c0_97 = arith.constant 0 : index
    %c4_98 = arith.constant 4 : index
    %c0_99 = arith.constant 0 : index
    %c0_100 = arith.constant 0 : index
    %280 = vector.load %arg6[%c0_97, %c4_98, %c0_99, %c0_100] : memref<1x16x1x16xf32, #tpu.memory_space<vmem>>, vector<1x1x1x16xf32>
    %281 = vector.shape_cast %280 : vector<1x1x1x16xf32> to vector<1x16xf32>
    %282 = vector.shape_cast %279 : vector<1x16xf32> to vector<1x1x1x16xf32>
    tpu.vector_store %arg6[%c0_97, %c4_98, %c0_99, %c0_100], %282 {strides = array<i32>} : memref<1x16x1x16xf32, #tpu.memory_space<vmem>>, vector<1x1x1x16xf32>,
    %c45 = arith.constant 45 : index
    %283 = memref.load %arg1[%c45] : memref<144xf32, #tpu.memory_space<smem>>
    %284 = vector.broadcast %283 : f32 to vector<16x16xf32>
    %285 = arith.mulf %1, %284 : vector<16x16xf32>
    %c46 = arith.constant 46 : index
    %286 = memref.load %arg1[%c46] : memref<144xf32, #tpu.memory_space<smem>>
    %287 = vector.broadcast %286 : f32 to vector<16x16xf32>
    %288 = arith.mulf %3, %287 : vector<16x16xf32>
    %289 = arith.addf %285, %288 : vector<16x16xf32>
    %c47 = arith.constant 47 : index
    %290 = memref.load %arg1[%c47] : memref<144xf32, #tpu.memory_space<smem>>
    %291 = vector.broadcast %290 : f32 to vector<16x16xf32>
    %292 = arith.mulf %5, %291 : vector<16x16xf32>
    %293 = arith.addf %289, %292 : vector<16x16xf32>
    %c48 = arith.constant 48 : index
    %294 = memref.load %arg1[%c48] : memref<144xf32, #tpu.memory_space<smem>>
    %295 = vector.broadcast %294 : f32 to vector<16x16xf32>
    %296 = arith.mulf %7, %295 : vector<16x16xf32>
    %297 = arith.addf %293, %296 : vector<16x16xf32>
    %c49 = arith.constant 49 : index
    %298 = memref.load %arg1[%c49] : memref<144xf32, #tpu.memory_space<smem>>
    %299 = vector.broadcast %298 : f32 to vector<16x16xf32>
    %300 = arith.mulf %9, %299 : vector<16x16xf32>
    %301 = arith.addf %297, %300 : vector<16x16xf32>
    %c50 = arith.constant 50 : index
    %302 = memref.load %arg1[%c50] : memref<144xf32, #tpu.memory_space<smem>>
    %303 = vector.broadcast %302 : f32 to vector<16x16xf32>
    %304 = arith.mulf %11, %303 : vector<16x16xf32>
    %305 = arith.addf %301, %304 : vector<16x16xf32>
    %c51 = arith.constant 51 : index
    %306 = memref.load %arg1[%c51] : memref<144xf32, #tpu.memory_space<smem>>
    %307 = vector.broadcast %306 : f32 to vector<16x16xf32>
    %308 = arith.mulf %13, %307 : vector<16x16xf32>
    %309 = arith.addf %305, %308 : vector<16x16xf32>
    %c52 = arith.constant 52 : index
    %310 = memref.load %arg1[%c52] : memref<144xf32, #tpu.memory_space<smem>>
    %311 = vector.broadcast %310 : f32 to vector<16x16xf32>
    %312 = arith.mulf %15, %311 : vector<16x16xf32>
    %313 = arith.addf %309, %312 : vector<16x16xf32>
    %c53 = arith.constant 53 : index
    %314 = memref.load %arg1[%c53] : memref<144xf32, #tpu.memory_space<smem>>
    %315 = vector.broadcast %314 : f32 to vector<16x16xf32>
    %316 = arith.mulf %17, %315 : vector<16x16xf32>
    %317 = arith.addf %313, %316 : vector<16x16xf32>
    %c5_101 = arith.constant 5 : index
    %318 = memref.load %arg2[%c5_101] : memref<16xf32, #tpu.memory_space<smem>>
    %319 = vector.broadcast %318 : f32 to vector<16x16xf32>
    %320 = arith.addf %317, %319 : vector<16x16xf32>
    %321 = arith.truncf %320 : vector<16x16xf32> to vector<16x16xbf16>
    %c0_102 = arith.constant 0 : index
    %c5_103 = arith.constant 5 : index
    %c0_104 = arith.constant 0 : index
    %c0_105 = arith.constant 0 : index
    %322 = vector.load %arg4[%c0_102, %c5_103, %c0_104, %c0_105] : memref<1x16x16x16xbf16, #tpu.memory_space<vmem>>, vector<1x1x16x16xbf16>
    %323 = vector.shape_cast %322 : vector<1x1x16x16xbf16> to vector<16x16xbf16>
    %324 = vector.shape_cast %321 : vector<16x16xbf16> to vector<1x1x16x16xbf16>
    tpu.vector_store %arg4[%c0_102, %c5_103, %c0_104, %c0_105], %324 {strides = array<i32>} : memref<1x16x16x16xbf16, #tpu.memory_space<vmem>>, vector<1x1x16x16xbf16>,
    %cst_106 = arith.constant dense<0.000000e+00> : vector<16xf32>
    %325 = vector.multi_reduction <add>, %320, %cst_106 [0] : vector<16x16xf32> to vector<16xf32>
    %326 = vector.shape_cast %325 : vector<16xf32> to vector<1x16xf32>
    %c0_107 = arith.constant 0 : index
    %c5_108 = arith.constant 5 : index
    %c0_109 = arith.constant 0 : index
    %c0_110 = arith.constant 0 : index
    %327 = vector.load %arg5[%c0_107, %c5_108, %c0_109, %c0_110] : memref<1x16x1x16xf32, #tpu.memory_space<vmem>>, vector<1x1x1x16xf32>
    %328 = vector.shape_cast %327 : vector<1x1x1x16xf32> to vector<1x16xf32>
    %329 = vector.shape_cast %326 : vector<1x16xf32> to vector<1x1x1x16xf32>
    tpu.vector_store %arg5[%c0_107, %c5_108, %c0_109, %c0_110], %329 {strides = array<i32>} : memref<1x16x1x16xf32, #tpu.memory_space<vmem>>, vector<1x1x1x16xf32>,
    %330 = arith.mulf %320, %320 : vector<16x16xf32>
    %cst_111 = arith.constant dense<0.000000e+00> : vector<16xf32>
    %331 = vector.multi_reduction <add>, %330, %cst_111 [0] : vector<16x16xf32> to vector<16xf32>
    %332 = vector.shape_cast %331 : vector<16xf32> to vector<1x16xf32>
    %c0_112 = arith.constant 0 : index
    %c5_113 = arith.constant 5 : index
    %c0_114 = arith.constant 0 : index
    %c0_115 = arith.constant 0 : index
    %333 = vector.load %arg6[%c0_112, %c5_113, %c0_114, %c0_115] : memref<1x16x1x16xf32, #tpu.memory_space<vmem>>, vector<1x1x1x16xf32>
    %334 = vector.shape_cast %333 : vector<1x1x1x16xf32> to vector<1x16xf32>
    %335 = vector.shape_cast %332 : vector<1x16xf32> to vector<1x1x1x16xf32>
    tpu.vector_store %arg6[%c0_112, %c5_113, %c0_114, %c0_115], %335 {strides = array<i32>} : memref<1x16x1x16xf32, #tpu.memory_space<vmem>>, vector<1x1x1x16xf32>,
    %c54 = arith.constant 54 : index
    %336 = memref.load %arg1[%c54] : memref<144xf32, #tpu.memory_space<smem>>
    %337 = vector.broadcast %336 : f32 to vector<16x16xf32>
    %338 = arith.mulf %1, %337 : vector<16x16xf32>
    %c55 = arith.constant 55 : index
    %339 = memref.load %arg1[%c55] : memref<144xf32, #tpu.memory_space<smem>>
    %340 = vector.broadcast %339 : f32 to vector<16x16xf32>
    %341 = arith.mulf %3, %340 : vector<16x16xf32>
    %342 = arith.addf %338, %341 : vector<16x16xf32>
    %c56 = arith.constant 56 : index
    %343 = memref.load %arg1[%c56] : memref<144xf32, #tpu.memory_space<smem>>
    %344 = vector.broadcast %343 : f32 to vector<16x16xf32>
    %345 = arith.mulf %5, %344 : vector<16x16xf32>
    %346 = arith.addf %342, %345 : vector<16x16xf32>
    %c57 = arith.constant 57 : index
    %347 = memref.load %arg1[%c57] : memref<144xf32, #tpu.memory_space<smem>>
    %348 = vector.broadcast %347 : f32 to vector<16x16xf32>
    %349 = arith.mulf %7, %348 : vector<16x16xf32>
    %350 = arith.addf %346, %349 : vector<16x16xf32>
    %c58 = arith.constant 58 : index
    %351 = memref.load %arg1[%c58] : memref<144xf32, #tpu.memory_space<smem>>
    %352 = vector.broadcast %351 : f32 to vector<16x16xf32>
    %353 = arith.mulf %9, %352 : vector<16x16xf32>
    %354 = arith.addf %350, %353 : vector<16x16xf32>
    %c59 = arith.constant 59 : index
    %355 = memref.load %arg1[%c59] : memref<144xf32, #tpu.memory_space<smem>>
    %356 = vector.broadcast %355 : f32 to vector<16x16xf32>
    %357 = arith.mulf %11, %356 : vector<16x16xf32>
    %358 = arith.addf %354, %357 : vector<16x16xf32>
    %c60 = arith.constant 60 : index
    %359 = memref.load %arg1[%c60] : memref<144xf32, #tpu.memory_space<smem>>
    %360 = vector.broadcast %359 : f32 to vector<16x16xf32>
    %361 = arith.mulf %13, %360 : vector<16x16xf32>
    %362 = arith.addf %358, %361 : vector<16x16xf32>
    %c61 = arith.constant 61 : index
    %363 = memref.load %arg1[%c61] : memref<144xf32, #tpu.memory_space<smem>>
    %364 = vector.broadcast %363 : f32 to vector<16x16xf32>
    %365 = arith.mulf %15, %364 : vector<16x16xf32>
    %366 = arith.addf %362, %365 : vector<16x16xf32>
    %c62 = arith.constant 62 : index
    %367 = memref.load %arg1[%c62] : memref<144xf32, #tpu.memory_space<smem>>
    %368 = vector.broadcast %367 : f32 to vector<16x16xf32>
    %369 = arith.mulf %17, %368 : vector<16x16xf32>
    %370 = arith.addf %366, %369 : vector<16x16xf32>
    %c6_116 = arith.constant 6 : index
    %371 = memref.load %arg2[%c6_116] : memref<16xf32, #tpu.memory_space<smem>>
    %372 = vector.broadcast %371 : f32 to vector<16x16xf32>
    %373 = arith.addf %370, %372 : vector<16x16xf32>
    %374 = arith.truncf %373 : vector<16x16xf32> to vector<16x16xbf16>
    %c0_117 = arith.constant 0 : index
    %c6_118 = arith.constant 6 : index
    %c0_119 = arith.constant 0 : index
    %c0_120 = arith.constant 0 : index
    %375 = vector.load %arg4[%c0_117, %c6_118, %c0_119, %c0_120] : memref<1x16x16x16xbf16, #tpu.memory_space<vmem>>, vector<1x1x16x16xbf16>
    %376 = vector.shape_cast %375 : vector<1x1x16x16xbf16> to vector<16x16xbf16>
    %377 = vector.shape_cast %374 : vector<16x16xbf16> to vector<1x1x16x16xbf16>
    tpu.vector_store %arg4[%c0_117, %c6_118, %c0_119, %c0_120], %377 {strides = array<i32>} : memref<1x16x16x16xbf16, #tpu.memory_space<vmem>>, vector<1x1x16x16xbf16>,
    %cst_121 = arith.constant dense<0.000000e+00> : vector<16xf32>
    %378 = vector.multi_reduction <add>, %373, %cst_121 [0] : vector<16x16xf32> to vector<16xf32>
    %379 = vector.shape_cast %378 : vector<16xf32> to vector<1x16xf32>
    %c0_122 = arith.constant 0 : index
    %c6_123 = arith.constant 6 : index
    %c0_124 = arith.constant 0 : index
    %c0_125 = arith.constant 0 : index
    %380 = vector.load %arg5[%c0_122, %c6_123, %c0_124, %c0_125] : memref<1x16x1x16xf32, #tpu.memory_space<vmem>>, vector<1x1x1x16xf32>
    %381 = vector.shape_cast %380 : vector<1x1x1x16xf32> to vector<1x16xf32>
    %382 = vector.shape_cast %379 : vector<1x16xf32> to vector<1x1x1x16xf32>
    tpu.vector_store %arg5[%c0_122, %c6_123, %c0_124, %c0_125], %382 {strides = array<i32>} : memref<1x16x1x16xf32, #tpu.memory_space<vmem>>, vector<1x1x1x16xf32>,
    %383 = arith.mulf %373, %373 : vector<16x16xf32>
    %cst_126 = arith.constant dense<0.000000e+00> : vector<16xf32>
    %384 = vector.multi_reduction <add>, %383, %cst_126 [0] : vector<16x16xf32> to vector<16xf32>
    %385 = vector.shape_cast %384 : vector<16xf32> to vector<1x16xf32>
    %c0_127 = arith.constant 0 : index
    %c6_128 = arith.constant 6 : index
    %c0_129 = arith.constant 0 : index
    %c0_130 = arith.constant 0 : index
    %386 = vector.load %arg6[%c0_127, %c6_128, %c0_129, %c0_130] : memref<1x16x1x16xf32, #tpu.memory_space<vmem>>, vector<1x1x1x16xf32>
    %387 = vector.shape_cast %386 : vector<1x1x1x16xf32> to vector<1x16xf32>
    %388 = vector.shape_cast %385 : vector<1x16xf32> to vector<1x1x1x16xf32>
    tpu.vector_store %arg6[%c0_127, %c6_128, %c0_129, %c0_130], %388 {strides = array<i32>} : memref<1x16x1x16xf32, #tpu.memory_space<vmem>>, vector<1x1x1x16xf32>,
    %c63 = arith.constant 63 : index
    %389 = memref.load %arg1[%c63] : memref<144xf32, #tpu.memory_space<smem>>
    %390 = vector.broadcast %389 : f32 to vector<16x16xf32>
    %391 = arith.mulf %1, %390 : vector<16x16xf32>
    %c64 = arith.constant 64 : index
    %392 = memref.load %arg1[%c64] : memref<144xf32, #tpu.memory_space<smem>>
    %393 = vector.broadcast %392 : f32 to vector<16x16xf32>
    %394 = arith.mulf %3, %393 : vector<16x16xf32>
    %395 = arith.addf %391, %394 : vector<16x16xf32>
    %c65 = arith.constant 65 : index
    %396 = memref.load %arg1[%c65] : memref<144xf32, #tpu.memory_space<smem>>
    %397 = vector.broadcast %396 : f32 to vector<16x16xf32>
    %398 = arith.mulf %5, %397 : vector<16x16xf32>
    %399 = arith.addf %395, %398 : vector<16x16xf32>
    %c66 = arith.constant 66 : index
    %400 = memref.load %arg1[%c66] : memref<144xf32, #tpu.memory_space<smem>>
    %401 = vector.broadcast %400 : f32 to vector<16x16xf32>
    %402 = arith.mulf %7, %401 : vector<16x16xf32>
    %403 = arith.addf %399, %402 : vector<16x16xf32>
    %c67 = arith.constant 67 : index
    %404 = memref.load %arg1[%c67] : memref<144xf32, #tpu.memory_space<smem>>
    %405 = vector.broadcast %404 : f32 to vector<16x16xf32>
    %406 = arith.mulf %9, %405 : vector<16x16xf32>
    %407 = arith.addf %403, %406 : vector<16x16xf32>
    %c68 = arith.constant 68 : index
    %408 = memref.load %arg1[%c68] : memref<144xf32, #tpu.memory_space<smem>>
    %409 = vector.broadcast %408 : f32 to vector<16x16xf32>
    %410 = arith.mulf %11, %409 : vector<16x16xf32>
    %411 = arith.addf %407, %410 : vector<16x16xf32>
    %c69 = arith.constant 69 : index
    %412 = memref.load %arg1[%c69] : memref<144xf32, #tpu.memory_space<smem>>
    %413 = vector.broadcast %412 : f32 to vector<16x16xf32>
    %414 = arith.mulf %13, %413 : vector<16x16xf32>
    %415 = arith.addf %411, %414 : vector<16x16xf32>
    %c70 = arith.constant 70 : index
    %416 = memref.load %arg1[%c70] : memref<144xf32, #tpu.memory_space<smem>>
    %417 = vector.broadcast %416 : f32 to vector<16x16xf32>
    %418 = arith.mulf %15, %417 : vector<16x16xf32>
    %419 = arith.addf %415, %418 : vector<16x16xf32>
    %c71 = arith.constant 71 : index
    %420 = memref.load %arg1[%c71] : memref<144xf32, #tpu.memory_space<smem>>
    %421 = vector.broadcast %420 : f32 to vector<16x16xf32>
    %422 = arith.mulf %17, %421 : vector<16x16xf32>
    %423 = arith.addf %419, %422 : vector<16x16xf32>
    %c7_131 = arith.constant 7 : index
    %424 = memref.load %arg2[%c7_131] : memref<16xf32, #tpu.memory_space<smem>>
    %425 = vector.broadcast %424 : f32 to vector<16x16xf32>
    %426 = arith.addf %423, %425 : vector<16x16xf32>
    %427 = arith.truncf %426 : vector<16x16xf32> to vector<16x16xbf16>
    %c0_132 = arith.constant 0 : index
    %c7_133 = arith.constant 7 : index
    %c0_134 = arith.constant 0 : index
    %c0_135 = arith.constant 0 : index
    %428 = vector.load %arg4[%c0_132, %c7_133, %c0_134, %c0_135] : memref<1x16x16x16xbf16, #tpu.memory_space<vmem>>, vector<1x1x16x16xbf16>
    %429 = vector.shape_cast %428 : vector<1x1x16x16xbf16> to vector<16x16xbf16>
    %430 = vector.shape_cast %427 : vector<16x16xbf16> to vector<1x1x16x16xbf16>
    tpu.vector_store %arg4[%c0_132, %c7_133, %c0_134, %c0_135], %430 {strides = array<i32>} : memref<1x16x16x16xbf16, #tpu.memory_space<vmem>>, vector<1x1x16x16xbf16>,
    %cst_136 = arith.constant dense<0.000000e+00> : vector<16xf32>
    %431 = vector.multi_reduction <add>, %426, %cst_136 [0] : vector<16x16xf32> to vector<16xf32>
    %432 = vector.shape_cast %431 : vector<16xf32> to vector<1x16xf32>
    %c0_137 = arith.constant 0 : index
    %c7_138 = arith.constant 7 : index
    %c0_139 = arith.constant 0 : index
    %c0_140 = arith.constant 0 : index
    %433 = vector.load %arg5[%c0_137, %c7_138, %c0_139, %c0_140] : memref<1x16x1x16xf32, #tpu.memory_space<vmem>>, vector<1x1x1x16xf32>
    %434 = vector.shape_cast %433 : vector<1x1x1x16xf32> to vector<1x16xf32>
    %435 = vector.shape_cast %432 : vector<1x16xf32> to vector<1x1x1x16xf32>
    tpu.vector_store %arg5[%c0_137, %c7_138, %c0_139, %c0_140], %435 {strides = array<i32>} : memref<1x16x1x16xf32, #tpu.memory_space<vmem>>, vector<1x1x1x16xf32>,
    %436 = arith.mulf %426, %426 : vector<16x16xf32>
    %cst_141 = arith.constant dense<0.000000e+00> : vector<16xf32>
    %437 = vector.multi_reduction <add>, %436, %cst_141 [0] : vector<16x16xf32> to vector<16xf32>
    %438 = vector.shape_cast %437 : vector<16xf32> to vector<1x16xf32>
    %c0_142 = arith.constant 0 : index
    %c7_143 = arith.constant 7 : index
    %c0_144 = arith.constant 0 : index
    %c0_145 = arith.constant 0 : index
    %439 = vector.load %arg6[%c0_142, %c7_143, %c0_144, %c0_145] : memref<1x16x1x16xf32, #tpu.memory_space<vmem>>, vector<1x1x1x16xf32>
    %440 = vector.shape_cast %439 : vector<1x1x1x16xf32> to vector<1x16xf32>
    %441 = vector.shape_cast %438 : vector<1x16xf32> to vector<1x1x1x16xf32>
    tpu.vector_store %arg6[%c0_142, %c7_143, %c0_144, %c0_145], %441 {strides = array<i32>} : memref<1x16x1x16xf32, #tpu.memory_space<vmem>>, vector<1x1x1x16xf32>,
    %c72 = arith.constant 72 : index
    %442 = memref.load %arg1[%c72] : memref<144xf32, #tpu.memory_space<smem>>
    %443 = vector.broadcast %442 : f32 to vector<16x16xf32>
    %444 = arith.mulf %1, %443 : vector<16x16xf32>
    %c73 = arith.constant 73 : index
    %445 = memref.load %arg1[%c73] : memref<144xf32, #tpu.memory_space<smem>>
    %446 = vector.broadcast %445 : f32 to vector<16x16xf32>
    %447 = arith.mulf %3, %446 : vector<16x16xf32>
    %448 = arith.addf %444, %447 : vector<16x16xf32>
    %c74 = arith.constant 74 : index
    %449 = memref.load %arg1[%c74] : memref<144xf32, #tpu.memory_space<smem>>
    %450 = vector.broadcast %449 : f32 to vector<16x16xf32>
    %451 = arith.mulf %5, %450 : vector<16x16xf32>
    %452 = arith.addf %448, %451 : vector<16x16xf32>
    %c75 = arith.constant 75 : index
    %453 = memref.load %arg1[%c75] : memref<144xf32, #tpu.memory_space<smem>>
    %454 = vector.broadcast %453 : f32 to vector<16x16xf32>
    %455 = arith.mulf %7, %454 : vector<16x16xf32>
    %456 = arith.addf %452, %455 : vector<16x16xf32>
    %c76 = arith.constant 76 : index
    %457 = memref.load %arg1[%c76] : memref<144xf32, #tpu.memory_space<smem>>
    %458 = vector.broadcast %457 : f32 to vector<16x16xf32>
    %459 = arith.mulf %9, %458 : vector<16x16xf32>
    %460 = arith.addf %456, %459 : vector<16x16xf32>
    %c77 = arith.constant 77 : index
    %461 = memref.load %arg1[%c77] : memref<144xf32, #tpu.memory_space<smem>>
    %462 = vector.broadcast %461 : f32 to vector<16x16xf32>
    %463 = arith.mulf %11, %462 : vector<16x16xf32>
    %464 = arith.addf %460, %463 : vector<16x16xf32>
    %c78 = arith.constant 78 : index
    %465 = memref.load %arg1[%c78] : memref<144xf32, #tpu.memory_space<smem>>
    %466 = vector.broadcast %465 : f32 to vector<16x16xf32>
    %467 = arith.mulf %13, %466 : vector<16x16xf32>
    %468 = arith.addf %464, %467 : vector<16x16xf32>
    %c79 = arith.constant 79 : index
    %469 = memref.load %arg1[%c79] : memref<144xf32, #tpu.memory_space<smem>>
    %470 = vector.broadcast %469 : f32 to vector<16x16xf32>
    %471 = arith.mulf %15, %470 : vector<16x16xf32>
    %472 = arith.addf %468, %471 : vector<16x16xf32>
    %c80 = arith.constant 80 : index
    %473 = memref.load %arg1[%c80] : memref<144xf32, #tpu.memory_space<smem>>
    %474 = vector.broadcast %473 : f32 to vector<16x16xf32>
    %475 = arith.mulf %17, %474 : vector<16x16xf32>
    %476 = arith.addf %472, %475 : vector<16x16xf32>
    %c8_146 = arith.constant 8 : index
    %477 = memref.load %arg2[%c8_146] : memref<16xf32, #tpu.memory_space<smem>>
    %478 = vector.broadcast %477 : f32 to vector<16x16xf32>
    %479 = arith.addf %476, %478 : vector<16x16xf32>
    %480 = arith.truncf %479 : vector<16x16xf32> to vector<16x16xbf16>
    %c0_147 = arith.constant 0 : index
    %c8_148 = arith.constant 8 : index
    %c0_149 = arith.constant 0 : index
    %c0_150 = arith.constant 0 : index
    %481 = vector.load %arg4[%c0_147, %c8_148, %c0_149, %c0_150] : memref<1x16x16x16xbf16, #tpu.memory_space<vmem>>, vector<1x1x16x16xbf16>
    %482 = vector.shape_cast %481 : vector<1x1x16x16xbf16> to vector<16x16xbf16>
    %483 = vector.shape_cast %480 : vector<16x16xbf16> to vector<1x1x16x16xbf16>
    tpu.vector_store %arg4[%c0_147, %c8_148, %c0_149, %c0_150], %483 {strides = array<i32>} : memref<1x16x16x16xbf16, #tpu.memory_space<vmem>>, vector<1x1x16x16xbf16>,
    %cst_151 = arith.constant dense<0.000000e+00> : vector<16xf32>
    %484 = vector.multi_reduction <add>, %479, %cst_151 [0] : vector<16x16xf32> to vector<16xf32>
    %485 = vector.shape_cast %484 : vector<16xf32> to vector<1x16xf32>
    %c0_152 = arith.constant 0 : index
    %c8_153 = arith.constant 8 : index
    %c0_154 = arith.constant 0 : index
    %c0_155 = arith.constant 0 : index
    %486 = vector.load %arg5[%c0_152, %c8_153, %c0_154, %c0_155] : memref<1x16x1x16xf32, #tpu.memory_space<vmem>>, vector<1x1x1x16xf32>
    %487 = vector.shape_cast %486 : vector<1x1x1x16xf32> to vector<1x16xf32>
    %488 = vector.shape_cast %485 : vector<1x16xf32> to vector<1x1x1x16xf32>
    tpu.vector_store %arg5[%c0_152, %c8_153, %c0_154, %c0_155], %488 {strides = array<i32>} : memref<1x16x1x16xf32, #tpu.memory_space<vmem>>, vector<1x1x1x16xf32>,
    %489 = arith.mulf %479, %479 : vector<16x16xf32>
    %cst_156 = arith.constant dense<0.000000e+00> : vector<16xf32>
    %490 = vector.multi_reduction <add>, %489, %cst_156 [0] : vector<16x16xf32> to vector<16xf32>
    %491 = vector.shape_cast %490 : vector<16xf32> to vector<1x16xf32>
    %c0_157 = arith.constant 0 : index
    %c8_158 = arith.constant 8 : index
    %c0_159 = arith.constant 0 : index
    %c0_160 = arith.constant 0 : index
    %492 = vector.load %arg6[%c0_157, %c8_158, %c0_159, %c0_160] : memref<1x16x1x16xf32, #tpu.memory_space<vmem>>, vector<1x1x1x16xf32>
    %493 = vector.shape_cast %492 : vector<1x1x1x16xf32> to vector<1x16xf32>
    %494 = vector.shape_cast %491 : vector<1x16xf32> to vector<1x1x1x16xf32>
    tpu.vector_store %arg6[%c0_157, %c8_158, %c0_159, %c0_160], %494 {strides = array<i32>} : memref<1x16x1x16xf32, #tpu.memory_space<vmem>>, vector<1x1x1x16xf32>,
    %c81 = arith.constant 81 : index
    %495 = memref.load %arg1[%c81] : memref<144xf32, #tpu.memory_space<smem>>
    %496 = vector.broadcast %495 : f32 to vector<16x16xf32>
    %497 = arith.mulf %1, %496 : vector<16x16xf32>
    %c82 = arith.constant 82 : index
    %498 = memref.load %arg1[%c82] : memref<144xf32, #tpu.memory_space<smem>>
    %499 = vector.broadcast %498 : f32 to vector<16x16xf32>
    %500 = arith.mulf %3, %499 : vector<16x16xf32>
    %501 = arith.addf %497, %500 : vector<16x16xf32>
    %c83 = arith.constant 83 : index
    %502 = memref.load %arg1[%c83] : memref<144xf32, #tpu.memory_space<smem>>
    %503 = vector.broadcast %502 : f32 to vector<16x16xf32>
    %504 = arith.mulf %5, %503 : vector<16x16xf32>
    %505 = arith.addf %501, %504 : vector<16x16xf32>
    %c84 = arith.constant 84 : index
    %506 = memref.load %arg1[%c84] : memref<144xf32, #tpu.memory_space<smem>>
    %507 = vector.broadcast %506 : f32 to vector<16x16xf32>
    %508 = arith.mulf %7, %507 : vector<16x16xf32>
    %509 = arith.addf %505, %508 : vector<16x16xf32>
    %c85 = arith.constant 85 : index
    %510 = memref.load %arg1[%c85] : memref<144xf32, #tpu.memory_space<smem>>
    %511 = vector.broadcast %510 : f32 to vector<16x16xf32>
    %512 = arith.mulf %9, %511 : vector<16x16xf32>
    %513 = arith.addf %509, %512 : vector<16x16xf32>
    %c86 = arith.constant 86 : index
    %514 = memref.load %arg1[%c86] : memref<144xf32, #tpu.memory_space<smem>>
    %515 = vector.broadcast %514 : f32 to vector<16x16xf32>
    %516 = arith.mulf %11, %515 : vector<16x16xf32>
    %517 = arith.addf %513, %516 : vector<16x16xf32>
    %c87 = arith.constant 87 : index
    %518 = memref.load %arg1[%c87] : memref<144xf32, #tpu.memory_space<smem>>
    %519 = vector.broadcast %518 : f32 to vector<16x16xf32>
    %520 = arith.mulf %13, %519 : vector<16x16xf32>
    %521 = arith.addf %517, %520 : vector<16x16xf32>
    %c88 = arith.constant 88 : index
    %522 = memref.load %arg1[%c88] : memref<144xf32, #tpu.memory_space<smem>>
    %523 = vector.broadcast %522 : f32 to vector<16x16xf32>
    %524 = arith.mulf %15, %523 : vector<16x16xf32>
    %525 = arith.addf %521, %524 : vector<16x16xf32>
    %c89 = arith.constant 89 : index
    %526 = memref.load %arg1[%c89] : memref<144xf32, #tpu.memory_space<smem>>
    %527 = vector.broadcast %526 : f32 to vector<16x16xf32>
    %528 = arith.mulf %17, %527 : vector<16x16xf32>
    %529 = arith.addf %525, %528 : vector<16x16xf32>
    %c9_161 = arith.constant 9 : index
    %530 = memref.load %arg2[%c9_161] : memref<16xf32, #tpu.memory_space<smem>>
    %531 = vector.broadcast %530 : f32 to vector<16x16xf32>
    %532 = arith.addf %529, %531 : vector<16x16xf32>
    %533 = arith.truncf %532 : vector<16x16xf32> to vector<16x16xbf16>
    %c0_162 = arith.constant 0 : index
    %c9_163 = arith.constant 9 : index
    %c0_164 = arith.constant 0 : index
    %c0_165 = arith.constant 0 : index
    %534 = vector.load %arg4[%c0_162, %c9_163, %c0_164, %c0_165] : memref<1x16x16x16xbf16, #tpu.memory_space<vmem>>, vector<1x1x16x16xbf16>
    %535 = vector.shape_cast %534 : vector<1x1x16x16xbf16> to vector<16x16xbf16>
    %536 = vector.shape_cast %533 : vector<16x16xbf16> to vector<1x1x16x16xbf16>
    tpu.vector_store %arg4[%c0_162, %c9_163, %c0_164, %c0_165], %536 {strides = array<i32>} : memref<1x16x16x16xbf16, #tpu.memory_space<vmem>>, vector<1x1x16x16xbf16>,
    %cst_166 = arith.constant dense<0.000000e+00> : vector<16xf32>
    %537 = vector.multi_reduction <add>, %532, %cst_166 [0] : vector<16x16xf32> to vector<16xf32>
    %538 = vector.shape_cast %537 : vector<16xf32> to vector<1x16xf32>
    %c0_167 = arith.constant 0 : index
    %c9_168 = arith.constant 9 : index
    %c0_169 = arith.constant 0 : index
    %c0_170 = arith.constant 0 : index
    %539 = vector.load %arg5[%c0_167, %c9_168, %c0_169, %c0_170] : memref<1x16x1x16xf32, #tpu.memory_space<vmem>>, vector<1x1x1x16xf32>
    %540 = vector.shape_cast %539 : vector<1x1x1x16xf32> to vector<1x16xf32>
    %541 = vector.shape_cast %538 : vector<1x16xf32> to vector<1x1x1x16xf32>
    tpu.vector_store %arg5[%c0_167, %c9_168, %c0_169, %c0_170], %541 {strides = array<i32>} : memref<1x16x1x16xf32, #tpu.memory_space<vmem>>, vector<1x1x1x16xf32>,
    %542 = arith.mulf %532, %532 : vector<16x16xf32>
    %cst_171 = arith.constant dense<0.000000e+00> : vector<16xf32>
    %543 = vector.multi_reduction <add>, %542, %cst_171 [0] : vector<16x16xf32> to vector<16xf32>
    %544 = vector.shape_cast %543 : vector<16xf32> to vector<1x16xf32>
    %c0_172 = arith.constant 0 : index
    %c9_173 = arith.constant 9 : index
    %c0_174 = arith.constant 0 : index
    %c0_175 = arith.constant 0 : index
    %545 = vector.load %arg6[%c0_172, %c9_173, %c0_174, %c0_175] : memref<1x16x1x16xf32, #tpu.memory_space<vmem>>, vector<1x1x1x16xf32>
    %546 = vector.shape_cast %545 : vector<1x1x1x16xf32> to vector<1x16xf32>
    %547 = vector.shape_cast %544 : vector<1x16xf32> to vector<1x1x1x16xf32>
    tpu.vector_store %arg6[%c0_172, %c9_173, %c0_174, %c0_175], %547 {strides = array<i32>} : memref<1x16x1x16xf32, #tpu.memory_space<vmem>>, vector<1x1x1x16xf32>,
    %c90 = arith.constant 90 : index
    %548 = memref.load %arg1[%c90] : memref<144xf32, #tpu.memory_space<smem>>
    %549 = vector.broadcast %548 : f32 to vector<16x16xf32>
    %550 = arith.mulf %1, %549 : vector<16x16xf32>
    %c91 = arith.constant 91 : index
    %551 = memref.load %arg1[%c91] : memref<144xf32, #tpu.memory_space<smem>>
    %552 = vector.broadcast %551 : f32 to vector<16x16xf32>
    %553 = arith.mulf %3, %552 : vector<16x16xf32>
    %554 = arith.addf %550, %553 : vector<16x16xf32>
    %c92 = arith.constant 92 : index
    %555 = memref.load %arg1[%c92] : memref<144xf32, #tpu.memory_space<smem>>
    %556 = vector.broadcast %555 : f32 to vector<16x16xf32>
    %557 = arith.mulf %5, %556 : vector<16x16xf32>
    %558 = arith.addf %554, %557 : vector<16x16xf32>
    %c93 = arith.constant 93 : index
    %559 = memref.load %arg1[%c93] : memref<144xf32, #tpu.memory_space<smem>>
    %560 = vector.broadcast %559 : f32 to vector<16x16xf32>
    %561 = arith.mulf %7, %560 : vector<16x16xf32>
    %562 = arith.addf %558, %561 : vector<16x16xf32>
    %c94 = arith.constant 94 : index
    %563 = memref.load %arg1[%c94] : memref<144xf32, #tpu.memory_space<smem>>
    %564 = vector.broadcast %563 : f32 to vector<16x16xf32>
    %565 = arith.mulf %9, %564 : vector<16x16xf32>
    %566 = arith.addf %562, %565 : vector<16x16xf32>
    %c95 = arith.constant 95 : index
    %567 = memref.load %arg1[%c95] : memref<144xf32, #tpu.memory_space<smem>>
    %568 = vector.broadcast %567 : f32 to vector<16x16xf32>
    %569 = arith.mulf %11, %568 : vector<16x16xf32>
    %570 = arith.addf %566, %569 : vector<16x16xf32>
    %c96 = arith.constant 96 : index
    %571 = memref.load %arg1[%c96] : memref<144xf32, #tpu.memory_space<smem>>
    %572 = vector.broadcast %571 : f32 to vector<16x16xf32>
    %573 = arith.mulf %13, %572 : vector<16x16xf32>
    %574 = arith.addf %570, %573 : vector<16x16xf32>
    %c97 = arith.constant 97 : index
    %575 = memref.load %arg1[%c97] : memref<144xf32, #tpu.memory_space<smem>>
    %576 = vector.broadcast %575 : f32 to vector<16x16xf32>
    %577 = arith.mulf %15, %576 : vector<16x16xf32>
    %578 = arith.addf %574, %577 : vector<16x16xf32>
    %c98 = arith.constant 98 : index
    %579 = memref.load %arg1[%c98] : memref<144xf32, #tpu.memory_space<smem>>
    %580 = vector.broadcast %579 : f32 to vector<16x16xf32>
    %581 = arith.mulf %17, %580 : vector<16x16xf32>
    %582 = arith.addf %578, %581 : vector<16x16xf32>
    %c10_176 = arith.constant 10 : index
    %583 = memref.load %arg2[%c10_176] : memref<16xf32, #tpu.memory_space<smem>>
    %584 = vector.broadcast %583 : f32 to vector<16x16xf32>
    %585 = arith.addf %582, %584 : vector<16x16xf32>
    %586 = arith.truncf %585 : vector<16x16xf32> to vector<16x16xbf16>
    %c0_177 = arith.constant 0 : index
    %c10_178 = arith.constant 10 : index
    %c0_179 = arith.constant 0 : index
    %c0_180 = arith.constant 0 : index
    %587 = vector.load %arg4[%c0_177, %c10_178, %c0_179, %c0_180] : memref<1x16x16x16xbf16, #tpu.memory_space<vmem>>, vector<1x1x16x16xbf16>
    %588 = vector.shape_cast %587 : vector<1x1x16x16xbf16> to vector<16x16xbf16>
    %589 = vector.shape_cast %586 : vector<16x16xbf16> to vector<1x1x16x16xbf16>
    tpu.vector_store %arg4[%c0_177, %c10_178, %c0_179, %c0_180], %589 {strides = array<i32>} : memref<1x16x16x16xbf16, #tpu.memory_space<vmem>>, vector<1x1x16x16xbf16>,
    %cst_181 = arith.constant dense<0.000000e+00> : vector<16xf32>
    %590 = vector.multi_reduction <add>, %585, %cst_181 [0] : vector<16x16xf32> to vector<16xf32>
    %591 = vector.shape_cast %590 : vector<16xf32> to vector<1x16xf32>
    %c0_182 = arith.constant 0 : index
    %c10_183 = arith.constant 10 : index
    %c0_184 = arith.constant 0 : index
    %c0_185 = arith.constant 0 : index
    %592 = vector.load %arg5[%c0_182, %c10_183, %c0_184, %c0_185] : memref<1x16x1x16xf32, #tpu.memory_space<vmem>>, vector<1x1x1x16xf32>
    %593 = vector.shape_cast %592 : vector<1x1x1x16xf32> to vector<1x16xf32>
    %594 = vector.shape_cast %591 : vector<1x16xf32> to vector<1x1x1x16xf32>
    tpu.vector_store %arg5[%c0_182, %c10_183, %c0_184, %c0_185], %594 {strides = array<i32>} : memref<1x16x1x16xf32, #tpu.memory_space<vmem>>, vector<1x1x1x16xf32>,
    %595 = arith.mulf %585, %585 : vector<16x16xf32>
    %cst_186 = arith.constant dense<0.000000e+00> : vector<16xf32>
    %596 = vector.multi_reduction <add>, %595, %cst_186 [0] : vector<16x16xf32> to vector<16xf32>
    %597 = vector.shape_cast %596 : vector<16xf32> to vector<1x16xf32>
    %c0_187 = arith.constant 0 : index
    %c10_188 = arith.constant 10 : index
    %c0_189 = arith.constant 0 : index
    %c0_190 = arith.constant 0 : index
    %598 = vector.load %arg6[%c0_187, %c10_188, %c0_189, %c0_190] : memref<1x16x1x16xf32, #tpu.memory_space<vmem>>, vector<1x1x1x16xf32>
    %599 = vector.shape_cast %598 : vector<1x1x1x16xf32> to vector<1x16xf32>
    %600 = vector.shape_cast %597 : vector<1x16xf32> to vector<1x1x1x16xf32>
    tpu.vector_store %arg6[%c0_187, %c10_188, %c0_189, %c0_190], %600 {strides = array<i32>} : memref<1x16x1x16xf32, #tpu.memory_space<vmem>>, vector<1x1x1x16xf32>,
    %c99 = arith.constant 99 : index
    %601 = memref.load %arg1[%c99] : memref<144xf32, #tpu.memory_space<smem>>
    %602 = vector.broadcast %601 : f32 to vector<16x16xf32>
    %603 = arith.mulf %1, %602 : vector<16x16xf32>
    %c100 = arith.constant 100 : index
    %604 = memref.load %arg1[%c100] : memref<144xf32, #tpu.memory_space<smem>>
    %605 = vector.broadcast %604 : f32 to vector<16x16xf32>
    %606 = arith.mulf %3, %605 : vector<16x16xf32>
    %607 = arith.addf %603, %606 : vector<16x16xf32>
    %c101 = arith.constant 101 : index
    %608 = memref.load %arg1[%c101] : memref<144xf32, #tpu.memory_space<smem>>
    %609 = vector.broadcast %608 : f32 to vector<16x16xf32>
    %610 = arith.mulf %5, %609 : vector<16x16xf32>
    %611 = arith.addf %607, %610 : vector<16x16xf32>
    %c102 = arith.constant 102 : index
    %612 = memref.load %arg1[%c102] : memref<144xf32, #tpu.memory_space<smem>>
    %613 = vector.broadcast %612 : f32 to vector<16x16xf32>
    %614 = arith.mulf %7, %613 : vector<16x16xf32>
    %615 = arith.addf %611, %614 : vector<16x16xf32>
    %c103 = arith.constant 103 : index
    %616 = memref.load %arg1[%c103] : memref<144xf32, #tpu.memory_space<smem>>
    %617 = vector.broadcast %616 : f32 to vector<16x16xf32>
    %618 = arith.mulf %9, %617 : vector<16x16xf32>
    %619 = arith.addf %615, %618 : vector<16x16xf32>
    %c104 = arith.constant 104 : index
    %620 = memref.load %arg1[%c104] : memref<144xf32, #tpu.memory_space<smem>>
    %621 = vector.broadcast %620 : f32 to vector<16x16xf32>
    %622 = arith.mulf %11, %621 : vector<16x16xf32>
    %623 = arith.addf %619, %622 : vector<16x16xf32>
    %c105 = arith.constant 105 : index
    %624 = memref.load %arg1[%c105] : memref<144xf32, #tpu.memory_space<smem>>
    %625 = vector.broadcast %624 : f32 to vector<16x16xf32>
    %626 = arith.mulf %13, %625 : vector<16x16xf32>
    %627 = arith.addf %623, %626 : vector<16x16xf32>
    %c106 = arith.constant 106 : index
    %628 = memref.load %arg1[%c106] : memref<144xf32, #tpu.memory_space<smem>>
    %629 = vector.broadcast %628 : f32 to vector<16x16xf32>
    %630 = arith.mulf %15, %629 : vector<16x16xf32>
    %631 = arith.addf %627, %630 : vector<16x16xf32>
    %c107 = arith.constant 107 : index
    %632 = memref.load %arg1[%c107] : memref<144xf32, #tpu.memory_space<smem>>
    %633 = vector.broadcast %632 : f32 to vector<16x16xf32>
    %634 = arith.mulf %17, %633 : vector<16x16xf32>
    %635 = arith.addf %631, %634 : vector<16x16xf32>
    %c11_191 = arith.constant 11 : index
    %636 = memref.load %arg2[%c11_191] : memref<16xf32, #tpu.memory_space<smem>>
    %637 = vector.broadcast %636 : f32 to vector<16x16xf32>
    %638 = arith.addf %635, %637 : vector<16x16xf32>
    %639 = arith.truncf %638 : vector<16x16xf32> to vector<16x16xbf16>
    %c0_192 = arith.constant 0 : index
    %c11_193 = arith.constant 11 : index
    %c0_194 = arith.constant 0 : index
    %c0_195 = arith.constant 0 : index
    %640 = vector.load %arg4[%c0_192, %c11_193, %c0_194, %c0_195] : memref<1x16x16x16xbf16, #tpu.memory_space<vmem>>, vector<1x1x16x16xbf16>
    %641 = vector.shape_cast %640 : vector<1x1x16x16xbf16> to vector<16x16xbf16>
    %642 = vector.shape_cast %639 : vector<16x16xbf16> to vector<1x1x16x16xbf16>
    tpu.vector_store %arg4[%c0_192, %c11_193, %c0_194, %c0_195], %642 {strides = array<i32>} : memref<1x16x16x16xbf16, #tpu.memory_space<vmem>>, vector<1x1x16x16xbf16>,
    %cst_196 = arith.constant dense<0.000000e+00> : vector<16xf32>
    %643 = vector.multi_reduction <add>, %638, %cst_196 [0] : vector<16x16xf32> to vector<16xf32>
    %644 = vector.shape_cast %643 : vector<16xf32> to vector<1x16xf32>
    %c0_197 = arith.constant 0 : index
    %c11_198 = arith.constant 11 : index
    %c0_199 = arith.constant 0 : index
    %c0_200 = arith.constant 0 : index
    %645 = vector.load %arg5[%c0_197, %c11_198, %c0_199, %c0_200] : memref<1x16x1x16xf32, #tpu.memory_space<vmem>>, vector<1x1x1x16xf32>
    %646 = vector.shape_cast %645 : vector<1x1x1x16xf32> to vector<1x16xf32>
    %647 = vector.shape_cast %644 : vector<1x16xf32> to vector<1x1x1x16xf32>
    tpu.vector_store %arg5[%c0_197, %c11_198, %c0_199, %c0_200], %647 {strides = array<i32>} : memref<1x16x1x16xf32, #tpu.memory_space<vmem>>, vector<1x1x1x16xf32>,
    %648 = arith.mulf %638, %638 : vector<16x16xf32>
    %cst_201 = arith.constant dense<0.000000e+00> : vector<16xf32>
    %649 = vector.multi_reduction <add>, %648, %cst_201 [0] : vector<16x16xf32> to vector<16xf32>
    %650 = vector.shape_cast %649 : vector<16xf32> to vector<1x16xf32>
    %c0_202 = arith.constant 0 : index
    %c11_203 = arith.constant 11 : index
    %c0_204 = arith.constant 0 : index
    %c0_205 = arith.constant 0 : index
    %651 = vector.load %arg6[%c0_202, %c11_203, %c0_204, %c0_205] : memref<1x16x1x16xf32, #tpu.memory_space<vmem>>, vector<1x1x1x16xf32>
    %652 = vector.shape_cast %651 : vector<1x1x1x16xf32> to vector<1x16xf32>
    %653 = vector.shape_cast %650 : vector<1x16xf32> to vector<1x1x1x16xf32>
    tpu.vector_store %arg6[%c0_202, %c11_203, %c0_204, %c0_205], %653 {strides = array<i32>} : memref<1x16x1x16xf32, #tpu.memory_space<vmem>>, vector<1x1x1x16xf32>,
    %c108 = arith.constant 108 : index
    %654 = memref.load %arg1[%c108] : memref<144xf32, #tpu.memory_space<smem>>
    %655 = vector.broadcast %654 : f32 to vector<16x16xf32>
    %656 = arith.mulf %1, %655 : vector<16x16xf32>
    %c109 = arith.constant 109 : index
    %657 = memref.load %arg1[%c109] : memref<144xf32, #tpu.memory_space<smem>>
    %658 = vector.broadcast %657 : f32 to vector<16x16xf32>
    %659 = arith.mulf %3, %658 : vector<16x16xf32>
    %660 = arith.addf %656, %659 : vector<16x16xf32>
    %c110 = arith.constant 110 : index
    %661 = memref.load %arg1[%c110] : memref<144xf32, #tpu.memory_space<smem>>
    %662 = vector.broadcast %661 : f32 to vector<16x16xf32>
    %663 = arith.mulf %5, %662 : vector<16x16xf32>
    %664 = arith.addf %660, %663 : vector<16x16xf32>
    %c111 = arith.constant 111 : index
    %665 = memref.load %arg1[%c111] : memref<144xf32, #tpu.memory_space<smem>>
    %666 = vector.broadcast %665 : f32 to vector<16x16xf32>
    %667 = arith.mulf %7, %666 : vector<16x16xf32>
    %668 = arith.addf %664, %667 : vector<16x16xf32>
    %c112 = arith.constant 112 : index
    %669 = memref.load %arg1[%c112] : memref<144xf32, #tpu.memory_space<smem>>
    %670 = vector.broadcast %669 : f32 to vector<16x16xf32>
    %671 = arith.mulf %9, %670 : vector<16x16xf32>
    %672 = arith.addf %668, %671 : vector<16x16xf32>
    %c113 = arith.constant 113 : index
    %673 = memref.load %arg1[%c113] : memref<144xf32, #tpu.memory_space<smem>>
    %674 = vector.broadcast %673 : f32 to vector<16x16xf32>
    %675 = arith.mulf %11, %674 : vector<16x16xf32>
    %676 = arith.addf %672, %675 : vector<16x16xf32>
    %c114 = arith.constant 114 : index
    %677 = memref.load %arg1[%c114] : memref<144xf32, #tpu.memory_space<smem>>
    %678 = vector.broadcast %677 : f32 to vector<16x16xf32>
    %679 = arith.mulf %13, %678 : vector<16x16xf32>
    %680 = arith.addf %676, %679 : vector<16x16xf32>
    %c115 = arith.constant 115 : index
    %681 = memref.load %arg1[%c115] : memref<144xf32, #tpu.memory_space<smem>>
    %682 = vector.broadcast %681 : f32 to vector<16x16xf32>
    %683 = arith.mulf %15, %682 : vector<16x16xf32>
    %684 = arith.addf %680, %683 : vector<16x16xf32>
    %c116 = arith.constant 116 : index
    %685 = memref.load %arg1[%c116] : memref<144xf32, #tpu.memory_space<smem>>
    %686 = vector.broadcast %685 : f32 to vector<16x16xf32>
    %687 = arith.mulf %17, %686 : vector<16x16xf32>
    %688 = arith.addf %684, %687 : vector<16x16xf32>
    %c12_206 = arith.constant 12 : index
    %689 = memref.load %arg2[%c12_206] : memref<16xf32, #tpu.memory_space<smem>>
    %690 = vector.broadcast %689 : f32 to vector<16x16xf32>
    %691 = arith.addf %688, %690 : vector<16x16xf32>
    %692 = arith.truncf %691 : vector<16x16xf32> to vector<16x16xbf16>
    %c0_207 = arith.constant 0 : index
    %c12_208 = arith.constant 12 : index
    %c0_209 = arith.constant 0 : index
    %c0_210 = arith.constant 0 : index
    %693 = vector.load %arg4[%c0_207, %c12_208, %c0_209, %c0_210] : memref<1x16x16x16xbf16, #tpu.memory_space<vmem>>, vector<1x1x16x16xbf16>
    %694 = vector.shape_cast %693 : vector<1x1x16x16xbf16> to vector<16x16xbf16>
    %695 = vector.shape_cast %692 : vector<16x16xbf16> to vector<1x1x16x16xbf16>
    tpu.vector_store %arg4[%c0_207, %c12_208, %c0_209, %c0_210], %695 {strides = array<i32>} : memref<1x16x16x16xbf16, #tpu.memory_space<vmem>>, vector<1x1x16x16xbf16>,
    %cst_211 = arith.constant dense<0.000000e+00> : vector<16xf32>
    %696 = vector.multi_reduction <add>, %691, %cst_211 [0] : vector<16x16xf32> to vector<16xf32>
    %697 = vector.shape_cast %696 : vector<16xf32> to vector<1x16xf32>
    %c0_212 = arith.constant 0 : index
    %c12_213 = arith.constant 12 : index
    %c0_214 = arith.constant 0 : index
    %c0_215 = arith.constant 0 : index
    %698 = vector.load %arg5[%c0_212, %c12_213, %c0_214, %c0_215] : memref<1x16x1x16xf32, #tpu.memory_space<vmem>>, vector<1x1x1x16xf32>
    %699 = vector.shape_cast %698 : vector<1x1x1x16xf32> to vector<1x16xf32>
    %700 = vector.shape_cast %697 : vector<1x16xf32> to vector<1x1x1x16xf32>
    tpu.vector_store %arg5[%c0_212, %c12_213, %c0_214, %c0_215], %700 {strides = array<i32>} : memref<1x16x1x16xf32, #tpu.memory_space<vmem>>, vector<1x1x1x16xf32>,
    %701 = arith.mulf %691, %691 : vector<16x16xf32>
    %cst_216 = arith.constant dense<0.000000e+00> : vector<16xf32>
    %702 = vector.multi_reduction <add>, %701, %cst_216 [0] : vector<16x16xf32> to vector<16xf32>
    %703 = vector.shape_cast %702 : vector<16xf32> to vector<1x16xf32>
    %c0_217 = arith.constant 0 : index
    %c12_218 = arith.constant 12 : index
    %c0_219 = arith.constant 0 : index
    %c0_220 = arith.constant 0 : index
    %704 = vector.load %arg6[%c0_217, %c12_218, %c0_219, %c0_220] : memref<1x16x1x16xf32, #tpu.memory_space<vmem>>, vector<1x1x1x16xf32>
    %705 = vector.shape_cast %704 : vector<1x1x1x16xf32> to vector<1x16xf32>
    %706 = vector.shape_cast %703 : vector<1x16xf32> to vector<1x1x1x16xf32>
    tpu.vector_store %arg6[%c0_217, %c12_218, %c0_219, %c0_220], %706 {strides = array<i32>} : memref<1x16x1x16xf32, #tpu.memory_space<vmem>>, vector<1x1x1x16xf32>,
    %c117 = arith.constant 117 : index
    %707 = memref.load %arg1[%c117] : memref<144xf32, #tpu.memory_space<smem>>
    %708 = vector.broadcast %707 : f32 to vector<16x16xf32>
    %709 = arith.mulf %1, %708 : vector<16x16xf32>
    %c118 = arith.constant 118 : index
    %710 = memref.load %arg1[%c118] : memref<144xf32, #tpu.memory_space<smem>>
    %711 = vector.broadcast %710 : f32 to vector<16x16xf32>
    %712 = arith.mulf %3, %711 : vector<16x16xf32>
    %713 = arith.addf %709, %712 : vector<16x16xf32>
    %c119 = arith.constant 119 : index
    %714 = memref.load %arg1[%c119] : memref<144xf32, #tpu.memory_space<smem>>
    %715 = vector.broadcast %714 : f32 to vector<16x16xf32>
    %716 = arith.mulf %5, %715 : vector<16x16xf32>
    %717 = arith.addf %713, %716 : vector<16x16xf32>
    %c120 = arith.constant 120 : index
    %718 = memref.load %arg1[%c120] : memref<144xf32, #tpu.memory_space<smem>>
    %719 = vector.broadcast %718 : f32 to vector<16x16xf32>
    %720 = arith.mulf %7, %719 : vector<16x16xf32>
    %721 = arith.addf %717, %720 : vector<16x16xf32>
    %c121 = arith.constant 121 : index
    %722 = memref.load %arg1[%c121] : memref<144xf32, #tpu.memory_space<smem>>
    %723 = vector.broadcast %722 : f32 to vector<16x16xf32>
    %724 = arith.mulf %9, %723 : vector<16x16xf32>
    %725 = arith.addf %721, %724 : vector<16x16xf32>
    %c122 = arith.constant 122 : index
    %726 = memref.load %arg1[%c122] : memref<144xf32, #tpu.memory_space<smem>>
    %727 = vector.broadcast %726 : f32 to vector<16x16xf32>
    %728 = arith.mulf %11, %727 : vector<16x16xf32>
    %729 = arith.addf %725, %728 : vector<16x16xf32>
    %c123 = arith.constant 123 : index
    %730 = memref.load %arg1[%c123] : memref<144xf32, #tpu.memory_space<smem>>
    %731 = vector.broadcast %730 : f32 to vector<16x16xf32>
    %732 = arith.mulf %13, %731 : vector<16x16xf32>
    %733 = arith.addf %729, %732 : vector<16x16xf32>
    %c124 = arith.constant 124 : index
    %734 = memref.load %arg1[%c124] : memref<144xf32, #tpu.memory_space<smem>>
    %735 = vector.broadcast %734 : f32 to vector<16x16xf32>
    %736 = arith.mulf %15, %735 : vector<16x16xf32>
    %737 = arith.addf %733, %736 : vector<16x16xf32>
    %c125 = arith.constant 125 : index
    %738 = memref.load %arg1[%c125] : memref<144xf32, #tpu.memory_space<smem>>
    %739 = vector.broadcast %738 : f32 to vector<16x16xf32>
    %740 = arith.mulf %17, %739 : vector<16x16xf32>
    %741 = arith.addf %737, %740 : vector<16x16xf32>
    %c13_221 = arith.constant 13 : index
    %742 = memref.load %arg2[%c13_221] : memref<16xf32, #tpu.memory_space<smem>>
    %743 = vector.broadcast %742 : f32 to vector<16x16xf32>
    %744 = arith.addf %741, %743 : vector<16x16xf32>
    %745 = arith.truncf %744 : vector<16x16xf32> to vector<16x16xbf16>
    %c0_222 = arith.constant 0 : index
    %c13_223 = arith.constant 13 : index
    %c0_224 = arith.constant 0 : index
    %c0_225 = arith.constant 0 : index
    %746 = vector.load %arg4[%c0_222, %c13_223, %c0_224, %c0_225] : memref<1x16x16x16xbf16, #tpu.memory_space<vmem>>, vector<1x1x16x16xbf16>
    %747 = vector.shape_cast %746 : vector<1x1x16x16xbf16> to vector<16x16xbf16>
    %748 = vector.shape_cast %745 : vector<16x16xbf16> to vector<1x1x16x16xbf16>
    tpu.vector_store %arg4[%c0_222, %c13_223, %c0_224, %c0_225], %748 {strides = array<i32>} : memref<1x16x16x16xbf16, #tpu.memory_space<vmem>>, vector<1x1x16x16xbf16>,
    %cst_226 = arith.constant dense<0.000000e+00> : vector<16xf32>
    %749 = vector.multi_reduction <add>, %744, %cst_226 [0] : vector<16x16xf32> to vector<16xf32>
    %750 = vector.shape_cast %749 : vector<16xf32> to vector<1x16xf32>
    %c0_227 = arith.constant 0 : index
    %c13_228 = arith.constant 13 : index
    %c0_229 = arith.constant 0 : index
    %c0_230 = arith.constant 0 : index
    %751 = vector.load %arg5[%c0_227, %c13_228, %c0_229, %c0_230] : memref<1x16x1x16xf32, #tpu.memory_space<vmem>>, vector<1x1x1x16xf32>
    %752 = vector.shape_cast %751 : vector<1x1x1x16xf32> to vector<1x16xf32>
    %753 = vector.shape_cast %750 : vector<1x16xf32> to vector<1x1x1x16xf32>
    tpu.vector_store %arg5[%c0_227, %c13_228, %c0_229, %c0_230], %753 {strides = array<i32>} : memref<1x16x1x16xf32, #tpu.memory_space<vmem>>, vector<1x1x1x16xf32>,
    %754 = arith.mulf %744, %744 : vector<16x16xf32>
    %cst_231 = arith.constant dense<0.000000e+00> : vector<16xf32>
    %755 = vector.multi_reduction <add>, %754, %cst_231 [0] : vector<16x16xf32> to vector<16xf32>
    %756 = vector.shape_cast %755 : vector<16xf32> to vector<1x16xf32>
    %c0_232 = arith.constant 0 : index
    %c13_233 = arith.constant 13 : index
    %c0_234 = arith.constant 0 : index
    %c0_235 = arith.constant 0 : index
    %757 = vector.load %arg6[%c0_232, %c13_233, %c0_234, %c0_235] : memref<1x16x1x16xf32, #tpu.memory_space<vmem>>, vector<1x1x1x16xf32>
    %758 = vector.shape_cast %757 : vector<1x1x1x16xf32> to vector<1x16xf32>
    %759 = vector.shape_cast %756 : vector<1x16xf32> to vector<1x1x1x16xf32>
    tpu.vector_store %arg6[%c0_232, %c13_233, %c0_234, %c0_235], %759 {strides = array<i32>} : memref<1x16x1x16xf32, #tpu.memory_space<vmem>>, vector<1x1x1x16xf32>,
    %c126 = arith.constant 126 : index
    %760 = memref.load %arg1[%c126] : memref<144xf32, #tpu.memory_space<smem>>
    %761 = vector.broadcast %760 : f32 to vector<16x16xf32>
    %762 = arith.mulf %1, %761 : vector<16x16xf32>
    %c127 = arith.constant 127 : index
    %763 = memref.load %arg1[%c127] : memref<144xf32, #tpu.memory_space<smem>>
    %764 = vector.broadcast %763 : f32 to vector<16x16xf32>
    %765 = arith.mulf %3, %764 : vector<16x16xf32>
    %766 = arith.addf %762, %765 : vector<16x16xf32>
    %c128 = arith.constant 128 : index
    %767 = memref.load %arg1[%c128] : memref<144xf32, #tpu.memory_space<smem>>
    %768 = vector.broadcast %767 : f32 to vector<16x16xf32>
    %769 = arith.mulf %5, %768 : vector<16x16xf32>
    %770 = arith.addf %766, %769 : vector<16x16xf32>
    %c129 = arith.constant 129 : index
    %771 = memref.load %arg1[%c129] : memref<144xf32, #tpu.memory_space<smem>>
    %772 = vector.broadcast %771 : f32 to vector<16x16xf32>
    %773 = arith.mulf %7, %772 : vector<16x16xf32>
    %774 = arith.addf %770, %773 : vector<16x16xf32>
    %c130 = arith.constant 130 : index
    %775 = memref.load %arg1[%c130] : memref<144xf32, #tpu.memory_space<smem>>
    %776 = vector.broadcast %775 : f32 to vector<16x16xf32>
    %777 = arith.mulf %9, %776 : vector<16x16xf32>
    %778 = arith.addf %774, %777 : vector<16x16xf32>
    %c131 = arith.constant 131 : index
    %779 = memref.load %arg1[%c131] : memref<144xf32, #tpu.memory_space<smem>>
    %780 = vector.broadcast %779 : f32 to vector<16x16xf32>
    %781 = arith.mulf %11, %780 : vector<16x16xf32>
    %782 = arith.addf %778, %781 : vector<16x16xf32>
    %c132 = arith.constant 132 : index
    %783 = memref.load %arg1[%c132] : memref<144xf32, #tpu.memory_space<smem>>
    %784 = vector.broadcast %783 : f32 to vector<16x16xf32>
    %785 = arith.mulf %13, %784 : vector<16x16xf32>
    %786 = arith.addf %782, %785 : vector<16x16xf32>
    %c133 = arith.constant 133 : index
    %787 = memref.load %arg1[%c133] : memref<144xf32, #tpu.memory_space<smem>>
    %788 = vector.broadcast %787 : f32 to vector<16x16xf32>
    %789 = arith.mulf %15, %788 : vector<16x16xf32>
    %790 = arith.addf %786, %789 : vector<16x16xf32>
    %c134 = arith.constant 134 : index
    %791 = memref.load %arg1[%c134] : memref<144xf32, #tpu.memory_space<smem>>
    %792 = vector.broadcast %791 : f32 to vector<16x16xf32>
    %793 = arith.mulf %17, %792 : vector<16x16xf32>
    %794 = arith.addf %790, %793 : vector<16x16xf32>
    %c14_236 = arith.constant 14 : index
    %795 = memref.load %arg2[%c14_236] : memref<16xf32, #tpu.memory_space<smem>>
    %796 = vector.broadcast %795 : f32 to vector<16x16xf32>
    %797 = arith.addf %794, %796 : vector<16x16xf32>
    %798 = arith.truncf %797 : vector<16x16xf32> to vector<16x16xbf16>
    %c0_237 = arith.constant 0 : index
    %c14_238 = arith.constant 14 : index
    %c0_239 = arith.constant 0 : index
    %c0_240 = arith.constant 0 : index
    %799 = vector.load %arg4[%c0_237, %c14_238, %c0_239, %c0_240] : memref<1x16x16x16xbf16, #tpu.memory_space<vmem>>, vector<1x1x16x16xbf16>
    %800 = vector.shape_cast %799 : vector<1x1x16x16xbf16> to vector<16x16xbf16>
    %801 = vector.shape_cast %798 : vector<16x16xbf16> to vector<1x1x16x16xbf16>
    tpu.vector_store %arg4[%c0_237, %c14_238, %c0_239, %c0_240], %801 {strides = array<i32>} : memref<1x16x16x16xbf16, #tpu.memory_space<vmem>>, vector<1x1x16x16xbf16>,
    %cst_241 = arith.constant dense<0.000000e+00> : vector<16xf32>
    %802 = vector.multi_reduction <add>, %797, %cst_241 [0] : vector<16x16xf32> to vector<16xf32>
    %803 = vector.shape_cast %802 : vector<16xf32> to vector<1x16xf32>
    %c0_242 = arith.constant 0 : index
    %c14_243 = arith.constant 14 : index
    %c0_244 = arith.constant 0 : index
    %c0_245 = arith.constant 0 : index
    %804 = vector.load %arg5[%c0_242, %c14_243, %c0_244, %c0_245] : memref<1x16x1x16xf32, #tpu.memory_space<vmem>>, vector<1x1x1x16xf32>
    %805 = vector.shape_cast %804 : vector<1x1x1x16xf32> to vector<1x16xf32>
    %806 = vector.shape_cast %803 : vector<1x16xf32> to vector<1x1x1x16xf32>
    tpu.vector_store %arg5[%c0_242, %c14_243, %c0_244, %c0_245], %806 {strides = array<i32>} : memref<1x16x1x16xf32, #tpu.memory_space<vmem>>, vector<1x1x1x16xf32>,
    %807 = arith.mulf %797, %797 : vector<16x16xf32>
    %cst_246 = arith.constant dense<0.000000e+00> : vector<16xf32>
    %808 = vector.multi_reduction <add>, %807, %cst_246 [0] : vector<16x16xf32> to vector<16xf32>
    %809 = vector.shape_cast %808 : vector<16xf32> to vector<1x16xf32>
    %c0_247 = arith.constant 0 : index
    %c14_248 = arith.constant 14 : index
    %c0_249 = arith.constant 0 : index
    %c0_250 = arith.constant 0 : index
    %810 = vector.load %arg6[%c0_247, %c14_248, %c0_249, %c0_250] : memref<1x16x1x16xf32, #tpu.memory_space<vmem>>, vector<1x1x1x16xf32>
    %811 = vector.shape_cast %810 : vector<1x1x1x16xf32> to vector<1x16xf32>
    %812 = vector.shape_cast %809 : vector<1x16xf32> to vector<1x1x1x16xf32>
    tpu.vector_store %arg6[%c0_247, %c14_248, %c0_249, %c0_250], %812 {strides = array<i32>} : memref<1x16x1x16xf32, #tpu.memory_space<vmem>>, vector<1x1x1x16xf32>,
    %c135 = arith.constant 135 : index
    %813 = memref.load %arg1[%c135] : memref<144xf32, #tpu.memory_space<smem>>
    %814 = vector.broadcast %813 : f32 to vector<16x16xf32>
    %815 = arith.mulf %1, %814 : vector<16x16xf32>
    %c136 = arith.constant 136 : index
    %816 = memref.load %arg1[%c136] : memref<144xf32, #tpu.memory_space<smem>>
    %817 = vector.broadcast %816 : f32 to vector<16x16xf32>
    %818 = arith.mulf %3, %817 : vector<16x16xf32>
    %819 = arith.addf %815, %818 : vector<16x16xf32>
    %c137 = arith.constant 137 : index
    %820 = memref.load %arg1[%c137] : memref<144xf32, #tpu.memory_space<smem>>
    %821 = vector.broadcast %820 : f32 to vector<16x16xf32>
    %822 = arith.mulf %5, %821 : vector<16x16xf32>
    %823 = arith.addf %819, %822 : vector<16x16xf32>
    %c138 = arith.constant 138 : index
    %824 = memref.load %arg1[%c138] : memref<144xf32, #tpu.memory_space<smem>>
    %825 = vector.broadcast %824 : f32 to vector<16x16xf32>
    %826 = arith.mulf %7, %825 : vector<16x16xf32>
    %827 = arith.addf %823, %826 : vector<16x16xf32>
    %c139 = arith.constant 139 : index
    %828 = memref.load %arg1[%c139] : memref<144xf32, #tpu.memory_space<smem>>
    %829 = vector.broadcast %828 : f32 to vector<16x16xf32>
    %830 = arith.mulf %9, %829 : vector<16x16xf32>
    %831 = arith.addf %827, %830 : vector<16x16xf32>
    %c140 = arith.constant 140 : index
    %832 = memref.load %arg1[%c140] : memref<144xf32, #tpu.memory_space<smem>>
    %833 = vector.broadcast %832 : f32 to vector<16x16xf32>
    %834 = arith.mulf %11, %833 : vector<16x16xf32>
    %835 = arith.addf %831, %834 : vector<16x16xf32>
    %c141 = arith.constant 141 : index
    %836 = memref.load %arg1[%c141] : memref<144xf32, #tpu.memory_space<smem>>
    %837 = vector.broadcast %836 : f32 to vector<16x16xf32>
    %838 = arith.mulf %13, %837 : vector<16x16xf32>
    %839 = arith.addf %835, %838 : vector<16x16xf32>
    %c142 = arith.constant 142 : index
    %840 = memref.load %arg1[%c142] : memref<144xf32, #tpu.memory_space<smem>>
    %841 = vector.broadcast %840 : f32 to vector<16x16xf32>
    %842 = arith.mulf %15, %841 : vector<16x16xf32>
    %843 = arith.addf %839, %842 : vector<16x16xf32>
    %c143 = arith.constant 143 : index
    %844 = memref.load %arg1[%c143] : memref<144xf32, #tpu.memory_space<smem>>
    %845 = vector.broadcast %844 : f32 to vector<16x16xf32>
    %846 = arith.mulf %17, %845 : vector<16x16xf32>
    %847 = arith.addf %843, %846 : vector<16x16xf32>
    %c15_251 = arith.constant 15 : index
    %848 = memref.load %arg2[%c15_251] : memref<16xf32, #tpu.memory_space<smem>>
    %849 = vector.broadcast %848 : f32 to vector<16x16xf32>
    %850 = arith.addf %847, %849 : vector<16x16xf32>
    %851 = arith.truncf %850 : vector<16x16xf32> to vector<16x16xbf16>
    %c0_252 = arith.constant 0 : index
    %c15_253 = arith.constant 15 : index
    %c0_254 = arith.constant 0 : index
    %c0_255 = arith.constant 0 : index
    %852 = vector.load %arg4[%c0_252, %c15_253, %c0_254, %c0_255] : memref<1x16x16x16xbf16, #tpu.memory_space<vmem>>, vector<1x1x16x16xbf16>
    %853 = vector.shape_cast %852 : vector<1x1x16x16xbf16> to vector<16x16xbf16>
    %854 = vector.shape_cast %851 : vector<16x16xbf16> to vector<1x1x16x16xbf16>
    tpu.vector_store %arg4[%c0_252, %c15_253, %c0_254, %c0_255], %854 {strides = array<i32>} : memref<1x16x16x16xbf16, #tpu.memory_space<vmem>>, vector<1x1x16x16xbf16>,
    %cst_256 = arith.constant dense<0.000000e+00> : vector<16xf32>
    %855 = vector.multi_reduction <add>, %850, %cst_256 [0] : vector<16x16xf32> to vector<16xf32>
    %856 = vector.shape_cast %855 : vector<16xf32> to vector<1x16xf32>
    %c0_257 = arith.constant 0 : index
    %c15_258 = arith.constant 15 : index
    %c0_259 = arith.constant 0 : index
    %c0_260 = arith.constant 0 : index
    %857 = vector.load %arg5[%c0_257, %c15_258, %c0_259, %c0_260] : memref<1x16x1x16xf32, #tpu.memory_space<vmem>>, vector<1x1x1x16xf32>
    %858 = vector.shape_cast %857 : vector<1x1x1x16xf32> to vector<1x16xf32>
    %859 = vector.shape_cast %856 : vector<1x16xf32> to vector<1x1x1x16xf32>
    tpu.vector_store %arg5[%c0_257, %c15_258, %c0_259, %c0_260], %859 {strides = array<i32>} : memref<1x16x1x16xf32, #tpu.memory_space<vmem>>, vector<1x1x1x16xf32>,
    %860 = arith.mulf %850, %850 : vector<16x16xf32>
    %cst_261 = arith.constant dense<0.000000e+00> : vector<16xf32>
    %861 = vector.multi_reduction <add>, %860, %cst_261 [0] : vector<16x16xf32> to vector<16xf32>
    %862 = vector.shape_cast %861 : vector<16xf32> to vector<1x16xf32>
    %c0_262 = arith.constant 0 : index
    %c15_263 = arith.constant 15 : index
    %c0_264 = arith.constant 0 : index
    %c0_265 = arith.constant 0 : index
    %863 = vector.load %arg6[%c0_262, %c15_263, %c0_264, %c0_265] : memref<1x16x1x16xf32, #tpu.memory_space<vmem>>, vector<1x1x1x16xf32>
    %864 = vector.shape_cast %863 : vector<1x1x1x16xf32> to vector<1x16xf32>
    %865 = vector.shape_cast %862 : vector<1x16xf32> to vector<1x1x1x16xf32>
    tpu.vector_store %arg6[%c0_262, %c15_263, %c0_264, %c0_265], %865 {strides = array<i32>} : memref<1x16x1x16xf32, #tpu.memory_space<vmem>>, vector<1x1x1x16xf32>,
    return
  }
  func.func @transform_0(%arg0: i32) -> i32 {
    %c0_i32 = arith.constant 0 : i32
    %c0_i32_0 = arith.constant 0 : i32
    return %c0_i32 : i32
  }
  func.func @transform_1(%arg0: i32) -> i32 {
    %c0_i32 = arith.constant 0 : i32
    %c0_i32_0 = arith.constant 0 : i32
    return %c0_i32 : i32
  }
  func.func @transform_2(%arg0: i32) -> (i32, i32, i32) {
    %c0_i32 = arith.constant 0 : i32
    %c0_i32_0 = arith.constant 0 : i32
    %c0_i32_1 = arith.constant 0 : i32
    return %arg0, %c0_i32, %c0_i32_0 : i32, i32, i32
  }
  func.func @transform_3(%arg0: i32) -> (i32, i32, i32, i32) {
    %c0_i32 = arith.constant 0 : i32
    %c0_i32_0 = arith.constant 0 : i32
    %c0_i32_1 = arith.constant 0 : i32
    %c0_i32_2 = arith.constant 0 : i32
    return %arg0, %c0_i32, %c0_i32_0, %c0_i32_1 : i32, i32, i32, i32
  }
  func.func @transform_4(%arg0: i32) -> (i32, i32, i32, i32) {
    %c0_i32 = arith.constant 0 : i32
    %c0_i32_0 = arith.constant 0 : i32
    %c0_i32_1 = arith.constant 0 : i32
    %c0_i32_2 = arith.constant 0 : i32
    return %arg0, %c0_i32, %c0_i32_0, %c0_i32_1 : i32, i32, i32, i32
  }
  func.func @transform_5(%arg0: i32) -> (i32, i32, i32, i32) {
    %c0_i32 = arith.constant 0 : i32
    %c0_i32_0 = arith.constant 0 : i32
    %c0_i32_1 = arith.constant 0 : i32
    %c0_i32_2 = arith.constant 0 : i32
    return %arg0, %c0_i32, %c0_i32_0, %c0_i32_1 : i32, i32, i32, i32
  }
}

module attributes {stable_mosaic.version = 11 : i64} {
  func.func @kernel(%arg0: i32, %arg1: memref<8x2x8x32xbf16, #tpu.memory_space<vmem>>, %arg2: memref<1x1x1x32xf32, #tpu.memory_space<vmem>>, %arg3: memref<1x1x1x32xf32, #tpu.memory_space<vmem>>, %arg4: memref<8x8x16xbf16, #tpu.memory_space<vmem>>) attributes {dimension_semantics = [#tpu.dimension_semantics<parallel>], iteration_bounds = array<i64: 2>, scalar_prefetch = 0 : i64, scratch_operands = 0 : i64, tpu.core_type = #tpu.core_type<tc>, window_params = [{transform_indices = @transform_0, window_bounds = array<i64: 8, 2, 8, 32>}, {pipeline_mode = #tpu.pipeline_mode<synchronous>, transform_indices = @transform_1, window_bounds = array<i64: 1, 1, 1, 32>}, {pipeline_mode = #tpu.pipeline_mode<synchronous>, transform_indices = @transform_2, window_bounds = array<i64: 1, 1, 1, 32>}, {transform_indices = @transform_3, window_bounds = array<i64: 8, 8, 16>}]} {
    %c0 = arith.constant 0 : index
    %c0_0 = arith.constant 0 : index
    %c0_1 = arith.constant 0 : index
    %c0_2 = arith.constant 0 : index
    %0 = vector.load %arg1[%c0, %c0_0, %c0_1, %c0_2] : memref<8x2x8x32xbf16, #tpu.memory_space<vmem>>, vector<8x2x8x32xbf16>
    %1 = arith.extf %0 : vector<8x2x8x32xbf16> to vector<8x2x8x32xf32>
    %c0_3 = arith.constant 0 : index
    %c0_4 = arith.constant 0 : index
    %c0_5 = arith.constant 0 : index
    %c0_6 = arith.constant 0 : index
    %2 = vector.load %arg2[%c0_3, %c0_4, %c0_5, %c0_6] : memref<1x1x1x32xf32, #tpu.memory_space<vmem>>, vector<1x1x1x32xf32>
    %3 = vector.broadcast %2 : vector<1x1x1x32xf32> to vector<8x2x8x32xf32>
    %4 = arith.mulf %1, %3 : vector<8x2x8x32xf32>
    %c0_7 = arith.constant 0 : index
    %c0_8 = arith.constant 0 : index
    %c0_9 = arith.constant 0 : index
    %c0_10 = arith.constant 0 : index
    %5 = vector.load %arg3[%c0_7, %c0_8, %c0_9, %c0_10] : memref<1x1x1x32xf32, #tpu.memory_space<vmem>>, vector<1x1x1x32xf32>
    %6 = vector.broadcast %5 : vector<1x1x1x32xf32> to vector<8x2x8x32xf32>
    %7 = arith.addf %4, %6 : vector<8x2x8x32xf32>
    %cst = arith.constant 0.000000e+00 : f32
    %8 = vector.broadcast %cst : f32 to vector<8x2x8x32xf32>
    %9 = arith.maximumf %7, %8 : vector<8x2x8x32xf32>
    %10 = vector.extract_strided_slice %9 {offsets = [0, 0, 0, 0], sizes = [8, 1, 8, 32], strides = [1, 1, 1, 1]} : vector<8x2x8x32xf32> to vector<8x1x8x32xf32>
    %11 = vector.shape_cast %10 : vector<8x1x8x32xf32> to vector<8x8x32xf32>
    %12 = vector.extract_strided_slice %9 {offsets = [0, 1, 0, 0], sizes = [8, 1, 8, 32], strides = [1, 1, 1, 1]} : vector<8x2x8x32xf32> to vector<8x1x8x32xf32>
    %13 = vector.shape_cast %12 : vector<8x1x8x32xf32> to vector<8x8x32xf32>
    %14 = arith.maximumf %11, %13 : vector<8x8x32xf32>
    %15 = vector.extract_strided_slice %14 {offsets = [0, 0, 0], sizes = [8, 8, 16], strides = [1, 1, 1]} : vector<8x8x32xf32> to vector<8x8x16xf32>
    %16 = vector.extract_strided_slice %14 {offsets = [0, 0, 16], sizes = [8, 8, 16], strides = [1, 1, 1]} : vector<8x8x32xf32> to vector<8x8x16xf32>
    %17 = arith.maximumf %15, %16 : vector<8x8x16xf32>
    %18 = arith.truncf %17 : vector<8x8x16xf32> to vector<8x8x16xbf16>
    %c0_11 = arith.constant 0 : index
    %c0_12 = arith.constant 0 : index
    %c0_13 = arith.constant 0 : index
    %19 = vector.load %arg4[%c0_11, %c0_12, %c0_13] : memref<8x8x16xbf16, #tpu.memory_space<vmem>>, vector<8x8x16xbf16>
    tpu.vector_store %arg4[%c0_11, %c0_12, %c0_13], %18 {strides = array<i32>} : memref<8x8x16xbf16, #tpu.memory_space<vmem>>, vector<8x8x16xbf16>,
    return
  }
  func.func @transform_0(%arg0: i32) -> (i32, i32, i32, i32) {
    %c0_i32 = arith.constant 0 : i32
    %c0_i32_0 = arith.constant 0 : i32
    %c0_i32_1 = arith.constant 0 : i32
    %c0_i32_2 = arith.constant 0 : i32
    return %arg0, %c0_i32, %c0_i32_0, %c0_i32_1 : i32, i32, i32, i32
  }
  func.func @transform_1(%arg0: i32) -> (i32, i32, i32, i32) {
    %c0_i32 = arith.constant 0 : i32
    %c0_i32_0 = arith.constant 0 : i32
    %c0_i32_1 = arith.constant 0 : i32
    %c0_i32_2 = arith.constant 0 : i32
    %c0_i32_3 = arith.constant 0 : i32
    return %c0_i32, %c0_i32_0, %c0_i32_1, %c0_i32_2 : i32, i32, i32, i32
  }
  func.func @transform_2(%arg0: i32) -> (i32, i32, i32, i32) {
    %c0_i32 = arith.constant 0 : i32
    %c0_i32_0 = arith.constant 0 : i32
    %c0_i32_1 = arith.constant 0 : i32
    %c0_i32_2 = arith.constant 0 : i32
    %c0_i32_3 = arith.constant 0 : i32
    return %c0_i32, %c0_i32_0, %c0_i32_1, %c0_i32_2 : i32, i32, i32, i32
  }
  func.func @transform_3(%arg0: i32) -> (i32, i32, i32) {
    %c0_i32 = arith.constant 0 : i32
    %c0_i32_0 = arith.constant 0 : i32
    %c0_i32_1 = arith.constant 0 : i32
    return %arg0, %c0_i32, %c0_i32_0 : i32, i32, i32
  }
}

module attributes {stable_mosaic.version = 11 : i64} {
  func.func @kernel(%arg0: i32, %arg1: i32, %arg2: memref<1x64x80xbf16, #tpu.memory_space<vmem>>, %arg3: memref<1x1x32x80xbf16, #tpu.memory_space<vmem>>, %arg4: memref<400x32xbf16, #tpu.memory_space<vmem>>, %arg5: memref<1x32xf32, #tpu.memory_space<vmem>>, %arg6: memref<1x64x32xbf16, #tpu.memory_space<vmem>>, %arg7: memref<1x1x1x32xf32, #tpu.memory_space<vmem>>, %arg8: memref<1x1x1x32xf32, #tpu.memory_space<vmem>>) attributes {dimension_semantics = [#tpu.dimension_semantics<parallel>, #tpu.dimension_semantics<arbitrary>], iteration_bounds = array<i64: 2, 1>, scalar_prefetch = 0 : i64, scratch_operands = 0 : i64, tpu.core_type = #tpu.core_type<tc>, window_params = [{transform_indices = @transform_0, window_bounds = array<i64: 1, 64, 80>}, {transform_indices = @transform_1, window_bounds = array<i64: 1, 1, 32, 80>}, {pipeline_mode = #tpu.pipeline_mode<synchronous>, transform_indices = @transform_2, window_bounds = array<i64: 400, 32>}, {pipeline_mode = #tpu.pipeline_mode<synchronous>, transform_indices = @transform_3, window_bounds = array<i64: 1, 32>}, {transform_indices = @transform_4, window_bounds = array<i64: 1, 64, 32>}, {transform_indices = @transform_5, window_bounds = array<i64: 1, 1, 1, 32>}, {transform_indices = @transform_6, window_bounds = array<i64: 1, 1, 1, 32>}]} {
    %c0 = arith.constant 0 : index
    %c0_0 = arith.constant 0 : index
    %c0_1 = arith.constant 0 : index
    %0 = vector.load %arg2[%c0, %c0_0, %c0_1] : memref<1x64x80xbf16, #tpu.memory_space<vmem>>, vector<1x64x80xbf16>
    %1 = vector.shape_cast %0 : vector<1x64x80xbf16> to vector<64x80xbf16>
    %c0_2 = arith.constant 0 : index
    %c0_3 = arith.constant 0 : index
    %c0_4 = arith.constant 0 : index
    %c0_5 = arith.constant 0 : index
    %2 = vector.load %arg3[%c0_2, %c0_3, %c0_4, %c0_5] : memref<1x1x32x80xbf16, #tpu.memory_space<vmem>>, vector<1x1x32x80xbf16>
    %3 = vector.shape_cast %2 : vector<1x1x32x80xbf16> to vector<32x80xbf16>
    %4 = tpu.concatenate %1, %3 in 0 : vector<64x80xbf16>, vector<32x80xbf16> -> vector<96x80xbf16>
    %5 = vector.extract_strided_slice %4 {offsets = [0, 0], sizes = [64, 80], strides = [1, 1]} : vector<96x80xbf16> to vector<64x80xbf16>
    %6 = vector.extract_strided_slice %4 {offsets = [8, 0], sizes = [64, 80], strides = [1, 1]} : vector<96x80xbf16> to vector<64x80xbf16>
    %7 = vector.extract_strided_slice %4 {offsets = [16, 0], sizes = [64, 80], strides = [1, 1]} : vector<96x80xbf16> to vector<64x80xbf16>
    %8 = vector.extract_strided_slice %4 {offsets = [24, 0], sizes = [64, 80], strides = [1, 1]} : vector<96x80xbf16> to vector<64x80xbf16>
    %9 = vector.extract_strided_slice %4 {offsets = [32, 0], sizes = [64, 80], strides = [1, 1]} : vector<96x80xbf16> to vector<64x80xbf16>
    %10 = tpu.concatenate %5, %6, %7, %8, %9 in 1 : vector<64x80xbf16>, vector<64x80xbf16>, vector<64x80xbf16>, vector<64x80xbf16>, vector<64x80xbf16> -> vector<64x400xbf16>
    %c0_6 = arith.constant 0 : index
    %c0_7 = arith.constant 0 : index
    %11 = vector.load %arg4[%c0_6, %c0_7] : memref<400x32xbf16, #tpu.memory_space<vmem>>, vector<400x32xbf16>
    %cst = arith.constant dense<0.000000e+00> : vector<64x32xf32>
    %12 = tpu.matmul %10, %11, %cst {dimension_numbers = #tpu.dot_dimension_numbers<[1], [0], [0], [1], [0, 0, 1, 1], [], []>} : vector<64x400xbf16>, vector<400x32xbf16>, vector<64x32xf32> -> vector<64x32xf32>
    %c0_8 = arith.constant 0 : index
    %c0_9 = arith.constant 0 : index
    %13 = vector.load %arg5[%c0_8, %c0_9] : memref<1x32xf32, #tpu.memory_space<vmem>>, vector<1x32xf32>
    %14 = vector.broadcast %13 : vector<1x32xf32> to vector<64x32xf32>
    %15 = arith.addf %12, %14 : vector<64x32xf32>
    %16 = arith.truncf %15 : vector<64x32xf32> to vector<64x32xbf16>
    %c0_10 = arith.constant 0 : index
    %c0_11 = arith.constant 0 : index
    %c0_12 = arith.constant 0 : index
    %17 = vector.load %arg6[%c0_10, %c0_11, %c0_12] : memref<1x64x32xbf16, #tpu.memory_space<vmem>>, vector<1x64x32xbf16>
    %18 = vector.shape_cast %17 : vector<1x64x32xbf16> to vector<64x32xbf16>
    %19 = vector.shape_cast %16 : vector<64x32xbf16> to vector<1x64x32xbf16>
    tpu.vector_store %arg6[%c0_10, %c0_11, %c0_12], %19 {strides = array<i32>} : memref<1x64x32xbf16, #tpu.memory_space<vmem>>, vector<1x64x32xbf16>,
    %cst_13 = arith.constant dense<0.000000e+00> : vector<32xf32>
    %20 = vector.multi_reduction <add>, %15, %cst_13 [0] : vector<64x32xf32> to vector<32xf32>
    %21 = vector.shape_cast %20 : vector<32xf32> to vector<1x32xf32>
    %c0_14 = arith.constant 0 : index
    %c0_15 = arith.constant 0 : index
    %c0_16 = arith.constant 0 : index
    %c0_17 = arith.constant 0 : index
    %22 = vector.load %arg7[%c0_14, %c0_15, %c0_16, %c0_17] : memref<1x1x1x32xf32, #tpu.memory_space<vmem>>, vector<1x1x1x32xf32>
    %23 = vector.shape_cast %22 : vector<1x1x1x32xf32> to vector<1x32xf32>
    %24 = vector.shape_cast %21 : vector<1x32xf32> to vector<1x1x1x32xf32>
    tpu.vector_store %arg7[%c0_14, %c0_15, %c0_16, %c0_17], %24 {strides = array<i32>} : memref<1x1x1x32xf32, #tpu.memory_space<vmem>>, vector<1x1x1x32xf32>,
    %25 = arith.mulf %15, %15 : vector<64x32xf32>
    %cst_18 = arith.constant dense<0.000000e+00> : vector<32xf32>
    %26 = vector.multi_reduction <add>, %25, %cst_18 [0] : vector<64x32xf32> to vector<32xf32>
    %27 = vector.shape_cast %26 : vector<32xf32> to vector<1x32xf32>
    %c0_19 = arith.constant 0 : index
    %c0_20 = arith.constant 0 : index
    %c0_21 = arith.constant 0 : index
    %c0_22 = arith.constant 0 : index
    %28 = vector.load %arg8[%c0_19, %c0_20, %c0_21, %c0_22] : memref<1x1x1x32xf32, #tpu.memory_space<vmem>>, vector<1x1x1x32xf32>
    %29 = vector.shape_cast %28 : vector<1x1x1x32xf32> to vector<1x32xf32>
    %30 = vector.shape_cast %27 : vector<1x32xf32> to vector<1x1x1x32xf32>
    tpu.vector_store %arg8[%c0_19, %c0_20, %c0_21, %c0_22], %30 {strides = array<i32>} : memref<1x1x1x32xf32, #tpu.memory_space<vmem>>, vector<1x1x1x32xf32>,
    return
  }
  func.func @transform_0(%arg0: i32, %arg1: i32) -> (i32, i32, i32) {
    %c0_i32 = arith.constant 0 : i32
    %c0_i32_0 = arith.constant 0 : i32
    return %arg0, %arg1, %c0_i32 : i32, i32, i32
  }
  func.func @transform_1(%arg0: i32, %arg1: i32) -> (i32, i32, i32, i32) {
    %c0_i32 = arith.constant 0 : i32
    %c0_i32_0 = arith.constant 0 : i32
    %c0_i32_1 = arith.constant 0 : i32
    return %arg0, %arg1, %c0_i32, %c0_i32_0 : i32, i32, i32, i32
  }
  func.func @transform_2(%arg0: i32, %arg1: i32) -> (i32, i32) {
    %c0_i32 = arith.constant 0 : i32
    %c0_i32_0 = arith.constant 0 : i32
    %c0_i32_1 = arith.constant 0 : i32
    return %c0_i32, %c0_i32_0 : i32, i32
  }
  func.func @transform_3(%arg0: i32, %arg1: i32) -> (i32, i32) {
    %c0_i32 = arith.constant 0 : i32
    %c0_i32_0 = arith.constant 0 : i32
    %c0_i32_1 = arith.constant 0 : i32
    return %c0_i32, %c0_i32_0 : i32, i32
  }
  func.func @transform_4(%arg0: i32, %arg1: i32) -> (i32, i32, i32) {
    %c0_i32 = arith.constant 0 : i32
    %c0_i32_0 = arith.constant 0 : i32
    return %arg0, %arg1, %c0_i32 : i32, i32, i32
  }
  func.func @transform_5(%arg0: i32, %arg1: i32) -> (i32, i32, i32, i32) {
    %c0_i32 = arith.constant 0 : i32
    %c0_i32_0 = arith.constant 0 : i32
    %c0_i32_1 = arith.constant 0 : i32
    return %arg0, %arg1, %c0_i32, %c0_i32_0 : i32, i32, i32, i32
  }
  func.func @transform_6(%arg0: i32, %arg1: i32) -> (i32, i32, i32, i32) {
    %c0_i32 = arith.constant 0 : i32
    %c0_i32_0 = arith.constant 0 : i32
    %c0_i32_1 = arith.constant 0 : i32
    return %arg0, %arg1, %c0_i32, %c0_i32_0 : i32, i32, i32, i32
  }
}

module attributes {stable_mosaic.version = 11 : i64} {
  func.func @kernel(%arg0: i32, %arg1: memref<4x2x4x64xbf16, #tpu.memory_space<vmem>>, %arg2: memref<1x1x1x64xf32, #tpu.memory_space<vmem>>, %arg3: memref<1x1x1x64xf32, #tpu.memory_space<vmem>>, %arg4: memref<4x4x32xbf16, #tpu.memory_space<vmem>>) attributes {dimension_semantics = [#tpu.dimension_semantics<parallel>], iteration_bounds = array<i64: 2>, scalar_prefetch = 0 : i64, scratch_operands = 0 : i64, tpu.core_type = #tpu.core_type<tc>, window_params = [{transform_indices = @transform_0, window_bounds = array<i64: 4, 2, 4, 64>}, {pipeline_mode = #tpu.pipeline_mode<synchronous>, transform_indices = @transform_1, window_bounds = array<i64: 1, 1, 1, 64>}, {pipeline_mode = #tpu.pipeline_mode<synchronous>, transform_indices = @transform_2, window_bounds = array<i64: 1, 1, 1, 64>}, {transform_indices = @transform_3, window_bounds = array<i64: 4, 4, 32>}]} {
    %c0 = arith.constant 0 : index
    %c0_0 = arith.constant 0 : index
    %c0_1 = arith.constant 0 : index
    %c0_2 = arith.constant 0 : index
    %0 = vector.load %arg1[%c0, %c0_0, %c0_1, %c0_2] : memref<4x2x4x64xbf16, #tpu.memory_space<vmem>>, vector<4x2x4x64xbf16>
    %1 = arith.extf %0 : vector<4x2x4x64xbf16> to vector<4x2x4x64xf32>
    %c0_3 = arith.constant 0 : index
    %c0_4 = arith.constant 0 : index
    %c0_5 = arith.constant 0 : index
    %c0_6 = arith.constant 0 : index
    %2 = vector.load %arg2[%c0_3, %c0_4, %c0_5, %c0_6] : memref<1x1x1x64xf32, #tpu.memory_space<vmem>>, vector<1x1x1x64xf32>
    %3 = vector.broadcast %2 : vector<1x1x1x64xf32> to vector<4x2x4x64xf32>
    %4 = arith.mulf %1, %3 : vector<4x2x4x64xf32>
    %c0_7 = arith.constant 0 : index
    %c0_8 = arith.constant 0 : index
    %c0_9 = arith.constant 0 : index
    %c0_10 = arith.constant 0 : index
    %5 = vector.load %arg3[%c0_7, %c0_8, %c0_9, %c0_10] : memref<1x1x1x64xf32, #tpu.memory_space<vmem>>, vector<1x1x1x64xf32>
    %6 = vector.broadcast %5 : vector<1x1x1x64xf32> to vector<4x2x4x64xf32>
    %7 = arith.addf %4, %6 : vector<4x2x4x64xf32>
    %cst = arith.constant 0.000000e+00 : f32
    %8 = vector.broadcast %cst : f32 to vector<4x2x4x64xf32>
    %9 = arith.maximumf %7, %8 : vector<4x2x4x64xf32>
    %10 = vector.extract_strided_slice %9 {offsets = [0, 0, 0, 0], sizes = [4, 1, 4, 64], strides = [1, 1, 1, 1]} : vector<4x2x4x64xf32> to vector<4x1x4x64xf32>
    %11 = vector.shape_cast %10 : vector<4x1x4x64xf32> to vector<4x4x64xf32>
    %12 = vector.extract_strided_slice %9 {offsets = [0, 1, 0, 0], sizes = [4, 1, 4, 64], strides = [1, 1, 1, 1]} : vector<4x2x4x64xf32> to vector<4x1x4x64xf32>
    %13 = vector.shape_cast %12 : vector<4x1x4x64xf32> to vector<4x4x64xf32>
    %14 = arith.maximumf %11, %13 : vector<4x4x64xf32>
    %15 = vector.extract_strided_slice %14 {offsets = [0, 0, 0], sizes = [4, 4, 32], strides = [1, 1, 1]} : vector<4x4x64xf32> to vector<4x4x32xf32>
    %16 = vector.extract_strided_slice %14 {offsets = [0, 0, 32], sizes = [4, 4, 32], strides = [1, 1, 1]} : vector<4x4x64xf32> to vector<4x4x32xf32>
    %17 = arith.maximumf %15, %16 : vector<4x4x32xf32>
    %18 = arith.truncf %17 : vector<4x4x32xf32> to vector<4x4x32xbf16>
    %c0_11 = arith.constant 0 : index
    %c0_12 = arith.constant 0 : index
    %c0_13 = arith.constant 0 : index
    %19 = vector.load %arg4[%c0_11, %c0_12, %c0_13] : memref<4x4x32xbf16, #tpu.memory_space<vmem>>, vector<4x4x32xbf16>
    tpu.vector_store %arg4[%c0_11, %c0_12, %c0_13], %18 {strides = array<i32>} : memref<4x4x32xbf16, #tpu.memory_space<vmem>>, vector<4x4x32xbf16>,
    return
  }
  func.func @transform_0(%arg0: i32) -> (i32, i32, i32, i32) {
    %c0_i32 = arith.constant 0 : i32
    %c0_i32_0 = arith.constant 0 : i32
    %c0_i32_1 = arith.constant 0 : i32
    %c0_i32_2 = arith.constant 0 : i32
    return %arg0, %c0_i32, %c0_i32_0, %c0_i32_1 : i32, i32, i32, i32
  }
  func.func @transform_1(%arg0: i32) -> (i32, i32, i32, i32) {
    %c0_i32 = arith.constant 0 : i32
    %c0_i32_0 = arith.constant 0 : i32
    %c0_i32_1 = arith.constant 0 : i32
    %c0_i32_2 = arith.constant 0 : i32
    %c0_i32_3 = arith.constant 0 : i32
    return %c0_i32, %c0_i32_0, %c0_i32_1, %c0_i32_2 : i32, i32, i32, i32
  }
  func.func @transform_2(%arg0: i32) -> (i32, i32, i32, i32) {
    %c0_i32 = arith.constant 0 : i32
    %c0_i32_0 = arith.constant 0 : i32
    %c0_i32_1 = arith.constant 0 : i32
    %c0_i32_2 = arith.constant 0 : i32
    %c0_i32_3 = arith.constant 0 : i32
    return %c0_i32, %c0_i32_0, %c0_i32_1, %c0_i32_2 : i32, i32, i32, i32
  }
  func.func @transform_3(%arg0: i32) -> (i32, i32, i32) {
    %c0_i32 = arith.constant 0 : i32
    %c0_i32_0 = arith.constant 0 : i32
    %c0_i32_1 = arith.constant 0 : i32
    return %arg0, %c0_i32, %c0_i32_0 : i32, i32, i32
  }
}

module attributes {stable_mosaic.version = 11 : i64} {
  func.func @kernel(%arg0: i32, %arg1: memref<2x512xbf16, #tpu.memory_space<vmem>>, %arg2: memref<4x512xbf16, #tpu.memory_space<vmem>>, %arg3: memref<1x4xf32, #tpu.memory_space<vmem>>, %arg4: memref<2x4xf32, #tpu.memory_space<vmem>>) attributes {dimension_semantics = [#tpu.dimension_semantics<arbitrary>], iteration_bounds = array<i64: 1>, scalar_prefetch = 0 : i64, scratch_operands = 0 : i64, tpu.core_type = #tpu.core_type<tc>, window_params = [{pipeline_mode = #tpu.pipeline_mode<synchronous>, transform_indices = @transform_0, window_bounds = array<i64: 2, 512>}, {pipeline_mode = #tpu.pipeline_mode<synchronous>, transform_indices = @transform_1, window_bounds = array<i64: 4, 512>}, {pipeline_mode = #tpu.pipeline_mode<synchronous>, transform_indices = @transform_2, window_bounds = array<i64: 1, 4>}, {pipeline_mode = #tpu.pipeline_mode<synchronous>, transform_indices = @transform_3, window_bounds = array<i64: 2, 4>}]} {
    %c0 = arith.constant 0 : index
    %c0_0 = arith.constant 0 : index
    %0 = vector.load %arg1[%c0, %c0_0] : memref<2x512xbf16, #tpu.memory_space<vmem>>, vector<2x512xbf16>
    %c0_1 = arith.constant 0 : index
    %c0_2 = arith.constant 0 : index
    %1 = vector.load %arg2[%c0_1, %c0_2] : memref<4x512xbf16, #tpu.memory_space<vmem>>, vector<4x512xbf16>
    %2 = tpu.transpose %1, [1, 0] : vector<4x512xbf16> -> vector<512x4xbf16>
    %cst = arith.constant dense<0.000000e+00> : vector<2x4xf32>
    %3 = tpu.matmul %0, %2, %cst {dimension_numbers = #tpu.dot_dimension_numbers<[1], [0], [0], [1], [0, 0, 1, 1], [], []>} : vector<2x512xbf16>, vector<512x4xbf16>, vector<2x4xf32> -> vector<2x4xf32>
    %c0_3 = arith.constant 0 : index
    %c0_4 = arith.constant 0 : index
    %4 = vector.load %arg3[%c0_3, %c0_4] : memref<1x4xf32, #tpu.memory_space<vmem>>, vector<1x4xf32>
    %5 = vector.broadcast %4 : vector<1x4xf32> to vector<2x4xf32>
    %6 = arith.addf %3, %5 : vector<2x4xf32>
    %c0_5 = arith.constant 0 : index
    %c0_6 = arith.constant 0 : index
    %7 = vector.load %arg4[%c0_5, %c0_6] : memref<2x4xf32, #tpu.memory_space<vmem>>, vector<2x4xf32>
    tpu.vector_store %arg4[%c0_5, %c0_6], %6 {strides = array<i32>} : memref<2x4xf32, #tpu.memory_space<vmem>>, vector<2x4xf32>,
    return
  }
  func.func @transform_0(%arg0: i32) -> (i32, i32) {
    %c0_i32 = arith.constant 0 : i32
    %c0_i32_0 = arith.constant 0 : i32
    %c0_i32_1 = arith.constant 0 : i32
    return %c0_i32, %c0_i32_0 : i32, i32
  }
  func.func @transform_1(%arg0: i32) -> (i32, i32) {
    %c0_i32 = arith.constant 0 : i32
    %c0_i32_0 = arith.constant 0 : i32
    %c0_i32_1 = arith.constant 0 : i32
    return %c0_i32, %c0_i32_0 : i32, i32
  }
  func.func @transform_2(%arg0: i32) -> (i32, i32) {
    %c0_i32 = arith.constant 0 : i32
    %c0_i32_0 = arith.constant 0 : i32
    %c0_i32_1 = arith.constant 0 : i32
    return %c0_i32, %c0_i32_0 : i32, i32
  }
  func.func @transform_3(%arg0: i32) -> (i32, i32) {
    %c0_i32 = arith.constant 0 : i32
    %c0_i32_0 = arith.constant 0 : i32
    %c0_i32_1 = arith.constant 0 : i32
    return %c0_i32, %c0_i32_0 : i32, i32
  }
}

</mosaic_0001>

<bundles_post_ra>
// kernel: tile.23
= control target key start
LH: loop header
LB: loop body
LE: loop exit
PB: predicated region body
PF: predicated region fallthrough
CT: control target
= control target key end

     0   :  { %s22_s0 = inlined_call_operand.vmem [shape: f32[16], index: 0, kind: input, shape index: {}]   ;;  %s23_s1 = inlined_call_operand.vmem [shape: f32[2,16], index: 1, kind: output, shape index: {}]  }
   0x1   :  { %v4_v0 = vld [vmem:[%s22_s0] ss:$0 sm:$0xff] }
   0x2   :  { %5 = vst [vmem:[%s23_s1] sm:$0x3] %v4_v0 }

// kernel: tile.24
= control target key start
LH: loop header
LB: loop body
LE: loop exit
PB: predicated region body
PF: predicated region fallthrough
CT: control target
= control target key end

     0   :  { %vm7_vm0 = vcmask 130048   ;;  %vm13_vm1 = vcmask 261248   ;;  %s39_s0 = inlined_call_operand.vmem [shape: f32[2,16], index: 0, kind: input, shape index: {}]   ;;  %s40_s1 = inlined_call_operand.vmem [shape: f32[1,1,1,32], index: 1, kind: output, shape index: {}]  }
   0x1   :  { %v4_v0 = vld [vmem:[%s39_s0] sm:$0x3]  ;;  %s22_s0 = smov 16  }
   0x2   :  { %5 = vst [vmem:[#allocation1] sm:$0x3] %v4_v0 }
   0x9   :  { %v10_v1 = vld [vmem:[#allocation1 + $0x1] sm:$0x1]   ;;  %v6_v2 = vld [vmem:[#allocation1] sm:$0x1]  }
   0xa   :  { %11 = vrot.lane.b32.xlu0 %v10_v1, %s22_s0  ;;  %8 = vst.msk [vmem:[#allocation0] sm:$0x1] %vm7_vm0, %v6_v2  }
  0x7c   :  { %v12_v3 = vpop.permute.xlu0 %11  }
  0x7d   :  { %14 = vst.msk [vmem:[#allocation0] sm:$0x1] %vm13_vm1, %v12_v3  }
  0x84   :  { %v18_v4 = vld [vmem:[#allocation0] sm:$0x1] }
  0x85   :  { %20 = vst [vmem:[%s40_s1] sm:$0x1] %v18_v4 }

// kernel: cnn_bn_forward.6
= control target key start
LH: loop header
LB: loop body
LE: loop exit
PB: predicated region body
PF: predicated region fallthrough
CT: control target
= control target key end

     0   :  { %s504_s12 = smov 0   ;;  %s589_s0 = inlined_call_operand.vmem [shape: bf16[16,2,8,32], index: 0, kind: input, shape index: {}]   ;;  %s590_s1 = inlined_call_operand.vmem [shape: f32[1,1,1,32], index: 1, kind: input, shape index: {}]   ;;  %s591_s2 = inlined_call_operand.vmem [shape: f32[1,1,1,32], index: 2, kind: input, shape index: {}]   ;;  %s592_s3 = inlined_call_operand.vmem [shape: bf16[16,8,16], index: 3, kind: output, shape index: {}]  }
   0x1 LB: > { %s392_s13 = sadd.s32 4294967295, %s481_s12   ;;  %p396_p0 = scmp.ge.s32.totalorder %s481_s12, 1  ;;  %s481_s12 = sphi %s504_s12, %s13_s12  }
   0x2   : > { %p139_p1 = scmp.lt.s32.totalorder %s481_s12, 3 }
   0x4   : > { %p140_p2 = pnand %p396_p0, %p139_p1 }
   0x5   : > { %s397_s14 = sshll.u32 (!%p140_p2), %s392_s13, 3  ;;  %v523_v0 = vld [vmem:[%s590_s1] ss:$0 sm:$0xff] (!%p140_p2)  ;;  %s483_s23 = smov (!%p140_p2), 112   ;;  %vm327_vm0 = vcmask (!%p140_p2), 125952  }
   0x6   : > { %143 = sbr.rel (%p140_p2) target bundleno = 163 (0xa3), region = 32  ;;  %p165_p3 = scmp.lt.s32.totalorder (!%p140_p2), %s397_s14, 15  ;;  %v532_v9 = vld [vmem:[%s591_s2] ss:$0 sm:$0xff] (!%p140_p2) }
   0xd   : > { %s594_s14 = smov (!%p165_p3, %s397_s14), 15 }
   0xe   : > { %s406_s15 = sshll.u32 %s594_s14, 3  ;;  %s401_s24 = sshll.u32 %s594_s14, 2 }
   0xf   : > { %s518_s18 = scalar_lea.vmem %s589_s0, %s406_s15  ;;  %s175_s27 = scalar_lea.vmem %s592_s3, %s401_s24 }
  0x10   : > { %v442_v1 = vld [vmem:[%s518_s18 + $0x20] sm:$0xff]   ;;  %v443_v2 = vld [vmem:[%s518_s18 + $0x28] sm:$0xff]   ;;  %v444_v30 = vld [vmem:[%s518_s18 + $0x30] sm:$0xff]  }
  0x11   : > { %v408_v3 = vld [vmem:[%s518_s18] sm:$0xff]   ;;  %v425_v4 = vunpack.c.l.bf16 %v442_v1  ;;  %v426_v5 = vunpack.c.h.bf16 %v442_v1  ;;  %v429_v6 = vunpack.c.l.bf16 %v443_v2  ;;  %v430_v7 = vunpack.c.h.bf16 %v443_v2  ;;  %v439_v8 = vld [vmem:[%s518_s18 + $0x8] sm:$0xff]   ;;  %v445_v35 = vld [vmem:[%s518_s18 + $0x38] sm:$0xff]  }
  0x12   : > { %v409_v10 = vunpack.c.l.bf16 %v408_v3  ;;  %v410_v11 = vunpack.c.h.bf16 %v408_v3  ;;  %v413_v12 = vunpack.c.l.bf16 %v439_v8  ;;  %v414_v13 = vunpack.c.h.bf16 %v439_v8  ;;  %v440_v40 = vld [vmem:[%s518_s18 + $0x10] sm:$0xff]   ;;  %v441_v49 = vld [vmem:[%s518_s18 + $0x18] sm:$0xff]  }
  0x13   : > { %v224_v14 = vmul.f32 %v425_v4, %v523_v0  ;;  %v225_v15 = vmul.f32 %v426_v5, %v523_v0  ;;  %v226_v16 = vmul.f32 %v429_v6, %v523_v0  ;;  %v227_v17 = vmul.f32 %v430_v7, %v523_v0 }
  0x14   : > { %v216_v18 = vmul.f32 %v409_v10, %v523_v0  ;;  %v217_v19 = vmul.f32 %v410_v11, %v523_v0  ;;  %v218_v20 = vmul.f32 %v413_v12, %v523_v0  ;;  %v219_v21 = vmul.f32 %v414_v13, %v523_v0 }
  0x15   : > { %v247_v22 = vadd.f32 %v532_v9, %v224_v14  ;;  %v248_v23 = vadd.f32 %v532_v9, %v225_v15  ;;  %v249_v24 = vadd.f32 %v532_v9, %v226_v16  ;;  %v250_v25 = vadd.f32 %v532_v9, %v227_v17 }
  0x16   : > { %v239_v26 = vadd.f32 %v532_v9, %v216_v18  ;;  %v240_v27 = vadd.f32 %v532_v9, %v217_v19  ;;  %v241_v28 = vadd.f32 %v532_v9, %v218_v20  ;;  %v242_v29 = vadd.f32 %v532_v9, %v219_v21 }
  0x17   : > { %v263_v31 = vmax.f32 %v247_v22, 0.0  ;;  %v264_v32 = vmax.f32 %v248_v23, 0.0  ;;  %v265_v33 = vmax.f32 %v249_v24, 0.0  ;;  %v266_v34 = vmax.f32 %v250_v25, 0.0 }
  0x18   : > { %v255_v36 = vmax.f32 %v239_v26, 0.0  ;;  %v256_v37 = vmax.f32 %v240_v27, 0.0  ;;  %v257_v38 = vmax.f32 %v241_v28, 0.0  ;;  %v258_v39 = vmax.f32 %v242_v29, 0.0 }
  0x19   : > { %v275_v41 = vmax.f32 %v263_v31, %v264_v32  ;;  %v276_v42 = vmax.f32 %v265_v33, %v266_v34  ;;  %v433_v43 = vunpack.c.l.bf16 %v444_v30  ;;  %v434_v44 = vunpack.c.h.bf16 %v444_v30 }
  0x1a   : > { %v271_v45 = vmax.f32 %v255_v36, %v256_v37  ;;  %v272_v46 = vmax.f32 %v257_v38, %v258_v39  ;;  %v437_v47 = vunpack.c.l.bf16 %v445_v35  ;;  %v438_v48 = vunpack.c.h.bf16 %v445_v35 }
  0x1b   : > { %v465_v50 = vpack.i.bf16 %v276_v42, %v275_v41  ;;  %v228_v51 = vmul.f32 %v433_v43, %v523_v0  ;;  %v229_v52 = vmul.f32 %v434_v44, %v523_v0  ;;  %v417_v53 = vunpack.c.l.bf16 %v440_v40 }
  0x1c   : > { %v455_v54 = vpack.i.bf16 %v272_v46, %v271_v45  ;;  %v230_v55 = vmul.f32 %v437_v47, %v523_v0  ;;  %v231_v56 = vmul.f32 %v438_v48, %v523_v0  ;;  %v418_v57 = vunpack.c.h.bf16 %v440_v40 }
  0x1d   : > { %466 = vrot.lane.b32.xlu1 %v465_v50, %s483_s23  ;;  %v251_v58 = vadd.f32 %v532_v9, %v228_v51  ;;  %v252_v59 = vadd.f32 %v532_v9, %v229_v52  ;;  %v421_v60 = vunpack.c.l.bf16 %v441_v49  ;;  %v422_v61 = vunpack.c.h.bf16 %v441_v49 }
  0x1e   : > { %456 = vrot.lane.b32.xlu0 %v455_v54, %s483_s23  ;;  %v253_v62 = vadd.f32 %v532_v9, %v230_v55  ;;  %v254_v63 = vadd.f32 %v532_v9, %v231_v56  ;;  %v220_v1 = vmul.f32 %v417_v53, %v523_v0  ;;  %v221_v2 = vmul.f32 %v418_v57, %v523_v0 }
  0x1f   : > { %v267_v3 = vmax.f32 %v251_v58, 0.0  ;;  %v268_v4 = vmax.f32 %v252_v59, 0.0  ;;  %v222_v5 = vmul.f32 %v421_v60, %v523_v0  ;;  %v223_v6 = vmul.f32 %v422_v61, %v523_v0 }
  0x20   : > { %v269_v7 = vmax.f32 %v253_v62, 0.0  ;;  %v270_v8 = vmax.f32 %v254_v63, 0.0  ;;  %v243_v10 = vadd.f32 %v532_v9, %v220_v1  ;;  %v244_v11 = vadd.f32 %v532_v9, %v221_v2 }
  0x21   : > { %v277_v12 = vmax.f32 %v267_v3, %v268_v4  ;;  %v245_v13 = vadd.f32 %v532_v9, %v222_v5  ;;  %v246_v14 = vadd.f32 %v532_v9, %v223_v6 }
  0x22   : > { %v278_v15 = vmax.f32 %v269_v7, %v270_v8  ;;  %v259_v16 = vmax.f32 %v243_v10, 0.0  ;;  %v260_v17 = vmax.f32 %v244_v11, 0.0 }
  0x23   : > { %v261_v18 = vmax.f32 %v245_v13, 0.0  ;;  %v262_v19 = vmax.f32 %v246_v14, 0.0 }
  0x24   : > { %v470_v20 = vpack.i.bf16 %v278_v15, %v277_v12  ;;  %v273_v21 = vmax.f32 %v259_v16, %v260_v17 }
  0x25   : > { %v274_v0 = vmax.f32 %v261_v18, %v262_v19 }
  0x26   : > { %471 = vrot.lane.b32.xlu1 %v470_v20, %s483_s23 }
  0x27   : > { %v460_v22 = vpack.i.bf16 %v274_v0, %v273_v21 }
  0x29   : > { %461 = vrot.lane.b32.xlu0 %v460_v22, %s483_s23 }
  0x8f   : > { %v467_v23 = vpop.permute.xlu1 %466 }
  0x90   : > { %v469_v24 = vunpack.i.h.bf16 %v467_v23  ;;  %v468_v25 = vunpack.i.l.bf16 %v467_v23  ;;  %v457_v26 = vpop.permute.xlu0 %456 }
  0x91   : > { %v459_v27 = vunpack.i.h.bf16 %v457_v26  ;;  %v458_v9 = vunpack.i.l.bf16 %v457_v26 }
  0x92   : > { %v316_v28 = vmax.f32 %v276_v42, %v469_v24  ;;  %v315_v29 = vmax.f32 %v275_v41, %v468_v25 }
  0x93   : > { %v312_v30 = vmax.f32 %v272_v46, %v459_v27  ;;  %v311_v31 = vmax.f32 %v271_v45, %v458_v9 }
  0x94   : > { %v324_v32 = vpack.c.bf16 %v316_v28, %v316_v28  ;;  %v323_v33 = vpack.c.bf16 %v315_v29, %v315_v29 }
  0x95   : > { %v320_v34 = vpack.c.bf16 %v312_v30, %v312_v30  ;;  %v319_v35 = vpack.c.bf16 %v311_v31, %v311_v31 }
  0x96   : > { %333 = vst.msk [vmem:[%s175_s27 + $0x14] sm:$0xf] %vm327_vm0, %v324_v32  ;;  %332 = vst.msk [vmem:[%s175_s27 + $0x10] sm:$0xf] %vm327_vm0, %v323_v33 }
  0x97   : > { %329 = vst.msk [vmem:[%s175_s27 + $0x4] sm:$0xf] %vm327_vm0, %v320_v34  ;;  %328 = vst.msk [vmem:[%s175_s27] sm:$0xf] %vm327_vm0, %v319_v35 }
  0x98   : > { %v472_v36 = vpop.permute.xlu1 %471 }
  0x99   : > { %v474_v37 = vunpack.i.h.bf16 %v472_v36  ;;  %v473_v38 = vunpack.i.l.bf16 %v472_v36 }
  0x9b   : > { %v318_v39 = vmax.f32 %v278_v15, %v474_v37  ;;  %v317_v40 = vmax.f32 %v277_v12, %v473_v38  ;;  %v462_v41 = vpop.permute.xlu0 %461 }
  0x9c   : > { %v464_v42 = vunpack.i.h.bf16 %v462_v41  ;;  %v463_v43 = vunpack.i.l.bf16 %v462_v41 }
  0x9d   : > { %v326_v44 = vpack.c.bf16 %v318_v39, %v318_v39  ;;  %v325_v45 = vpack.c.bf16 %v317_v40, %v317_v40 }
  0x9e   : > { %v314_v46 = vmax.f32 %v274_v0, %v464_v42  ;;  %v313_v47 = vmax.f32 %v273_v21, %v463_v43 }
  0x9f   : > { %335 = vst.msk [vmem:[%s175_s27 + $0x1c] sm:$0xf] %vm327_vm0, %v326_v44  ;;  %334 = vst.msk [vmem:[%s175_s27 + $0x18] sm:$0xf] %vm327_vm0, %v325_v45 }
  0xa0   : > { %v322_v48 = vpack.c.bf16 %v314_v46, %v314_v46  ;;  %v321_v49 = vpack.c.bf16 %v313_v47, %v313_v47 }
  0xa2   : > { %331 = vst.msk [vmem:[%s175_s27 + $0xc] sm:$0xf] %vm327_vm0, %v322_v48  ;;  %330 = vst.msk [vmem:[%s175_s27 + $0x8] sm:$0xf] %vm327_vm0, %v321_v49 }
  0xa3 PF: > { %s13_s12 = sadd.s32 1, %s481_s12  }
  0xa4   : > { %p10_p4 = scmp.ge.s32.totalorder %s13_s12, 4  }
  0xa6   :  { %12 = sbr.rel (!%p10_p4) target bundleno = 1 (0x1), region = 62 }

// kernel: cnn_bn_forward.5
= control target key start
LH: loop header
LB: loop body
LE: loop exit
PB: predicated region body
PF: predicated region fallthrough
CT: control target
= control target key end

     0   :  { %11 = vsyncpa [#allocation3], 0  ;;  %s4350_s0 = inlined_call_operand.vmem [shape: f32[144], index: 0, kind: input, shape index: {}]   ;;  %s4351_s1 = inlined_call_operand.vmem [shape: f32[16], index: 1, kind: input, shape index: {}]   ;;  %s4352_s2 = inlined_call_operand.vmem [shape: f32[2,18,18], index: 2, kind: input, shape index: {}]   ;;  %s4353_s3 = inlined_call_operand.vmem [shape: bf16[2,16,16,16], index: 3, kind: output, shape index: {0}]   ;;  %s4354_s4 = inlined_call_operand.vmem [shape: f32[2,16,1,16], index: 4, kind: output, shape index: {1}]   ;;  %s4355_s5 = inlined_call_operand.vmem [shape: f32[2,16,1,16], index: 5, kind: output, shape index: {2}]  }
   0x1   :  { %12 = vsyncpa [#allocation5], 0  ;;  %s3065_s18 = smov 0  }
   0x2 LB: > { %s3071_s19 = sadd.s32 4294967295, %s3029_s18   ;;  %p2644_p0 = scmp.ge.s32.totalorder %s3029_s18, 1  ;;  %s3029_s18 = sphi %s3065_s18, %s18_s18  }
   0x3   : > { %p169_p1 = scmp.lt.s32.totalorder %s3029_s18, 3  ;;  %s182_s22 = sshll.u32 %s4350_s0, 4  ;;  %s183_s22 = int_to_ptr.vmem [resolvable:$true] %s182_s22 }
   0x4   : > { %p4356_p3 = scmp.eq.s32.totalorder %s3071_s19, 0  ;;  %s193_s26 = sshll.u32 %s4351_s1, 4  ;;  %s194_s26 = int_to_ptr.vmem [resolvable:$true] %s193_s26 }
   0x5   : > { %p3078_p2 = pnand %p2644_p0, %p169_p1  ;;  %s2985_s28 = scalar_lea.vmem %s183_s22, 32 }
   0x6   : > { %p2986_p6 = scmp.ne.s32.totalorder %s183_s22, %s2985_s28  ;;  %p2993_p10 = scmp.lt.s32.totalorder %s183_s22, %s183_s22 }
   0x7   : > { %s4358_s23 = scalar_select %p3078_p2, 1, 0 }
   0x8   : > { %p2950_p4 = pneg %p3078_p2  ;;  %p2994_p11 = scmp.lt.s32.totalorder %s2985_s28, %s2985_s28 }
   0xa   : > { %p3090_p5 = pnand %p4356_p3, %p2950_p4  ;;  %p2995_p12 = por %p2994_p11, %p2993_p10 }
   0xc   : > { %p2987_p7 = pneg %p3090_p5 }
   0xe   : > { %p2988_p8 = pnand %p2987_p7, %p2986_p6 }
  0x10   : > { %p2989_p9 = pneg %p2988_p8 }
  0x12   : > { %p2996_p13 = pnand %p2995_p12, %p2989_p9 }
  0x14   : > { %2999 = shalt.err (!%p2996_p13)
}
  0x15   : > { %s3031_s29 = smov [#allocation2]   ;;  %s3000_s30 = scalar_lea.vmem %s194_s26, 16 }
  0x16   : > { %2953 = dma.vmem_to_smem (!%p3090_p5), %s183_s22, 32, %s3031_s29, [#allocation3]  }
  0x17   : > { %p3001_p0 = scmp.ne.s32.totalorder %s194_s26, %s3000_s30  ;;  %p3008_p3 = scmp.lt.s32.totalorder %s194_s26, %s194_s26 }
  0x18   : > { %p3009_p2 = scmp.lt.s32.totalorder %s3000_s30, %s3000_s30 }
  0x19   : > { %p3003_p1 = pnand %p3001_p0, %p2987_p7 }
  0x1a   : > { %p3010_p6 = por %p3009_p2, %p3008_p3 }
  0x1b   : > { %p3004_p4 = pneg %p3003_p1 }
  0x1d   : > { %p3011_p8 = pnand %p3010_p6, %p3004_p4 }
  0x1f   : > { %3014 = shalt.err (!%p3011_p8)
}
  0x20   : > { %s3032_s6 = smov [#allocation4]   ;;  %p4360_p9 = scmp.ne.s32.totalorder %s4358_s23, 0 }
  0x21   : > { %2956 = dma.vmem_to_smem (!%p3090_p5), %s194_s26, 16, %s3032_s6, [#allocation5]  }
  0x22   : > { %214 = sbr.rel (%p4360_p9) target bundleno = 583 (0x247), region = 32  ;;  %p4361_p10 = scmp.eq.s32.totalorder (!%p4360_p9), %s3071_s19, 0 }
  0x29   : > { %3020 = dma.done.wait (%p4361_p10), [#allocation3], 32   ;;  %p4362_p11 = pmov %p4361_p10 }
  0x2a   : > { %p4363_p7 = pmov %p4361_p10 }
  0x2b   : > { %3022 = vsyncadd (%p4362_p11), [#allocation3], 4294967264 }
  0x2c   : > { %3024 = dma.done.wait (%p4363_p7), [#allocation5], 16   ;;  %p4364_p2 = pmov %p4363_p7 }
  0x2e   : > { %3026 = vsyncadd (%p4364_p2), [#allocation5], 4294967280 }
  0x2f   : > { %224 = sfence }
  0x30   : > { %p255_p3 = scmp.lt.s32.totalorder %s3071_s19, 1  ;;  %s2657_s7 = sld [smem:[#allocation2 + $0x2]]  ;;  %vm394_vm0 = vcmask 130048   ;;  %vm391_vm1 = vcmask 125952   ;;  %vm404_vm2 = vcmask 122880  }
  0x31   : > { %s2656_s8 = sld [smem:[#allocation2 + $0x1]]  ;;  %s2659_s9 = sld [smem:[#allocation2 + $0x4]] }
  0x32   : > { %s4366_s19 = smov (!%p255_p3, %s3071_s19), 1  ;;  %s2660_s14 = sld [smem:[#allocation2 + $0x5]] }
  0x33   : > { %s2941_s10 = smul.u32 24, %s4366_s19  ;;  %s3033_s15 = smov 126  }
  0x34   : > { %s3034_s16 = smov 127   ;;  %s2662_s17 = sld [smem:[#allocation2 + $0x7]] }
  0x35   : > { %s3118_s13 = scalar_lea.vmem %s4352_s2, %s2941_s10  ;;  %s2663_s20 = sld [smem:[#allocation2 + $0x8]] }
  0x36   : > { %v298_v0 = vstv %s2657_s7  ;;  %v3121_v1 = vld [vmem:[%s3118_s13] sm:$0xff]  ;;  %v3124_v2 = vld [vmem:[%s3118_s13 + $0x8] sm:$0xff]  ;;  %s2667_s21 = sld [smem:[#allocation2 + $0xa]]  ;;  %s2668_s22 = sld [smem:[#allocation2 + $0xb]] }
  0x37   : > { %v284_v3 = vstv %s2656_s8  ;;  %v299_v4 = vmul.f32 %v298_v0, %v3121_v1  ;;  %v300_v6 = vmul.f32 %v298_v0, %v3124_v2  ;;  %v3133_v8 = vld [vmem:[%s3118_s13 + $0x9] sm:$0xff]  ;;  %v318_v9 = vstv %s2659_s9  ;;  %v3136_v10 = vld [vmem:[%s3118_s13 + $0x1] sm:$0xff]  ;;  %s2670_s23 = sld [smem:[#allocation2 + $0xd]]  ;;  %s2671_s24 = sld [smem:[#allocation2 + $0xe]] }
  0x38   : > { %v285_v5 = vmul.f32 %v284_v3, %v3121_v1  ;;  %v286_v7 = vmul.f32 %v284_v3, %v3124_v2  ;;  %v320_v11 = vmul.f32 %v318_v9, %v3133_v8  ;;  %v319_v12 = vmul.f32 %v318_v9, %v3136_v10  ;;  %v3147_v16 = vld [vmem:[%s3118_s13 + $0xa] sm:$0xff]  ;;  %v3150_v18 = vld [vmem:[%s3118_s13 + $0x2] sm:$0xff]  ;;  %s2673_s25 = sld [smem:[#allocation2 + $0x10]]  ;;  %s2674_s26 = sld [smem:[#allocation2 + $0x11]] }
  0x39   : > { %303 = vrot.lane.b32.xlu1 %v299_v4, %s3033_s15  ;;  %v332_v13 = vstv %s2660_s14  ;;  %s2683_s27 = sld [smem:[#allocation2 + $0x13]]  ;;  %s2684_s28 = sld [smem:[#allocation2 + $0x14]] }
  0x3a   : > { %289 = vrot.lane.b32.xlu0 %v285_v5, %s3034_s16  ;;  %v334_v14 = vmul.f32 %v332_v13, %v3133_v8  ;;  %v333_v15 = vmul.f32 %v332_v13, %v3136_v10  ;;  %v352_v17 = vstv %s2662_s17  ;;  %s2686_s29 = sld [smem:[#allocation2 + $0x16]]  ;;  %s2687_s30 = sld [smem:[#allocation2 + $0x17]] }
  0x3b   : > { %v354_v19 = vmul.f32 %v352_v17, %v3147_v16  ;;  %v353_v20 = vmul.f32 %v352_v17, %v3150_v18  ;;  %v366_v21 = vstv %s2663_s20  ;;  %s2689_s6 = sld [smem:[#allocation2 + $0x19]]  ;;  %s2690_s7 = sld [smem:[#allocation2 + $0x1a]] }
  0x3c   : > { %v368_v22 = vmul.f32 %v366_v21, %v3147_v16  ;;  %v367_v23 = vmul.f32 %v366_v21, %v3150_v18  ;;  %v423_v24 = vstv %s2667_s21  ;;  %v437_v27 = vstv %s2668_s22  ;;  %s2699_s8 = sld [smem:[#allocation2 + $0x1c]]  ;;  %s2700_s9 = sld [smem:[#allocation2 + $0x1d]] }
  0x3d   : > { %305 = vrot.lane.b32.xlu1 %v300_v6, %s3033_s15  ;;  %v425_v25 = vmul.f32 %v423_v24, %v3124_v2  ;;  %v424_v26 = vmul.f32 %v423_v24, %v3121_v1  ;;  %v439_v28 = vmul.f32 %v437_v27, %v3124_v2  ;;  %v438_v29 = vmul.f32 %v437_v27, %v3121_v1  ;;  %s2702_s10 = sld [smem:[#allocation2 + $0x1f]]  ;;  %s2703_s11 = sld [smem:[#allocation2 + $0x20]] }
  0x3e   : > { %291 = vrot.lane.b32.xlu0 %v286_v7, %s3034_s16  ;;  %v457_v30 = vstv %s2670_s23  ;;  %v471_v33 = vstv %s2671_s24  ;;  %v491_v36 = vstv %s2673_s25  ;;  %s2705_s12 = sld [smem:[#allocation2 + $0x22]]  ;;  %s2706_s14 = sld [smem:[#allocation2 + $0x23]] }
  0x3f   : > { %v459_v31 = vmul.f32 %v457_v30, %v3133_v8  ;;  %v458_v32 = vmul.f32 %v457_v30, %v3136_v10  ;;  %v473_v34 = vmul.f32 %v471_v33, %v3133_v8  ;;  %v472_v35 = vmul.f32 %v471_v33, %v3136_v10  ;;  %s2715_s17 = sld [smem:[#allocation2 + $0x25]]  ;;  %s2716_s20 = sld [smem:[#allocation2 + $0x26]] }
  0x40   : > { %v493_v37 = vmul.f32 %v491_v36, %v3147_v16  ;;  %v492_v38 = vmul.f32 %v491_v36, %v3150_v18  ;;  %v505_v39 = vstv %s2674_s26  ;;  %v562_v42 = vstv %s2683_s27  ;;  %s2718_s21 = sld [smem:[#allocation2 + $0x28]]  ;;  %s2719_s22 = sld [smem:[#allocation2 + $0x29]] }
  0x41   : > { %325 = vrot.lane.b32.xlu1 %v320_v11, %s3034_s16  ;;  %v507_v40 = vmul.f32 %v505_v39, %v3147_v16  ;;  %v506_v41 = vmul.f32 %v505_v39, %v3150_v18  ;;  %v564_v43 = vmul.f32 %v562_v42, %v3124_v2  ;;  %v563_v44 = vmul.f32 %v562_v42, %v3121_v1  ;;  %s2721_s23 = sld [smem:[#allocation2 + $0x2b]]  ;;  %s279_s24 = sld [smem:[#allocation2]] }
  0x42   : > { %323 = vrot.lane.b32.xlu0 %v319_v12, %s3034_s16  ;;  %v576_v45 = vstv %s2684_s28  ;;  %v596_v48 = vstv %s2686_s29  ;;  %v610_v51 = vstv %s2687_s30  ;;  %s2722_s25 = sld [smem:[#allocation2 + $0x2c]]  ;;  %s2731_s26 = sld [smem:[#allocation2 + $0x2e]] }
  0x43   : > { %v578_v46 = vmul.f32 %v576_v45, %v3124_v2  ;;  %v577_v47 = vmul.f32 %v576_v45, %v3121_v1  ;;  %v598_v49 = vmul.f32 %v596_v48, %v3133_v8  ;;  %v597_v50 = vmul.f32 %v596_v48, %v3136_v10  ;;  %s2658_s27 = sld [smem:[#allocation2 + $0x3]]  ;;  %s2732_s28 = sld [smem:[#allocation2 + $0x2f]] }
  0x44   : > { %v612_v52 = vmul.f32 %v610_v51, %v3133_v8  ;;  %v611_v53 = vmul.f32 %v610_v51, %v3136_v10  ;;  %v630_v54 = vstv %s2689_s6  ;;  %v644_v57 = vstv %s2690_s7  ;;  %s3257_s29 = sld [smem:[#allocation2 + $0x31]]  ;;  %s3259_s30 = sld [smem:[#allocation2 + $0x6]] }
  0x45   : > { %339 = vrot.lane.b32.xlu1 %v334_v14, %s3033_s15  ;;  %v632_v55 = vmul.f32 %v630_v54, %v3147_v16  ;;  %v631_v56 = vmul.f32 %v630_v54, %v3150_v18  ;;  %v646_v58 = vmul.f32 %v644_v57, %v3147_v16  ;;  %v645_v59 = vmul.f32 %v644_v57, %v3150_v18  ;;  %s3266_s6 = sld [smem:[#allocation2 + $0x32]]  ;;  %s3275_s7 = sld [smem:[#allocation2 + $0x34]] }
  0x46   : > { %337 = vrot.lane.b32.xlu0 %v333_v15, %s3033_s15  ;;  %v701_v60 = vstv %s2699_s8  ;;  %v715_v63 = vstv %s2700_s9  ;;  %v735_v4 = vstv %s2702_s10  ;;  %s3285_s8 = sld [smem:[#allocation2 + $0x9]]  ;;  %s3287_s9 = sld [smem:[#allocation2 + $0x35]] }
  0x47   : > { %v703_v61 = vmul.f32 %v701_v60, %v3124_v2  ;;  %v702_v62 = vmul.f32 %v701_v60, %v3121_v1  ;;  %v717_v0 = vmul.f32 %v715_v63, %v3124_v2  ;;  %v716_v3 = vmul.f32 %v715_v63, %v3121_v1  ;;  %s3289_s10 = sld [smem:[#allocation4]] }
  0x48   : > { %v737_v5 = vmul.f32 %v735_v4, %v3133_v8  ;;  %v736_v6 = vmul.f32 %v735_v4, %v3136_v10  ;;  %v749_v7 = vstv %s2703_s11  ;;  %v769_v12 = vstv %s2705_s12  ;;  %s3291_s11 = sld [smem:[#allocation2 + $0x37]]  ;;  %s3298_s12 = sld [smem:[#allocation2 + $0xc]] }
  0x49   : > { %359 = vrot.lane.b32.xlu1 %v354_v19, %s3034_s16  ;;  %v751_v9 = vmul.f32 %v749_v7, %v3133_v8  ;;  %v750_v11 = vmul.f32 %v749_v7, %v3136_v10  ;;  %v771_v13 = vmul.f32 %v769_v12, %v3147_v16  ;;  %v770_v14 = vmul.f32 %v769_v12, %v3150_v18 }
  0x4a   : > { %357 = vrot.lane.b32.xlu0 %v353_v20, %s3034_s16  ;;  %v783_v15 = vstv %s2706_s14  ;;  %v840_v20 = vstv %s2715_s17  ;;  %v922_v36 = vstv %s2722_s25  ;;  %s3300_s14 = sld [smem:[#allocation2 + $0x38]]  ;;  %s2908_s17 = sshll.u32 %s4366_s19, 7 }
  0x4b   : > { %v785_v17 = vmul.f32 %v783_v15, %v3147_v16  ;;  %v784_v19 = vmul.f32 %v783_v15, %v3150_v18  ;;  %v842_v21 = vmul.f32 %v840_v20, %v3124_v2  ;;  %v923_v39 = vmul.f32 %v922_v36, %v3150_v18  ;;  %s3336_s25 = sld [smem:[#allocation2 + $0x3b]] }
  0x4c   : > { %v993_v48 = vstv %s2732_s28  ;;  %v1027_v4 = vstv %s3266_s6  ;;  %s3360_s28 = sld [smem:[#allocation2 + $0x3e]]  ;;  %s3366_s6 = sld [smem:[#allocation2 + $0x40]] }
  0x4d   : > { %373 = vrot.lane.b32.xlu1 %v368_v22, %s3033_s15  ;;  %v841_v22 = vmul.f32 %v840_v20, %v3121_v1  ;;  %v1029_v15 = vmul.f32 %v1027_v4, %v3133_v8 }
  0x4e   : > { %371 = vrot.lane.b32.xlu0 %v367_v23, %s3033_s15  ;;  %v854_v23 = vstv %s2716_s20  ;;  %s3316_s20 = sld [smem:[#allocation2 + $0x3a]] }
  0x4f   : > { %v856_v24 = vmul.f32 %v854_v23, %v3124_v2 }
  0x51   : > { %430 = vrot.lane.b32.xlu1 %v425_v25, %s3034_s16  ;;  %v855_v25 = vmul.f32 %v854_v23, %v3121_v1 }
  0x52   : > { %428 = vrot.lane.b32.xlu0 %v424_v26, %s3034_s16  ;;  %v874_v26 = vstv %s2718_s21  ;;  %s3318_s21 = sld [smem:[#allocation2 + $0xf]] }
  0x53   : > { %v876_v27 = vmul.f32 %v874_v26, %v3133_v8 }
  0x55   : > { %444 = vrot.lane.b32.xlu1 %v439_v28, %s3033_s15  ;;  %v875_v28 = vmul.f32 %v874_v26, %v3136_v10 }
  0x56   : > { %442 = vrot.lane.b32.xlu0 %v438_v29, %s3033_s15  ;;  %v888_v29 = vstv %s2719_s22  ;;  %s3433_s22 = sld [smem:[#allocation2 + $0x46]] }
  0x57   : > { %v890_v30 = vmul.f32 %v888_v29, %v3133_v8 }
  0x59   : > { %464 = vrot.lane.b32.xlu1 %v459_v31, %s3034_s16  ;;  %v889_v31 = vmul.f32 %v888_v29, %v3136_v10  ;;  %v1061_v29 = vstv %s3287_s9 }
  0x5a   : > { %462 = vrot.lane.b32.xlu0 %v458_v32, %s3034_s16  ;;  %v908_v32 = vstv %s2721_s23  ;;  %s3442_s23 = sld [smem:[#allocation2 + $0x47]] }
  0x5b   : > { %v910_v33 = vmul.f32 %v908_v32, %v3147_v16 }
  0x5d   : > { %478 = vrot.lane.b32.xlu1 %v473_v34, %s3033_s15  ;;  %v909_v34 = vmul.f32 %v908_v32, %v3150_v18 }
  0x5e   : > { %476 = vrot.lane.b32.xlu0 %v472_v35, %s3033_s15  ;;  %v280_v35 = vstv %s279_s24  ;;  %s3325_s24 = scalar_lea.vmem %s4353_s3, %s2908_s17  ;;  %s3404_s17 = sld [smem:[#allocation2 + $0x43]] }
  0x61   : > { %498 = vrot.lane.b32.xlu1 %v493_v37, %s3034_s16  ;;  %v281_v37 = vmul.f32 %v280_v35, %v3121_v1 }
  0x62   : > { %496 = vrot.lane.b32.xlu0 %v492_v38, %s3034_s16  ;;  %v924_v38 = vmul.f32 %v922_v36, %v3147_v16 }
  0x65   : > { %512 = vrot.lane.b32.xlu1 %v507_v40, %s3033_s15  ;;  %v979_v40 = vstv %s2731_s26  ;;  %s3350_s26 = sld [smem:[#allocation2 + $0x3d]] }
  0x66   : > { %510 = vrot.lane.b32.xlu0 %v506_v41, %s3033_s15  ;;  %v981_v45 = vmul.f32 %v979_v40, %v3124_v2 }
  0x69   : > { %569 = vrot.lane.b32.xlu1 %v564_v43, %s3034_s16 }
  0x6a   : > { %567 = vrot.lane.b32.xlu0 %v563_v44, %s3034_s16  ;;  %v282_v44 = vmul.f32 %v280_v35, %v3124_v2  ;;  %v1118_v35 = vstv %s3291_s11  ;;  %s3536_s11 = sld [smem:[#allocation2 + $0x24]] }
  0x6d   : > { %583 = vrot.lane.b32.xlu1 %v578_v46, %s3033_s15  ;;  %v980_v46 = vmul.f32 %v979_v40, %v3121_v1 }
  0x6e   : > { %581 = vrot.lane.b32.xlu0 %v577_v47, %s3033_s15  ;;  %v312_v47 = vstv %s2658_s27  ;;  %s2654_s27 = sshll.u32 %s4366_s19, 4  ;;  %s3368_s19 = sld [smem:[#allocation2 + $0x15]] }
  0x6f   : > { %v313_v54 = vmul.f32 %v312_v47, %v3136_v10  ;;  %s3373_s9 = scalar_lea.vmem %s4354_s4, %s2654_s27 }
  0x71   : > { %603 = vrot.lane.b32.xlu1 %v598_v49, %s3034_s16 }
  0x72   : > { %601 = vrot.lane.b32.xlu0 %v597_v50, %s3034_s16 }
  0x75   : > { %617 = vrot.lane.b32.xlu1 %v612_v52, %s3033_s15 }
  0x76   : > { %615 = vrot.lane.b32.xlu0 %v611_v53, %s3033_s15  ;;  %v314_v53 = vmul.f32 %v312_v47, %v3133_v8  ;;  %v1132_v47 = vstv %s3300_s14  ;;  %s3391_s14 = sld [smem:[#allocation2 + $0x41]] }
  0x79   : > { %637 = vrot.lane.b32.xlu1 %v632_v55, %s3034_s16  ;;  %v995_v55 = vmul.f32 %v993_v48, %v3124_v2 }
  0x7a   : > { %635 = vrot.lane.b32.xlu0 %v631_v56, %s3034_s16  ;;  %v994_v56 = vmul.f32 %v993_v48, %v3121_v1 }
  0x7d   : > { %651 = vrot.lane.b32.xlu1 %v646_v58, %s3033_s15  ;;  %v1013_v58 = vstv %s3257_s29  ;;  %s3362_s29 = sld [smem:[#allocation4 + $0x1]] }
  0x7e   : > { %649 = vrot.lane.b32.xlu0 %v645_v59, %s3033_s15 }
  0x81   : > { %708 = vrot.lane.b32.xlu1 %v703_v61, %s3034_s16  ;;  %v346_v61 = vstv %s3259_s30  ;;  %s3364_s30 = sld [smem:[#allocation2 + $0x12]] }
  0x82   : > { %706 = vrot.lane.b32.xlu0 %v702_v62, %s3034_s16  ;;  %v348_v7 = vmul.f32 %v346_v61, %v3147_v16 }
  0x85   : > { %722 = vrot.lane.b32.xlu1 %v717_v0, %s3033_s15  ;;  %v1015_v0 = vmul.f32 %v1013_v58, %v3133_v8 }
  0x86   : > { %720 = vrot.lane.b32.xlu0 %v716_v3, %s3033_s15  ;;  %v1014_v3 = vmul.f32 %v1013_v58, %v3136_v10 }
  0x89   : > { %742 = vrot.lane.b32.xlu1 %v737_v5, %s3034_s16 }
  0x8a   : > { %740 = vrot.lane.b32.xlu0 %v736_v6, %s3034_s16 }
  0x8d   : > { %756 = vrot.lane.b32.xlu1 %v751_v9, %s3033_s15  ;;  %v347_v9 = vmul.f32 %v346_v61, %v3150_v18 }
  0x8e   : > { %754 = vrot.lane.b32.xlu0 %v750_v11, %s3033_s15 }
  0x91   : > { %776 = vrot.lane.b32.xlu1 %v771_v13, %s3034_s16 }
  0x92   : > { %774 = vrot.lane.b32.xlu0 %v770_v14, %s3034_s16 }
  0x95   : > { %790 = vrot.lane.b32.xlu1 %v785_v17, %s3033_s15  ;;  %v1028_v17 = vmul.f32 %v1027_v4, %v3136_v10 }
  0x96   : > { %788 = vrot.lane.b32.xlu0 %v784_v19, %s3033_s15 }
  0x99   : > { %847 = vrot.lane.b32.xlu1 %v842_v21, %s3034_s16  ;;  %v1047_v21 = vstv %s3275_s7  ;;  %s3511_s7 = sld [smem:[#allocation2 + $0x4f]] }
  0x9a   : > { %845 = vrot.lane.b32.xlu0 %v841_v22, %s3034_s16 }
  0x9d   : > { %861 = vrot.lane.b32.xlu1 %v856_v24, %s3033_s15  ;;  %v1049_v24 = vmul.f32 %v1047_v21, %v3147_v16 }
  0x9e   : > { %859 = vrot.lane.b32.xlu0 %v855_v25, %s3033_s15  ;;  %v1048_v25 = vmul.f32 %v1047_v21, %v3150_v18 }
  0xa1   : > { %881 = vrot.lane.b32.xlu1 %v876_v27, %s3034_s16 }
  0xa2   : > { %879 = vrot.lane.b32.xlu0 %v875_v28, %s3034_s16  ;;  %v419_v28 = vstv %s3285_s8  ;;  %s3532_s8 = sld [smem:[#allocation2 + $0x50]] }
  0xa3   : > { %v421_v36 = vmul.f32 %v419_v28, %v3124_v2 }
  0xa5   : > { %895 = vrot.lane.b32.xlu1 %v890_v30, %s3033_s15  ;;  %v380_v30 = vstv %s3289_s10  ;;  %s3534_s10 = sld [smem:[#allocation4 + $0x3]] }
  0xa6   : > { %893 = vrot.lane.b32.xlu0 %v889_v31, %s3033_s15 }
  0xa9   : > { %915 = vrot.lane.b32.xlu1 %v910_v33, %s3034_s16 }
  0xaa   : > { %913 = vrot.lane.b32.xlu0 %v909_v34, %s3034_s16 }
  0xab   : > { %v304_v41 = vpop.permute.xlu1 %303 }
  0xac   : > { %v290_v42 = vpop.permute.xlu0 %289 }
  0xad   : > { %v295_v43 = vadd.f32 %v290_v42, %v281_v37  ;;  %929 = vrot.lane.b32.xlu1 %v924_v38, %s3033_s15  ;;  %v1063_v37 = vmul.f32 %v1061_v29, %v3147_v16  ;;  %v1062_v38 = vmul.f32 %v1061_v29, %v3150_v18  ;;  %v451_v42 = vstv %s3298_s12  ;;  %s3383_s12 = scalar_lea.vmem %s4355_s5, %s2654_s27  ;;  %s3448_s27 = sld [smem:[#allocation2 + $0x49]] }
  0xae   : > { %927 = vrot.lane.b32.xlu0 %v923_v39, %s3033_s15 }
  0xaf   : > { %v306_v49 = vpop.permute.xlu1 %305  ;;  %v309_v51 = vadd.f32 %v304_v41, %v295_v43  ;;  %v420_v41 = vmul.f32 %v419_v28, %v3121_v1 }
  0xb0   : > { %v292_v50 = vpop.permute.xlu0 %291 }
  0xb1   : > { %v296_v52 = vadd.f32 %v292_v50, %v282_v44  ;;  %986 = vrot.lane.b32.xlu1 %v981_v45, %s3034_s16  ;;  %v315_v63 = vadd.f32 %v313_v54, %v309_v51  ;;  %v1120_v45 = vmul.f32 %v1118_v35, %v3124_v2  ;;  %v453_v54 = vmul.f32 %v451_v42, %v3133_v8 }
  0xb2   : > { %984 = vrot.lane.b32.xlu0 %v980_v46, %s3034_s16  ;;  %v1119_v46 = vmul.f32 %v1118_v35, %v3121_v1 }
  0xb3   : > { %v310_v57 = vadd.f32 %v306_v49, %v296_v52  ;;  %v326_v59 = vpop.permute.xlu1 %325 }
  0xb4   : > { %v324_v60 = vpop.permute.xlu0 %323 }
  0xb5   : > { %v316_v62 = vadd.f32 %v314_v53, %v310_v57  ;;  %1000 = vrot.lane.b32.xlu1 %v995_v55, %s3033_s15  ;;  %v329_v6 = vadd.f32 %v324_v60, %v315_v63  ;;  %v452_v55 = vmul.f32 %v451_v42, %v3136_v10 }
  0xb6   : > { %998 = vrot.lane.b32.xlu0 %v994_v56, %s3033_s15 }
  0xb7   : > { %v330_v5 = vadd.f32 %v326_v59, %v316_v62  ;;  %v340_v11 = vpop.permute.xlu1 %339 }
  0xb8   : > { %v338_v12 = vpop.permute.xlu0 %337 }
  0xb9   : > { %v344_v13 = vadd.f32 %v340_v11, %v330_v5  ;;  %v343_v14 = vadd.f32 %v338_v12, %v329_v6  ;;  %1020 = vrot.lane.b32.xlu1 %v1015_v0, %s3034_s16  ;;  %v1134_v5 = vmul.f32 %v1132_v47, %v3124_v2  ;;  %v1133_v6 = vmul.f32 %v1132_v47, %v3121_v1 }
  0xba   : > { %1018 = vrot.lane.b32.xlu0 %v1014_v3, %s3034_s16 }
  0xbb   : > { %v350_v19 = vadd.f32 %v348_v7, %v344_v13  ;;  %v349_v20 = vadd.f32 %v347_v9, %v343_v14  ;;  %v360_v22 = vpop.permute.xlu1 %359  ;;  %v1152_v7 = vstv %s3316_s20  ;;  %v485_v9 = vstv %s3318_s21  ;;  %s3406_s20 = sld [smem:[#allocation2 + $0x18]]  ;;  %s3419_s21 = sld [smem:[#allocation2 + $0x44]] }
  0xbc   : > { %v358_v23 = vpop.permute.xlu0 %357  ;;  %v1154_v21 = vmul.f32 %v1152_v7, %v3133_v8 }
  0xbd   : > { %1034 = vrot.lane.b32.xlu1 %v1029_v15, %s3033_s15  ;;  %v364_v26 = vadd.f32 %v360_v22, %v350_v19  ;;  %v363_v27 = vadd.f32 %v358_v23, %v349_v20  ;;  %v1153_v22 = vmul.f32 %v1152_v7, %v3136_v10  ;;  %v487_v23 = vmul.f32 %v485_v9, %v3147_v16 }
  0xbe   : > { %1032 = vrot.lane.b32.xlu0 %v1028_v17, %s3033_s15 }
  0xbf   : > { %v374_v31 = vpop.permute.xlu1 %373 }
  0xc0   : > { %v372_v32 = vpop.permute.xlu0 %371  ;;  %v378_v33 = vadd.f32 %v374_v31, %v364_v26 }
  0xc1   : > { %v377_v34 = vadd.f32 %v372_v32, %v363_v27  ;;  %1054 = vrot.lane.b32.xlu1 %v1049_v24, %s3034_s16  ;;  %v486_v24 = vmul.f32 %v485_v9, %v3150_v18 }
  0xc2   : > { %1052 = vrot.lane.b32.xlu0 %v1048_v25, %s3034_s16  ;;  %v382_v39 = vadd.f32 %v380_v30, %v378_v33  ;;  %v1166_v25 = vstv %s3336_s25  ;;  %s3444_s25 = sld [smem:[#allocation4 + $0x2]] }
  0xc3   : > { %v381_v40 = vadd.f32 %v380_v30, %v377_v34  ;;  %v431_v43 = vpop.permute.xlu1 %430 }
  0xc4   : > { %v429_v44 = vpop.permute.xlu0 %428  ;;  %v2910_v48 = vpack.c.bf16 %v382_v39, %v382_v39  ;;  %v396_v49 = vsel %vm394_vm0, %v382_v39, 0.0  ;;  %v407_v50 = vmul.f32 %v382_v39, %v382_v39  ;;  %v435_v58 = vadd.f32 %v431_v43, %v421_v36 }
  0xc5   : > { %v2909_v51 = vpack.c.bf16 %v381_v40, %v381_v40  ;;  %v395_v52 = vsel %vm394_vm0, %v381_v40, 0.0  ;;  %v406_v53 = vmul.f32 %v381_v40, %v381_v40  ;;  %1068 = vrot.lane.b32.xlu1 %v1063_v37, %s3033_s15  ;;  %v434_v59 = vadd.f32 %v429_v44, %v420_v41 }
  0xc6   : > { %1066 = vrot.lane.b32.xlu0 %v1062_v38, %s3033_s15  ;;  %393 = vst.msk [vmem:[%s3325_s24 + $0x4] sm:$0xf] %vm391_vm1, %v2910_v48  ;;  %v409_v56 = vsel %vm394_vm0, %v407_v50, 0.0  ;;  %v397_v57 = vadd.f32 %v396_v49, %v395_v52  ;;  %v1168_v36 = vmul.f32 %v1166_v25, %v3133_v8  ;;  %v1167_v37 = vmul.f32 %v1166_v25, %v3136_v10 }
  0xc7   : > { %392 = vst.msk [vmem:[%s3325_s24] sm:$0xf] %vm391_vm1, %v2909_v51  ;;  %v408_v60 = vsel %vm394_vm0, %v406_v53, 0.0  ;;  %v445_v61 = vpop.permute.xlu1 %444  ;;  %v1186_v38 = vstv %s3350_s26  ;;  %v1200_v50 = vstv %s3360_s28  ;;  %v519_v51 = vstv %s3362_s29  ;;  %s3446_s26 = sld [smem:[#allocation2 + $0x1b]]  ;;  %s3450_s28 = sld [smem:[#allocation2 + $0x1e]] }
  0xc8   : > { %v443_v62 = vpop.permute.xlu0 %442  ;;  %v398_v63 = vrot.slane %v397_v57, 4  ;;  %v410_v0 = vadd.f32 %v409_v56, %v408_v60  ;;  %v449_v3 = vadd.f32 %v445_v61, %v435_v58  ;;  %v1187_v47 = vmul.f32 %v1186_v38, %v3150_v18  ;;  %s3463_s29 = sld [smem:[#allocation2 + $0x4a]] }
  0xc9   : > { %v448_v4 = vadd.f32 %v443_v62, %v434_v59  ;;  %1125 = vrot.lane.b32.xlu1 %v1120_v45, %s3034_s16  ;;  %v590_v58 = vstv %s3368_s19  ;;  %v1202_v59 = vmul.f32 %v1200_v50, %v3147_v16  ;;  %v1201_v60 = vmul.f32 %v1200_v50, %v3150_v18  ;;  %s3491_s19 = sld [smem:[#allocation2 + $0x4d]] }
  0xca   : > { %1123 = vrot.lane.b32.xlu0 %v1119_v46, %s3034_s16  ;;  %v399_v11 = vadd.f32 %v398_v63, %v397_v57  ;;  %v411_v12 = vrot.slane %v410_v0, 4  ;;  %v455_v13 = vadd.f32 %v453_v54, %v449_v3  ;;  %v1188_v46 = vmul.f32 %v1186_v38, %v3147_v16 }
  0xcb   : > { %v454_v14 = vadd.f32 %v452_v55, %v448_v4  ;;  %v465_v15 = vpop.permute.xlu1 %464  ;;  %v558_v54 = vstv %s3364_s30  ;;  %v1257_v57 = vstv %s3366_s6  ;;  %v592_v7 = vmul.f32 %v590_v58, %v3133_v8  ;;  %s3476_s30 = sld [smem:[#allocation2 + $0x4c]]  ;;  %s3478_s6 = sld [smem:[#allocation2 + $0x21]] }
  0xcc   : > { %v463_v17 = vpop.permute.xlu0 %462  ;;  %v400_v19 = vrot.slane %v399_v11, 2  ;;  %v412_v20 = vadd.f32 %v411_v12, %v410_v0  ;;  %v469_v28 = vadd.f32 %v465_v15, %v455_v13  ;;  %v560_v63 = vmul.f32 %v558_v54, %v3124_v2 }
  0xcd   : > { %1139 = vrot.lane.b32.xlu1 %v1134_v5, %s3033_s15  ;;  %v468_v29 = vadd.f32 %v463_v17, %v454_v14  ;;  %v559_v0 = vmul.f32 %v558_v54, %v3121_v1  ;;  %v1259_v5 = vmul.f32 %v1257_v57, %v3124_v2  ;;  %v591_v17 = vmul.f32 %v590_v58, %v3136_v10 }
  0xce   : > { %1137 = vrot.lane.b32.xlu0 %v1133_v6, %s3033_s15  ;;  %v401_v26 = vadd.f32 %v400_v19, %v399_v11  ;;  %v413_v27 = vrot.slane %v412_v20, 2  ;;  %v1258_v6 = vmul.f32 %v1257_v57, %v3121_v1  ;;  %v1271_v19 = vstv %s3391_s14  ;;  %s3538_s14 = sld [smem:[#allocation2 + $0x52]] }
  0xcf   : > { %v479_v30 = vpop.permute.xlu1 %478 }
  0xd0   : > { %v477_v31 = vpop.permute.xlu0 %476  ;;  %v402_v32 = vrot.slane %v401_v26, 1  ;;  %v414_v33 = vadd.f32 %v413_v27, %v412_v20  ;;  %v483_v34 = vadd.f32 %v479_v30, %v469_v28 }
  0xd1   : > { %v482_v35 = vadd.f32 %v477_v31, %v468_v29  ;;  %1159 = vrot.lane.b32.xlu1 %v1154_v21, %s3034_s16  ;;  %v1273_v31 = vmul.f32 %v1271_v19, %v3124_v2 }
  0xd2   : > { %1157 = vrot.lane.b32.xlu0 %v1153_v22, %s3034_s16  ;;  %v403_v39 = vadd.f32 %v402_v32, %v401_v26  ;;  %v415_v40 = vrot.slane %v414_v33, 1  ;;  %v489_v41 = vadd.f32 %v487_v23, %v483_v34  ;;  %v1272_v32 = vmul.f32 %v1271_v19, %v3121_v1 }
  0xd3   : > { %v488_v42 = vadd.f32 %v486_v24, %v482_v35  ;;  %v499_v43 = vpop.permute.xlu1 %498  ;;  %v624_v34 = vstv %s3406_s20  ;;  %s3553_s20 = sld [smem:[#allocation2 + $0x53]] }
  0xd4   : > { %v497_v44 = vpop.permute.xlu0 %496  ;;  %405 = vst.msk [vmem:[%s3373_s9] sm:$0x1] %vm404_vm2, %v403_v39  ;;  %v416_v45 = vadd.f32 %v415_v40, %v414_v33  ;;  %v503_v48 = vadd.f32 %v499_v43, %v489_v41  ;;  %v1291_v33 = vstv %s3404_s17  ;;  %s3540_s17 = sld [smem:[#allocation2 + $0x27]] }
  0xd5   : > { %1173 = vrot.lane.b32.xlu1 %v1168_v36, %s3033_s15  ;;  %v502_v49 = vadd.f32 %v497_v44, %v488_v42  ;;  %v1293_v43 = vmul.f32 %v1291_v33, %v3133_v8  ;;  %v1292_v44 = vmul.f32 %v1291_v33, %v3136_v10 }
  0xd6   : > { %1171 = vrot.lane.b32.xlu0 %v1167_v37, %s3033_s15  ;;  %417 = vst.msk [vmem:[%s3383_s12] sm:$0x1] %vm404_vm2, %v416_v45  ;;  %v626_v45 = vmul.f32 %v624_v34, %v3147_v16 }
  0xd7   : > { %v513_v52 = vpop.permute.xlu1 %512 }
  0xd8   : > { %v511_v53 = vpop.permute.xlu0 %510  ;;  %v517_v55 = vadd.f32 %v513_v52, %v503_v48 }
  0xd9   : > { %v516_v56 = vadd.f32 %v511_v53, %v502_v49  ;;  %1193 = vrot.lane.b32.xlu1 %v1188_v46, %s3034_s16  ;;  %v625_v46 = vmul.f32 %v624_v34, %v3150_v18 }
  0xda   : > { %1191 = vrot.lane.b32.xlu0 %v1187_v47, %s3034_s16  ;;  %v521_v61 = vadd.f32 %v519_v51, %v517_v55  ;;  %v1305_v47 = vstv %s3419_s21  ;;  %s3566_s21 = sld [smem:[#allocation2 + $0x55]] }
  0xdb   : > { %v520_v62 = vadd.f32 %v519_v51, %v516_v56  ;;  %v570_v3 = vpop.permute.xlu1 %569  ;;  %v1307_v58 = vmul.f32 %v1305_v47, %v3133_v8 }
  0xdc   : > { %v568_v4 = vpop.permute.xlu0 %567  ;;  %v2912_v9 = vpack.c.bf16 %v521_v61, %v521_v61  ;;  %v534_v11 = vsel %vm394_vm0, %v521_v61, 0.0  ;;  %v545_v12 = vmul.f32 %v521_v61, %v521_v61  ;;  %v574_v22 = vadd.f32 %v570_v3, %v560_v63 }
  0xdd   : > { %v2911_v13 = vpack.c.bf16 %v520_v62, %v520_v62  ;;  %v533_v14 = vsel %vm394_vm0, %v520_v62, 0.0  ;;  %v544_v15 = vmul.f32 %v520_v62, %v520_v62  ;;  %1207 = vrot.lane.b32.xlu1 %v1202_v59, %s3033_s15  ;;  %v573_v23 = vadd.f32 %v568_v4, %v559_v0 }
  0xde   : > { %1205 = vrot.lane.b32.xlu0 %v1201_v60, %s3033_s15  ;;  %2679 = vst.msk [vmem:[%s3325_s24 + $0xc] sm:$0xf] %vm391_vm1, %v2912_v9  ;;  %v547_v20 = vsel %vm394_vm0, %v545_v12, 0.0  ;;  %v535_v21 = vadd.f32 %v534_v11, %v533_v14  ;;  %v1306_v59 = vmul.f32 %v1305_v47, %v3136_v10  ;;  %v1325_v60 = vstv %s3433_s22  ;;  %v3502_v47 = vld [vmem:[%s3118_s13 + $0x8] sm:$0xff]  ;;  %s3568_s22 = sld [smem:[#allocation2 + $0x2a]] }
  0xdf   : > { %2678 = vst.msk [vmem:[%s3325_s24 + $0x8] sm:$0xf] %vm391_vm1, %v2911_v13  ;;  %v546_v24 = vsel %vm394_vm0, %v544_v15, 0.0  ;;  %v584_v25 = vpop.permute.xlu1 %583  ;;  %v1339_v12 = vstv %s3442_s23  ;;  %v658_v13 = vstv %s3444_s25  ;;  %s3581_s23 = sld [smem:[#allocation2 + $0x56]]  ;;  %s3595_s25 = sld [smem:[#allocation2 + $0x58]] }
  0xe0   : > { %v582_v26 = vpop.permute.xlu0 %581  ;;  %v536_v27 = vrot.slane %v535_v21, 4  ;;  %v548_v28 = vadd.f32 %v547_v20, %v546_v24  ;;  %v588_v29 = vadd.f32 %v584_v25, %v574_v22  ;;  %v729_v22 = vstv %s3450_s28  ;;  %s3608_s28 = sld [smem:[#allocation2 + $0x2d]] }
  0xe1   : > { %v587_v30 = vadd.f32 %v582_v26, %v573_v23  ;;  %1264 = vrot.lane.b32.xlu1 %v1259_v5, %s3034_s16  ;;  %v1341_v23 = vmul.f32 %v1339_v12, %v3147_v16  ;;  %v1340_v24 = vmul.f32 %v1339_v12, %v3150_v18 }
  0xe2   : > { %1262 = vrot.lane.b32.xlu0 %v1258_v6, %s3034_s16  ;;  %v537_v35 = vadd.f32 %v536_v27, %v535_v21  ;;  %v549_v36 = vrot.slane %v548_v28, 4  ;;  %v594_v37 = vadd.f32 %v592_v7, %v588_v29  ;;  %v1327_v6 = vmul.f32 %v1325_v60, %v3147_v16 }
  0xe3   : > { %v593_v38 = vadd.f32 %v591_v17, %v587_v30  ;;  %v604_v39 = vpop.permute.xlu1 %603  ;;  %v1326_v7 = vmul.f32 %v1325_v60, %v3150_v18  ;;  %v697_v17 = vstv %s3446_s26  ;;  %v1396_v21 = vstv %s3448_s27  ;;  %s3604_s26 = sld [smem:[#allocation2 + $0x59]]  ;;  %s3606_s27 = sld [smem:[#allocation4 + $0x4]] }
  0xe4   : > { %v602_v40 = vpop.permute.xlu0 %601  ;;  %v538_v41 = vrot.slane %v537_v35, 2  ;;  %v550_v42 = vadd.f32 %v549_v36, %v548_v28  ;;  %v608_v50 = vadd.f32 %v604_v39, %v594_v37  ;;  %v699_v27 = vmul.f32 %v697_v17, %v3124_v2 }
  0xe5   : > { %1278 = vrot.lane.b32.xlu1 %v1273_v31, %s3033_s15  ;;  %v607_v51 = vadd.f32 %v602_v40, %v593_v38  ;;  %v698_v28 = vmul.f32 %v697_v17, %v3121_v1  ;;  %v1398_v31 = vmul.f32 %v1396_v21, %v3124_v2  ;;  %v1397_v16 = vmul.f32 %v1396_v21, %v3121_v1 }
  0xe6   : > { %1276 = vrot.lane.b32.xlu0 %v1272_v32, %s3033_s15  ;;  %v539_v48 = vadd.f32 %v538_v41, %v537_v35  ;;  %v551_v49 = vrot.slane %v550_v42, 2  ;;  %v731_v18 = vmul.f32 %v729_v22, %v3133_v8  ;;  %v730_v38 = vmul.f32 %v729_v22, %v3136_v10 }
  0xe7   : > { %v618_v52 = vpop.permute.xlu1 %617  ;;  %v1410_v2 = vstv %s3463_s29  ;;  %s3610_s29 = sld [smem:[#allocation2 + $0x5b]] }
  0xe8   : > { %v616_v53 = vpop.permute.xlu0 %615  ;;  %v540_v54 = vrot.slane %v539_v48, 1  ;;  %v552_v55 = vadd.f32 %v551_v49, %v550_v42  ;;  %v622_v56 = vadd.f32 %v618_v52, %v608_v50  ;;  %v3506_v49 = vld [vmem:[%s3118_s13] sm:$0xff]  ;;  %v763_v52 = vstv %s3478_s6  ;;  %s3625_s6 = sld [smem:[#allocation2 + $0x5c]] }
  0xe9   : > { %v621_v57 = vadd.f32 %v616_v53, %v607_v51  ;;  %1298 = vrot.lane.b32.xlu1 %v1293_v43, %s3034_s16  ;;  %v1411_v50 = vmul.f32 %v3506_v49, %v1410_v2  ;;  %v1430_v51 = vstv %s3476_s30  ;;  %s3612_s30 = sld [smem:[#allocation2 + $0x30]] }
  0xea   : > { %1296 = vrot.lane.b32.xlu0 %v1292_v44, %s3034_s16  ;;  %v541_v61 = vadd.f32 %v540_v54, %v539_v48  ;;  %v553_v62 = vrot.slane %v552_v55, 1  ;;  %v628_v63 = vadd.f32 %v626_v45, %v622_v56  ;;  %v1412_v48 = vmul.f32 %v3502_v47, %v1410_v2 }
  0xeb   : > { %v627_v0 = vadd.f32 %v625_v46, %v621_v57  ;;  %v638_v3 = vpop.permute.xlu1 %637 }
  0xec   : > { %v636_v4 = vpop.permute.xlu0 %635  ;;  %2680 = vst.msk [vmem:[%s3373_s9 + $0x1] sm:$0x1] %vm404_vm2, %v541_v61  ;;  %v554_v5 = vadd.f32 %v553_v62, %v552_v55  ;;  %v642_v9 = vadd.f32 %v638_v3, %v628_v63  ;;  %v3514_v61 = vld [vmem:[%s3118_s13 + $0x9] sm:$0xff]  ;;  %v3520_v63 = vld [vmem:[%s3118_s13 + $0x1] sm:$0xff] }
  0xed   : > { %1312 = vrot.lane.b32.xlu1 %v1307_v58, %s3033_s15  ;;  %v641_v11 = vadd.f32 %v636_v4, %v627_v0  ;;  %v1432_v62 = vmul.f32 %v3514_v61, %v1430_v51  ;;  %v1431_v0 = vmul.f32 %v3520_v63, %v1430_v51  ;;  %v3524_v3 = vld [vmem:[%s3118_s13 + $0xa] sm:$0xff] }
  0xee   : > { %1310 = vrot.lane.b32.xlu0 %v1306_v59, %s3033_s15  ;;  %2681 = vst.msk [vmem:[%s3383_s12 + $0x1] sm:$0x1] %vm404_vm2, %v554_v5  ;;  %v765_v4 = vmul.f32 %v3524_v3, %v763_v52  ;;  %v3528_v5 = vld [vmem:[%s3118_s13 + $0x2] sm:$0xff] }
  0xef   : > { %v652_v14 = vpop.permute.xlu1 %651 }
  0xf0   : > { %v650_v15 = vpop.permute.xlu0 %649  ;;  %v656_v19 = vadd.f32 %v652_v14, %v642_v9 }
  0xf1   : > { %v655_v20 = vadd.f32 %v650_v15, %v641_v11  ;;  %1332 = vrot.lane.b32.xlu1 %v1327_v6, %s3034_s16  ;;  %v764_v6 = vmul.f32 %v3528_v5, %v763_v52 }
  0xf2   : > { %1330 = vrot.lane.b32.xlu0 %v1326_v7, %s3034_s16  ;;  %v660_v25 = vadd.f32 %v658_v13, %v656_v19  ;;  %v1444_v7 = vstv %s3491_s19  ;;  %s3638_s19 = sld [smem:[#allocation2 + $0x5e]] }
  0xf3   : > { %v659_v26 = vadd.f32 %v658_v13, %v655_v20  ;;  %v709_v29 = vpop.permute.xlu1 %708  ;;  %v1446_v22 = vmul.f32 %v3514_v61, %v1444_v7 }
  0xf4   : > { %v707_v30 = vpop.permute.xlu0 %706  ;;  %v2914_v32 = vpack.c.bf16 %v660_v25, %v660_v25  ;;  %v673_v33 = vsel %vm394_vm0, %v660_v25, 0.0  ;;  %v684_v34 = vmul.f32 %v660_v25, %v660_v25  ;;  %v713_v39 = vadd.f32 %v709_v29, %v699_v27 }
  0xf5   : > { %v2913_v35 = vpack.c.bf16 %v659_v26, %v659_v26  ;;  %v672_v36 = vsel %vm394_vm0, %v659_v26, 0.0  ;;  %v683_v37 = vmul.f32 %v659_v26, %v659_v26  ;;  %1346 = vrot.lane.b32.xlu1 %v1341_v23, %s3033_s15  ;;  %v712_v40 = vadd.f32 %v707_v30, %v698_v28 }
  0xf6   : > { %1344 = vrot.lane.b32.xlu0 %v1340_v24, %s3033_s15  ;;  %2695 = vst.msk [vmem:[%s3325_s24 + $0x14] sm:$0xf] %vm391_vm1, %v2914_v32  ;;  %v686_v1 = vsel %vm394_vm0, %v684_v34, 0.0  ;;  %v674_v8 = vadd.f32 %v673_v33, %v672_v36  ;;  %v1445_v23 = vmul.f32 %v3520_v63, %v1444_v7  ;;  %v1464_v24 = vstv %s3511_s7  ;;  %s3640_s7 = sld [smem:[#allocation2 + $0x33]] }
  0xf7   : > { %2694 = vst.msk [vmem:[%s3325_s24 + $0x10] sm:$0xf] %vm391_vm1, %v2913_v35  ;;  %v685_v41 = vsel %vm394_vm0, %v683_v37, 0.0  ;;  %v723_v42 = vpop.permute.xlu1 %722  ;;  %v1478_v34 = vstv %s3532_s8  ;;  %v797_v35 = vstv %s3534_s10  ;;  %s3653_s8 = sld [smem:[#allocation2 + $0x5f]]  ;;  %s3667_s10 = sld [smem:[#allocation2 + $0x61]] }
  0xf8   : > { %v721_v10 = vpop.permute.xlu0 %720  ;;  %v675_v43 = vrot.slane %v674_v8, 4  ;;  %v687_v44 = vadd.f32 %v686_v1, %v685_v41  ;;  %v727_v45 = vadd.f32 %v723_v42, %v713_v39  ;;  %v868_v39 = vstv %s3540_s17  ;;  %s3680_s17 = sld [smem:[#allocation2 + $0x36]] }
  0xf9   : > { %v726_v46 = vadd.f32 %v721_v10, %v712_v40  ;;  %1403 = vrot.lane.b32.xlu1 %v1398_v31, %s3034_s16  ;;  %v1480_v40 = vmul.f32 %v3524_v3, %v1478_v34  ;;  %v1479_v41 = vmul.f32 %v3528_v5, %v1478_v34  ;;  %v870_v51 = vmul.f32 %v3514_v61, %v868_v39 }
  0xfa   : > { %1401 = vrot.lane.b32.xlu0 %v1397_v16, %s3034_s16  ;;  %v676_v53 = vadd.f32 %v675_v43, %v674_v8  ;;  %v688_v54 = vrot.slane %v687_v44, 4  ;;  %v733_v55 = vadd.f32 %v731_v18, %v727_v45  ;;  %v1466_v16 = vmul.f32 %v3524_v3, %v1464_v24 }
  0xfb   : > { %v732_v56 = vadd.f32 %v730_v38, %v726_v46  ;;  %v743_v57 = vpop.permute.xlu1 %742  ;;  %v1465_v18 = vmul.f32 %v3528_v5, %v1464_v24  ;;  %v836_v38 = vstv %s3536_s11  ;;  %v1535_v8 = vstv %s3538_s14  ;;  %s3676_s11 = sld [smem:[#allocation2 + $0x62]]  ;;  %s3678_s14 = sld [smem:[#allocation4 + $0x5]] }
  0xfc   : > { %v741_v58 = vpop.permute.xlu0 %740  ;;  %v677_v59 = vrot.slane %v676_v53, 2  ;;  %v689_v60 = vadd.f32 %v688_v54, %v687_v44  ;;  %v747_v12 = vadd.f32 %v743_v57, %v733_v55  ;;  %v838_v43 = vmul.f32 %v3502_v47, %v836_v38 }
  0xfd   : > { %1417 = vrot.lane.b32.xlu1 %v1412_v48, %s3033_s15  ;;  %v746_v13 = vadd.f32 %v741_v58, %v732_v56  ;;  %v837_v44 = vmul.f32 %v3506_v49, %v836_v38  ;;  %v1537_v48 = vmul.f32 %v3502_v47, %v1535_v8  ;;  %v869_v58 = vmul.f32 %v3520_v63, %v868_v39 }
  0xfe   : > { %1415 = vrot.lane.b32.xlu0 %v1411_v50, %s3033_s15  ;;  %v678_v9 = vadd.f32 %v677_v59, %v676_v53  ;;  %v690_v11 = vrot.slane %v689_v60, 2  ;;  %v1536_v50 = vmul.f32 %v3506_v49, %v1535_v8  ;;  %v1549_v59 = vstv %s3553_s20  ;;  %s3682_s20 = sld [smem:[#allocation2 + $0x64]] }
  0xff   : > { %v757_v14 = vpop.permute.xlu1 %756 }
 0x100   : > { %v755_v15 = vpop.permute.xlu0 %754  ;;  %v679_v17 = vrot.slane %v678_v9, 1  ;;  %v691_v19 = vadd.f32 %v690_v11, %v689_v60  ;;  %v761_v20 = vadd.f32 %v757_v14, %v747_v12 }
 0x101   : > { %v760_v21 = vadd.f32 %v755_v15, %v746_v13  ;;  %1437 = vrot.lane.b32.xlu1 %v1432_v62, %s3034_s16  ;;  %v1551_v15 = vmul.f32 %v3502_v47, %v1549_v59 }
 0x102   : > { %1435 = vrot.lane.b32.xlu0 %v1431_v0, %s3034_s16  ;;  %v680_v25 = vadd.f32 %v679_v17, %v678_v9  ;;  %v692_v26 = vrot.slane %v691_v19, 1  ;;  %v767_v27 = vadd.f32 %v765_v4, %v761_v20  ;;  %v1550_v17 = vmul.f32 %v3506_v49, %v1549_v59 }
 0x103   : > { %v766_v28 = vadd.f32 %v764_v6, %v760_v21  ;;  %v777_v29 = vpop.permute.xlu1 %776  ;;  %v902_v20 = vstv %s3568_s22  ;;  %s3697_s22 = sld [smem:[#allocation2 + $0x65]] }
 0x104   : > { %v775_v30 = vpop.permute.xlu0 %774  ;;  %2696 = vst.msk [vmem:[%s3373_s9 + $0x2] sm:$0x1] %vm404_vm2, %v680_v25  ;;  %v693_v31 = vadd.f32 %v692_v26, %v691_v19  ;;  %v781_v32 = vadd.f32 %v777_v29, %v767_v27  ;;  %v1569_v19 = vstv %s3566_s21  ;;  %s3684_s21 = sld [smem:[#allocation2 + $0x39]] }
 0x105   : > { %1451 = vrot.lane.b32.xlu1 %v1446_v22, %s3033_s15  ;;  %v780_v33 = vadd.f32 %v775_v30, %v766_v28  ;;  %v1571_v29 = vmul.f32 %v3514_v61, %v1569_v19  ;;  %v1570_v30 = vmul.f32 %v3520_v63, %v1569_v19 }
 0x106   : > { %1449 = vrot.lane.b32.xlu0 %v1445_v23, %s3033_s15  ;;  %2697 = vst.msk [vmem:[%s3383_s12 + $0x2] sm:$0x1] %vm404_vm2, %v693_v31  ;;  %v904_v31 = vmul.f32 %v3524_v3, %v902_v20 }
 0x107   : > { %v791_v36 = vpop.permute.xlu1 %790 }
 0x108   : > { %v789_v37 = vpop.permute.xlu0 %788  ;;  %v795_v2 = vadd.f32 %v791_v36, %v781_v32 }
 0x109   : > { %v794_v1 = vadd.f32 %v789_v37, %v780_v33  ;;  %1471 = vrot.lane.b32.xlu1 %v1466_v16, %s3034_s16  ;;  %v903_v16 = vmul.f32 %v3528_v5, %v902_v20 }
 0x10a   : > { %1469 = vrot.lane.b32.xlu0 %v1465_v18, %s3034_s16  ;;  %v799_v42 = vadd.f32 %v797_v35, %v795_v2  ;;  %v1583_v18 = vstv %s3581_s23  ;;  %s3710_s23 = sld [smem:[#allocation2 + $0x67]] }
 0x10b   : > { %v798_v10 = vadd.f32 %v797_v35, %v794_v1  ;;  %v848_v45 = vpop.permute.xlu1 %847  ;;  %v1585_v39 = vmul.f32 %v3514_v61, %v1583_v18 }
 0x10c   : > { %v846_v46 = vpop.permute.xlu0 %845  ;;  %v2916_v52 = vpack.c.bf16 %v799_v42, %v799_v42  ;;  %v812_v53 = vsel %vm394_vm0, %v799_v42, 0.0  ;;  %v823_v54 = vmul.f32 %v799_v42, %v799_v42  ;;  %v852_v0 = vadd.f32 %v848_v45, %v838_v43 }
 0x10d   : > { %v2915_v55 = vpack.c.bf16 %v798_v10, %v798_v10  ;;  %v811_v56 = vsel %vm394_vm0, %v798_v10, 0.0  ;;  %v822_v57 = vmul.f32 %v798_v10, %v798_v10  ;;  %1485 = vrot.lane.b32.xlu1 %v1480_v40, %s3033_s15  ;;  %v851_v4 = vadd.f32 %v846_v46, %v837_v44 }
 0x10e   : > { %1483 = vrot.lane.b32.xlu0 %v1479_v41, %s3033_s15  ;;  %2711 = vst.msk [vmem:[%s3325_s24 + $0x1c] sm:$0xf] %vm391_vm1, %v2916_v52  ;;  %v825_v60 = vsel %vm394_vm0, %v823_v54, 0.0  ;;  %v813_v62 = vadd.f32 %v812_v53, %v811_v56  ;;  %v1584_v40 = vmul.f32 %v3520_v63, %v1583_v18  ;;  %v1603_v41 = vstv %s3595_s25  ;;  %s3712_s25 = sld [smem:[#allocation2 + $0x3c]] }
 0x10f   : > { %2710 = vst.msk [vmem:[%s3325_s24 + $0x18] sm:$0xf] %vm391_vm1, %v2915_v55  ;;  %v824_v6 = vsel %vm394_vm0, %v822_v57, 0.0  ;;  %v862_v7 = vpop.permute.xlu1 %861  ;;  %v1617_v54 = vstv %s3604_s26  ;;  %v936_v55 = vstv %s3606_s27  ;;  %s3725_s26 = sld [smem:[#allocation2 + $0x68]]  ;;  %s3739_s27 = sld [smem:[#allocation2 + $0x6a]] }
 0x110   : > { %v860_v9 = vpop.permute.xlu0 %859  ;;  %v814_v11 = vrot.slane %v813_v62, 4  ;;  %v826_v12 = vadd.f32 %v825_v60, %v824_v6  ;;  %v866_v13 = vadd.f32 %v862_v7, %v852_v0  ;;  %v1007_v0 = vstv %s3612_s30  ;;  %s3752_s30 = sld [smem:[#allocation2 + $0x3f]] }
 0x111   : > { %v865_v14 = vadd.f32 %v860_v9, %v851_v4  ;;  %1542 = vrot.lane.b32.xlu1 %v1537_v48, %s3034_s16  ;;  %v1619_v4 = vmul.f32 %v3524_v3, %v1617_v54  ;;  %v1618_v6 = vmul.f32 %v3528_v5, %v1617_v54  ;;  %v1009_v19 = vmul.f32 %v3514_v61, %v1007_v0 }
 0x112   : > { %1540 = vrot.lane.b32.xlu0 %v1536_v50, %s3034_s16  ;;  %v815_v21 = vadd.f32 %v814_v11, %v813_v62  ;;  %v827_v22 = vrot.slane %v826_v12, 4  ;;  %v872_v23 = vadd.f32 %v870_v51, %v866_v13  ;;  %v1605_v50 = vmul.f32 %v3524_v3, %v1603_v41 }
 0x113   : > { %v871_v24 = vadd.f32 %v869_v58, %v865_v14  ;;  %v882_v25 = vpop.permute.xlu1 %881  ;;  %v1604_v51 = vmul.f32 %v3528_v5, %v1603_v41  ;;  %v975_v58 = vstv %s3608_s28  ;;  %v1674_v62 = vstv %s3610_s29  ;;  %s3748_s28 = sld [smem:[#allocation2 + $0x6b]]  ;;  %s3750_s29 = sld [smem:[#allocation4 + $0x6]] }
 0x114   : > { %v880_v26 = vpop.permute.xlu0 %879  ;;  %v816_v27 = vrot.slane %v815_v21, 2  ;;  %v828_v28 = vadd.f32 %v827_v22, %v826_v12  ;;  %v886_v34 = vadd.f32 %v882_v25, %v872_v23  ;;  %v977_v11 = vmul.f32 %v3502_v47, %v975_v58 }
 0x115   : > { %1556 = vrot.lane.b32.xlu1 %v1551_v15, %s3033_s15  ;;  %v885_v35 = vadd.f32 %v880_v26, %v871_v24  ;;  %v976_v12 = vmul.f32 %v3506_v49, %v975_v58  ;;  %v1676_v15 = vmul.f32 %v3502_v47, %v1674_v62  ;;  %v1008_v26 = vmul.f32 %v3520_v63, %v1007_v0 }
 0x116   : > { %1554 = vrot.lane.b32.xlu0 %v1550_v17, %s3033_s15  ;;  %v817_v32 = vadd.f32 %v816_v27, %v815_v21  ;;  %v829_v33 = vrot.slane %v828_v28, 2  ;;  %v1675_v17 = vmul.f32 %v3506_v49, %v1674_v62  ;;  %v1688_v27 = vstv %s3625_s6  ;;  %s3754_s6 = sld [smem:[#allocation2 + $0x6d]] }
 0x117   : > { %v896_v36 = vpop.permute.xlu1 %895 }
 0x118   : > { %v894_v37 = vpop.permute.xlu0 %893  ;;  %v818_v38 = vrot.slane %v817_v32, 1  ;;  %v830_v2 = vadd.f32 %v829_v33, %v828_v28  ;;  %v900_v1 = vadd.f32 %v896_v36, %v886_v34 }
 0x119   : > { %v899_v8 = vadd.f32 %v894_v37, %v885_v35  ;;  %1576 = vrot.lane.b32.xlu1 %v1571_v29, %s3034_s16  ;;  %v1690_v37 = vmul.f32 %v3502_v47, %v1688_v27 }
 0x11a   : > { %1574 = vrot.lane.b32.xlu0 %v1570_v30, %s3034_s16  ;;  %v819_v42 = vadd.f32 %v818_v38, %v817_v32  ;;  %v831_v10 = vrot.slane %v830_v2, 1  ;;  %v906_v43 = vadd.f32 %v904_v31, %v900_v1  ;;  %v1689_v38 = vmul.f32 %v3506_v49, %v1688_v27 }
 0x11b   : > { %v905_v44 = vadd.f32 %v903_v16, %v899_v8  ;;  %v916_v45 = vpop.permute.xlu1 %915  ;;  %v1041_v1 = vstv %s3640_s7  ;;  %s3769_s7 = sld [smem:[#allocation2 + $0x76]] }
 0x11c   : > { %v914_v46 = vpop.permute.xlu0 %913  ;;  %2712 = vst.msk [vmem:[%s3373_s9 + $0x3] sm:$0x1] %vm404_vm2, %v819_v42  ;;  %v832_v48 = vadd.f32 %v831_v10, %v830_v2  ;;  %v920_v52 = vadd.f32 %v916_v45, %v906_v43  ;;  %v1708_v2 = vstv %s3638_s19  ;;  %s3756_s19 = sld [smem:[#allocation2 + $0x42]] }
 0x11d   : > { %1590 = vrot.lane.b32.xlu1 %v1585_v39, %s3033_s15  ;;  %v919_v53 = vadd.f32 %v914_v46, %v905_v44  ;;  %v1710_v45 = vmul.f32 %v3514_v61, %v1708_v2  ;;  %v1709_v46 = vmul.f32 %v3520_v63, %v1708_v2 }
 0x11e   : > { %1588 = vrot.lane.b32.xlu0 %v1584_v40, %s3033_s15  ;;  %2713 = vst.msk [vmem:[%s3383_s12 + $0x3] sm:$0x1] %vm404_vm2, %v832_v48  ;;  %v1043_v48 = vmul.f32 %v3524_v3, %v1041_v1 }
 0x11f   : > { %v930_v56 = vpop.permute.xlu1 %929 }
 0x120   : > { %v928_v57 = vpop.permute.xlu0 %927  ;;  %v934_v59 = vadd.f32 %v930_v56, %v920_v52 }
 0x121   : > { %v933_v60 = vadd.f32 %v928_v57, %v919_v53  ;;  %1610 = vrot.lane.b32.xlu1 %v1605_v50, %s3034_s16  ;;  %v1042_v50 = vmul.f32 %v3528_v5, %v1041_v1 }
 0x122   : > { %1608 = vrot.lane.b32.xlu0 %v1604_v51, %s3034_s16  ;;  %v938_v7 = vadd.f32 %v936_v55, %v934_v59  ;;  %v1722_v51 = vstv %s3653_s8  ;;  %s3782_s8 = sld [smem:[#allocation2 + $0x7f]] }
 0x123   : > { %v937_v9 = vadd.f32 %v936_v55, %v933_v60  ;;  %v987_v13 = vpop.permute.xlu1 %986  ;;  %v1724_v0 = vmul.f32 %v3514_v61, %v1722_v51 }
 0x124   : > { %v985_v14 = vpop.permute.xlu0 %984  ;;  %v2918_v20 = vpack.c.bf16 %v938_v7, %v938_v7  ;;  %v951_v21 = vsel %vm394_vm0, %v938_v7, 0.0  ;;  %v962_v22 = vmul.f32 %v938_v7, %v938_v7  ;;  %v991_v30 = vadd.f32 %v987_v13, %v977_v11 }
 0x125   : > { %v2917_v23 = vpack.c.bf16 %v937_v9, %v937_v9  ;;  %v950_v24 = vsel %vm394_vm0, %v937_v9, 0.0  ;;  %v961_v25 = vmul.f32 %v937_v9, %v937_v9  ;;  %1624 = vrot.lane.b32.xlu1 %v1619_v4, %s3033_s15  ;;  %v990_v31 = vadd.f32 %v985_v14, %v976_v12 }
 0x126   : > { %1622 = vrot.lane.b32.xlu0 %v1618_v6, %s3033_s15  ;;  %2727 = vst.msk [vmem:[%s3325_s24 + $0x24] sm:$0xf] %vm391_vm1, %v2918_v20  ;;  %v964_v28 = vsel %vm394_vm0, %v962_v22, 0.0  ;;  %v952_v29 = vadd.f32 %v951_v21, %v950_v24  ;;  %v1723_v4 = vmul.f32 %v3520_v63, %v1722_v51  ;;  %v1742_v6 = vstv %s3667_s10  ;;  %s3784_s10 = sld [smem:[#allocation2 + $0x45]] }
 0x127   : > { %2726 = vst.msk [vmem:[%s3325_s24 + $0x20] sm:$0xf] %vm391_vm1, %v2917_v23  ;;  %v963_v16 = vsel %vm394_vm0, %v961_v25, 0.0  ;;  %v1001_v18 = vpop.permute.xlu1 %1000  ;;  %v1756_v22 = vstv %s3676_s11  ;;  %v1075_v23 = vstv %s3678_s14  ;;  %s3797_s11 = sld [smem:[#allocation2 + $0x88]]  ;;  %s3811_s14 = sld [smem:[#allocation2 + $0x6e]] }
 0x128   : > { %v999_v32 = vpop.permute.xlu0 %998  ;;  %v953_v33 = vrot.slane %v952_v29, 4  ;;  %v965_v34 = vadd.f32 %v964_v28, %v963_v16  ;;  %v1005_v35 = vadd.f32 %v1001_v18, %v991_v30  ;;  %v1146_v30 = vstv %s3684_s21  ;;  %s3824_s21 = sld [smem:[#allocation2 + $0x48]] }
 0x129   : > { %v1004_v36 = vadd.f32 %v999_v32, %v990_v31  ;;  %1681 = vrot.lane.b32.xlu1 %v1676_v15, %s3034_s16  ;;  %v1758_v31 = vmul.f32 %v3524_v3, %v1756_v22  ;;  %v1757_v16 = vmul.f32 %v3528_v5, %v1756_v22  ;;  %v1148_v2 = vmul.f32 %v3514_v61, %v1146_v30 }
 0x12a   : > { %1679 = vrot.lane.b32.xlu0 %v1675_v17, %s3034_s16  ;;  %v954_v8 = vadd.f32 %v953_v33, %v952_v29  ;;  %v966_v39 = vrot.slane %v965_v34, 4  ;;  %v1011_v40 = vadd.f32 %v1009_v19, %v1005_v35  ;;  %v1744_v17 = vmul.f32 %v3524_v3, %v1742_v6 }
 0x12b   : > { %v1010_v41 = vadd.f32 %v1008_v26, %v1004_v36  ;;  %v1021_v42 = vpop.permute.xlu1 %1020  ;;  %v1743_v19 = vmul.f32 %v3528_v5, %v1742_v6  ;;  %v1114_v26 = vstv %s3680_s17  ;;  %v1813_v29 = vstv %s3682_s20  ;;  %s3820_s17 = sld [smem:[#allocation2 + $0x77]] }
 0x12c   : > { %v1019_v10 = vpop.permute.xlu0 %1018  ;;  %v955_v43 = vrot.slane %v954_v8, 2  ;;  %v967_v44 = vadd.f32 %v966_v39, %v965_v34  ;;  %v1025_v54 = vadd.f32 %v1021_v42, %v1011_v40  ;;  %v1116_v33 = vmul.f32 %v3502_v47, %v1114_v26  ;;  %s3822_s20 = sld [smem:[#allocation4 + $0x7]] }
 0x12d   : > { %1695 = vrot.lane.b32.xlu1 %v1690_v37, %s3033_s15  ;;  %v1024_v55 = vadd.f32 %v1019_v10, %v1010_v41  ;;  %v1115_v34 = vmul.f32 %v3506_v49, %v1114_v26  ;;  %v1815_v37 = vmul.f32 %v3502_v47, %v1813_v29  ;;  %v1147_v10 = vmul.f32 %v3520_v63, %v1146_v30 }
 0x12e   : > { %1693 = vrot.lane.b32.xlu0 %v1689_v38, %s3033_s15  ;;  %v956_v52 = vadd.f32 %v955_v43, %v954_v8  ;;  %v968_v53 = vrot.slane %v967_v44, 2  ;;  %v1814_v38 = vmul.f32 %v3506_v49, %v1813_v29  ;;  %v1827_v43 = vstv %s3697_s22  ;;  %s3826_s22 = sld [smem:[#allocation2 + $0x80]] }
 0x12f   : > { %v1035_v56 = vpop.permute.xlu1 %1034 }
 0x130   : > { %v1033_v57 = vpop.permute.xlu0 %1032  ;;  %v957_v58 = vrot.slane %v956_v52, 1  ;;  %v969_v59 = vadd.f32 %v968_v53, %v967_v44  ;;  %v1039_v60 = vadd.f32 %v1035_v56, %v1025_v54 }
 0x131   : > { %v1038_v62 = vadd.f32 %v1033_v57, %v1024_v55  ;;  %1715 = vrot.lane.b32.xlu1 %v1710_v45, %s3034_s16  ;;  %v1829_v57 = vmul.f32 %v3502_v47, %v1827_v43 }
 0x132   : > { %1713 = vrot.lane.b32.xlu0 %v1709_v46, %s3034_s16  ;;  %v958_v7 = vadd.f32 %v957_v58, %v956_v52  ;;  %v970_v9 = vrot.slane %v969_v59, 1  ;;  %v1045_v11 = vadd.f32 %v1043_v48, %v1039_v60  ;;  %v1828_v58 = vmul.f32 %v3506_v49, %v1827_v43 }
 0x133   : > { %v1044_v12 = vadd.f32 %v1042_v50, %v1038_v62  ;;  %v1055_v13 = vpop.permute.xlu1 %1054  ;;  %v1180_v60 = vstv %s3712_s25  ;;  %s3841_s25 = sld [smem:[#allocation2 + $0x89]] }
 0x134   : > { %v1053_v14 = vpop.permute.xlu0 %1052  ;;  %2728 = vst.msk [vmem:[%s3373_s9 + $0x4] sm:$0x1] %vm404_vm2, %v958_v7  ;;  %v971_v15 = vadd.f32 %v970_v9, %v969_v59  ;;  %v1059_v20 = vadd.f32 %v1055_v13, %v1045_v11  ;;  %v1847_v59 = vstv %s3710_s23  ;;  %s3828_s23 = sld [smem:[#allocation2 + $0x4b]] }
 0x135   : > { %1729 = vrot.lane.b32.xlu1 %v1724_v0, %s3033_s15  ;;  %v1058_v21 = vadd.f32 %v1053_v14, %v1044_v12  ;;  %v1849_v13 = vmul.f32 %v3514_v61, %v1847_v59  ;;  %v1848_v14 = vmul.f32 %v3520_v63, %v1847_v59 }
 0x136   : > { %1727 = vrot.lane.b32.xlu0 %v1723_v4, %s3033_s15  ;;  %2729 = vst.msk [vmem:[%s3383_s12 + $0x4] sm:$0x1] %vm404_vm2, %v971_v15  ;;  %v1182_v15 = vmul.f32 %v3524_v3, %v1180_v60 }
 0x137   : > { %v1069_v24 = vpop.permute.xlu1 %1068 }
 0x138   : > { %v1067_v25 = vpop.permute.xlu0 %1066  ;;  %v1073_v27 = vadd.f32 %v1069_v24, %v1059_v20 }
 0x139   : > { %v1072_v28 = vadd.f32 %v1067_v25, %v1058_v21  ;;  %1749 = vrot.lane.b32.xlu1 %v1744_v17, %s3034_s16  ;;  %v1181_v17 = vmul.f32 %v3528_v5, %v1180_v60 }
 0x13a   : > { %1747 = vrot.lane.b32.xlu0 %v1743_v19, %s3034_s16  ;;  %v1077_v18 = vadd.f32 %v1075_v23, %v1073_v27  ;;  %v1861_v19 = vstv %s3725_s26  ;;  %s3854_s26 = sld [smem:[#allocation2 + $0x70]] }
 0x13b   : > { %v1076_v32 = vadd.f32 %v1075_v23, %v1072_v28  ;;  %v1126_v35 = vpop.permute.xlu1 %1125  ;;  %v1863_v30 = vmul.f32 %v3514_v61, %v1861_v19 }
 0x13c   : > { %v1124_v36 = vpop.permute.xlu0 %1123  ;;  %v2920_v1 = vpack.c.bf16 %v1077_v18, %v1077_v18  ;;  %v1090_v8 = vsel %vm394_vm0, %v1077_v18, 0.0  ;;  %v1101_v39 = vmul.f32 %v1077_v18, %v1077_v18  ;;  %v1130_v46 = vadd.f32 %v1126_v35, %v1116_v33 }
 0x13d   : > { %v2919_v40 = vpack.c.bf16 %v1076_v32, %v1076_v32  ;;  %v1089_v41 = vsel %vm394_vm0, %v1076_v32, 0.0  ;;  %v1100_v42 = vmul.f32 %v1076_v32, %v1076_v32  ;;  %1763 = vrot.lane.b32.xlu1 %v1758_v31, %s3033_s15  ;;  %v1129_v48 = vadd.f32 %v1124_v36, %v1115_v34 }
 0x13e   : > { %1761 = vrot.lane.b32.xlu0 %v1757_v16, %s3033_s15  ;;  %2743 = vst.msk [vmem:[%s3325_s24 + $0x2c] sm:$0xf] %vm391_vm1, %v2920_v1  ;;  %v1103_v44 = vsel %vm394_vm0, %v1101_v39, 0.0  ;;  %v1091_v45 = vadd.f32 %v1090_v8, %v1089_v41  ;;  %v1862_v31 = vmul.f32 %v3520_v63, %v1861_v19  ;;  %v1881_v16 = vstv %s3739_s27  ;;  %s3856_s27 = sld [smem:[#allocation2 + $0x4e]] }
 0x13f   : > { %2742 = vst.msk [vmem:[%s3325_s24 + $0x28] sm:$0xf] %vm391_vm1, %v2919_v40  ;;  %v1102_v50 = vsel %vm394_vm0, %v1100_v42, 0.0  ;;  %v1140_v51 = vpop.permute.xlu1 %1139  ;;  %v1895_v39 = vstv %s3748_s28  ;;  %v1214_v40 = vstv %s3750_s29  ;;  %s3869_s28 = sld [smem:[#allocation2 + $0x79]]  ;;  %s3889_s29 = sld [smem:[#allocation2 + $0x82]] }
 0x140   : > { %v1138_v52 = vpop.permute.xlu0 %1137  ;;  %v1092_v53 = vrot.slane %v1091_v45, 4  ;;  %v1104_v54 = vadd.f32 %v1103_v44, %v1102_v50  ;;  %v1144_v55 = vadd.f32 %v1140_v51, %v1130_v46  ;;  %v1285_v46 = vstv %s3756_s19  ;;  %s3914_s19 = sld [smem:[#allocation2 + $0x51]] }
 0x141   : > { %v1143_v56 = vadd.f32 %v1138_v52, %v1129_v48  ;;  %1820 = vrot.lane.b32.xlu1 %v1815_v37, %s3034_s16  ;;  %v1897_v48 = vmul.f32 %v3524_v3, %v1895_v39  ;;  %v1896_v50 = vmul.f32 %v3528_v5, %v1895_v39  ;;  %v1287_v59 = vmul.f32 %v3514_v61, %v1285_v46 }
 0x142   : > { %1818 = vrot.lane.b32.xlu0 %v1814_v38, %s3034_s16  ;;  %v1093_v62 = vadd.f32 %v1092_v53, %v1091_v45  ;;  %v1105_v0 = vrot.slane %v1104_v54, 4  ;;  %v1150_v4 = vadd.f32 %v1148_v2, %v1144_v55  ;;  %v1883_v38 = vmul.f32 %v3524_v3, %v1881_v16 }
 0x143   : > { %v1149_v6 = vadd.f32 %v1147_v10, %v1143_v56  ;;  %v1160_v7 = vpop.permute.xlu1 %1159  ;;  %v1882_v2 = vmul.f32 %v3528_v5, %v1881_v16  ;;  %v1253_v10 = vstv %s3752_s30  ;;  %v1952_v45 = vstv %s3754_s6  ;;  %s3910_s30 = sld [smem:[#allocation2 + $0x8b]]  ;;  %s3912_s6 = sld [smem:[#allocation4 + $0x8]] }
 0x144   : > { %v1158_v9 = vpop.permute.xlu0 %1157  ;;  %v1094_v11 = vrot.slane %v1093_v62, 2  ;;  %v1106_v12 = vadd.f32 %v1105_v0, %v1104_v54  ;;  %v1164_v22 = vadd.f32 %v1160_v7, %v1150_v4  ;;  %v1255_v53 = vmul.f32 %v3502_v47, %v1253_v10 }
 0x145   : > { %1834 = vrot.lane.b32.xlu1 %v1829_v57, %s3033_s15  ;;  %v1163_v23 = vadd.f32 %v1158_v9, %v1149_v6  ;;  %v1254_v54 = vmul.f32 %v3506_v49, %v1253_v10  ;;  %v1954_v57 = vmul.f32 %v3502_v47, %v1952_v45  ;;  %v1286_v9 = vmul.f32 %v3520_v63, %v1285_v46 }
 0x146   : > { %1832 = vrot.lane.b32.xlu0 %v1828_v58, %s3033_s15  ;;  %v1095_v20 = vadd.f32 %v1094_v11, %v1093_v62  ;;  %v1107_v21 = vrot.slane %v1106_v12, 2  ;;  %v1953_v58 = vmul.f32 %v3506_v49, %v1952_v45  ;;  %v2091_v11 = vstv %s3769_s7  ;;  %s3918_s7 = sld [smem:[#allocation2 + $0x54]] }
 0x147   : > { %v1174_v24 = vpop.permute.xlu1 %1173  ;;  %v1966_v46 = vstv %s3811_s14  ;;  %s3959_s14 = sld [smem:[#allocation2 + $0x8c]] }
 0x148   : > { %v1172_v25 = vpop.permute.xlu0 %1171  ;;  %v1096_v26 = vrot.slane %v1095_v20, 1  ;;  %v1108_v27 = vadd.f32 %v1107_v21, %v1106_v12  ;;  %v1178_v28 = vadd.f32 %v1174_v24, %v1164_v22 }
 0x149   : > { %v1177_v29 = vadd.f32 %v1172_v25, %v1163_v23  ;;  %1854 = vrot.lane.b32.xlu1 %v1849_v13, %s3034_s16  ;;  %v2093_v25 = vmul.f32 %v3502_v47, %v2091_v11 }
 0x14a   : > { %1852 = vrot.lane.b32.xlu0 %v1848_v14, %s3034_s16  ;;  %v1097_v18 = vadd.f32 %v1096_v26, %v1095_v20  ;;  %v1109_v32 = vrot.slane %v1108_v27, 1  ;;  %v1184_v33 = vadd.f32 %v1182_v15, %v1178_v28  ;;  %v2092_v26 = vmul.f32 %v3506_v49, %v2091_v11 }
 0x14b   : > { %v1183_v34 = vadd.f32 %v1181_v17, %v1177_v29  ;;  %v1194_v35 = vpop.permute.xlu1 %1193  ;;  %v1319_v28 = vstv %s3784_s10  ;;  %v2244_v11 = vstv %s3826_s22  ;;  %s3944_s10 = sld [smem:[#allocation2 + $0x83]]  ;;  %s3986_s22 = sld [smem:[#allocation2 + $0x5a]] }
 0x14c   : > { %v1192_v36 = vpop.permute.xlu0 %1191  ;;  %2744 = vst.msk [vmem:[%s3373_s9 + $0x5] sm:$0x1] %vm404_vm2, %v1097_v18  ;;  %v1110_v37 = vadd.f32 %v1109_v32, %v1108_v27  ;;  %v1198_v1 = vadd.f32 %v1194_v35, %v1184_v33  ;;  %v2230_v27 = vstv %s3782_s8  ;;  %s3931_s8 = sld [smem:[#allocation2 + $0x7a]] }
 0x14d   : > { %1868 = vrot.lane.b32.xlu1 %v1863_v30, %s3033_s15  ;;  %v1197_v8 = vadd.f32 %v1192_v36, %v1183_v34  ;;  %v2232_v35 = vmul.f32 %v3502_v47, %v2230_v27  ;;  %v2231_v36 = vmul.f32 %v3506_v49, %v2230_v27 }
 0x14e   : > { %1866 = vrot.lane.b32.xlu0 %v1862_v31, %s3033_s15  ;;  %2745 = vst.msk [vmem:[%s3383_s12 + $0x5] sm:$0x1] %vm404_vm2, %v1110_v37  ;;  %v1321_v37 = vmul.f32 %v3524_v3, %v1319_v28 }
 0x14f   : > { %v1208_v41 = vpop.permute.xlu1 %1207 }
 0x150   : > { %v1206_v42 = vpop.permute.xlu0 %1205  ;;  %v1212_v43 = vadd.f32 %v1208_v41, %v1198_v1 }
 0x151   : > { %v1211_v44 = vadd.f32 %v1206_v42, %v1197_v8  ;;  %1888 = vrot.lane.b32.xlu1 %v1883_v38, %s3034_s16  ;;  %v1320_v38 = vmul.f32 %v3528_v5, %v1319_v28 }
 0x152   : > { %1886 = vrot.lane.b32.xlu0 %v1882_v2, %s3034_s16  ;;  %v1216_v51 = vadd.f32 %v1214_v40, %v1212_v43  ;;  %v2369_v2 = vstv %s3797_s11  ;;  %s3946_s11 = sld [smem:[#allocation2 + $0x57]] }
 0x153   : > { %v1215_v52 = vadd.f32 %v1214_v40, %v1211_v44  ;;  %v1265_v55 = vpop.permute.xlu1 %1264  ;;  %v2371_v5 = vmul.f32 %v3502_v47, %v2369_v2  ;;  %v2370_v45 = vmul.f32 %v3506_v49, %v2369_v2  ;;  %v3880_v2 = vld [vmem:[%s3118_s13 + $0x8] sm:$0xff] }
 0x154   : > { %v1263_v56 = vpop.permute.xlu0 %1262  ;;  %v2922_v60 = vpack.c.bf16 %v1216_v51, %v1216_v51  ;;  %v1229_v62 = vsel %vm394_vm0, %v1216_v51, 0.0  ;;  %v1240_v0 = vmul.f32 %v1216_v51, %v1216_v51  ;;  %v1269_v14 = vadd.f32 %v1265_v55, %v1255_v53 }
 0x155   : > { %v2921_v4 = vpack.c.bf16 %v1215_v52, %v1215_v52  ;;  %v1228_v6 = vsel %vm394_vm0, %v1215_v52, 0.0  ;;  %v1239_v7 = vmul.f32 %v1215_v52, %v1215_v52  ;;  %1902 = vrot.lane.b32.xlu1 %v1897_v48, %s3033_s15  ;;  %v1268_v15 = vadd.f32 %v1263_v56, %v1254_v54 }
 0x156   : > { %1900 = vrot.lane.b32.xlu0 %v1896_v50, %s3033_s15  ;;  %2759 = vst.msk [vmem:[%s3325_s24 + $0x34] sm:$0xf] %vm391_vm1, %v2922_v60  ;;  %v1242_v12 = vsel %vm394_vm0, %v1240_v0, 0.0  ;;  %v1230_v13 = vadd.f32 %v1229_v62, %v1228_v6  ;;  %v1968_v56 = vmul.f32 %v3502_v47, %v1966_v46  ;;  %v2105_v60 = vstv %s3820_s17  ;;  %s3973_s17 = sld [smem:[#allocation2 + $0x73]] }
 0x157   : > { %2758 = vst.msk [vmem:[%s3325_s24 + $0x30] sm:$0xf] %vm391_vm1, %v2921_v4  ;;  %v1241_v17 = vsel %vm394_vm0, %v1239_v7, 0.0  ;;  %v1279_v19 = vpop.permute.xlu1 %1278  ;;  %v1353_v62 = vstv %s3822_s20  ;;  %v1392_v6 = vstv %s3824_s21  ;;  %s3982_s20 = sld [smem:[#allocation2 + $0x7c]]  ;;  %s3984_s21 = sld [smem:[#allocation4 + $0x9]] }
 0x158   : > { %v1277_v20 = vpop.permute.xlu0 %1276  ;;  %v1231_v21 = vrot.slane %v1230_v13, 4  ;;  %v1243_v22 = vadd.f32 %v1242_v12, %v1241_v17  ;;  %v1283_v23 = vadd.f32 %v1279_v19, %v1269_v14  ;;  %v1424_v12 = vstv %s3828_s23  ;;  %s3988_s23 = sld [smem:[#allocation2 + $0x85]] }
 0x159   : > { %v1282_v24 = vadd.f32 %v1277_v20, %v1268_v15  ;;  %1959 = vrot.lane.b32.xlu1 %v1954_v57, %s3034_s16  ;;  %v1967_v57 = vmul.f32 %v3506_v49, %v1966_v46  ;;  %v2106_v14 = vmul.f32 %v3506_v49, %v2105_v60  ;;  %v1394_v19 = vmul.f32 %v3502_v47, %v1392_v6 }
 0x15a   : > { %1957 = vrot.lane.b32.xlu0 %v1953_v58, %s3034_s16  ;;  %v1232_v29 = vadd.f32 %v1231_v21, %v1230_v13  ;;  %v1244_v30 = vrot.slane %v1243_v22, 4  ;;  %v1289_v31 = vadd.f32 %v1287_v59, %v1283_v23  ;;  %v2107_v13 = vmul.f32 %v3502_v47, %v2105_v60 }
 0x15b   : > { %v1288_v16 = vadd.f32 %v1286_v9, %v1282_v24  ;;  %v1299_v18 = vpop.permute.xlu1 %1298  ;;  %v1393_v20 = vmul.f32 %v3506_v49, %v1392_v6  ;;  %v2246_v23 = vmul.f32 %v3502_v47, %v2244_v11  ;;  %v2245_v24 = vmul.f32 %v3506_v49, %v2244_v11 }
 0x15c   : > { %v1297_v32 = vpop.permute.xlu0 %1296  ;;  %v1233_v33 = vrot.slane %v1232_v29, 2  ;;  %v1245_v34 = vadd.f32 %v1244_v30, %v1243_v22  ;;  %v1303_v39 = vadd.f32 %v1299_v18, %v1289_v31  ;;  %v2383_v47 = vstv %s3841_s25  ;;  %s3990_s25 = sld [smem:[#allocation2 + $0x5d]] }
 0x15d   : > { %2098 = vrot.lane.b32.xlu1 %v2093_v25, %s3034_s16  ;;  %v1302_v40 = vadd.f32 %v1297_v32, %v1288_v16  ;;  %v1426_v25 = vmul.f32 %v3514_v61, %v1424_v12  ;;  %v1425_v16 = vmul.f32 %v3520_v63, %v1424_v12 }
 0x15e   : > { %2096 = vrot.lane.b32.xlu0 %v2092_v26, %s3034_s16  ;;  %v1234_v1 = vadd.f32 %v1233_v33, %v1232_v29  ;;  %v1246_v8 = vrot.slane %v1245_v34, 2 }
 0x15f   : > { %v1313_v41 = vpop.permute.xlu1 %1312 }
 0x160   : > { %v1311_v42 = vpop.permute.xlu0 %1310  ;;  %v1235_v10 = vrot.slane %v1234_v1, 1  ;;  %v1247_v43 = vadd.f32 %v1246_v8, %v1245_v34  ;;  %v1317_v3 = vadd.f32 %v1313_v41, %v1303_v39  ;;  %v3884_v8 = vld [vmem:[%s3118_s13] sm:$0xff]  ;;  %v1458_v41 = vstv %s3856_s27  ;;  %s4016_s27 = sld [smem:[#allocation2 + $0x74]] }
 0x161   : > { %v1316_v44 = vadd.f32 %v1311_v42, %v1302_v40  ;;  %2237 = vrot.lane.b32.xlu1 %v2232_v35, %s3034_s16  ;;  %v2384_v39 = vmul.f32 %v3884_v8, %v2383_v47  ;;  %v1986_v40 = vstv %s3854_s26  ;;  %s4003_s26 = sld [smem:[#allocation2 + $0x8e]] }
 0x162   : > { %2235 = vrot.lane.b32.xlu0 %v2231_v36, %s3034_s16  ;;  %v1236_v48 = vadd.f32 %v1235_v10, %v1234_v1  ;;  %v1248_v50 = vrot.slane %v1247_v43, 1  ;;  %v1323_v51 = vadd.f32 %v1321_v37, %v1317_v3  ;;  %v2385_v1 = vmul.f32 %v3880_v2, %v2383_v47 }
 0x163   : > { %v1322_v52 = vadd.f32 %v1320_v38, %v1316_v44  ;;  %v1333_v53 = vpop.permute.xlu1 %1332 }
 0x164   : > { %v1331_v54 = vpop.permute.xlu0 %1330  ;;  %2760 = vst.msk [vmem:[%s3373_s9 + $0x6] sm:$0x1] %vm404_vm2, %v1236_v48  ;;  %v1249_v55 = vadd.f32 %v1248_v50, %v1247_v43  ;;  %v1337_v58 = vadd.f32 %v1333_v53, %v1323_v51  ;;  %v3892_v48 = vld [vmem:[%s3118_s13 + $0x9] sm:$0xff]  ;;  %v3898_v51 = vld [vmem:[%s3118_s13 + $0x1] sm:$0xff] }
 0x165   : > { %2376 = vrot.lane.b32.xlu1 %v2371_v5, %s3034_s16  ;;  %v1336_v59 = vadd.f32 %v1331_v54, %v1322_v52  ;;  %v1988_v50 = vmul.f32 %v3892_v48, %v1986_v40  ;;  %v1987_v52 = vmul.f32 %v3898_v51, %v1986_v40  ;;  %v3902_v53 = vld [vmem:[%s3118_s13 + $0xa] sm:$0xff] }
 0x166   : > { %2374 = vrot.lane.b32.xlu0 %v2370_v45, %s3034_s16  ;;  %2761 = vst.msk [vmem:[%s3383_s12 + $0x6] sm:$0x1] %vm404_vm2, %v1249_v55  ;;  %v1460_v54 = vmul.f32 %v3902_v53, %v1458_v41  ;;  %v3906_v55 = vld [vmem:[%s3118_s13 + $0x2] sm:$0xff]  ;;  %s3916_s13 = sld [smem:[#allocation2 + $0x71]] }
 0x167   : > { %v1347_v0 = vpop.permute.xlu1 %1346 }
 0x168   : > { %v1345_v4 = vpop.permute.xlu0 %1344  ;;  %v1351_v7 = vadd.f32 %v1347_v0, %v1337_v58 }
 0x169   : > { %v1350_v9 = vadd.f32 %v1345_v4, %v1336_v59  ;;  %1973 = vrot.lane.b32.xlu1 %v1968_v56, %s3033_s15  ;;  %v1459_v56 = vmul.f32 %v3906_v55, %v1458_v41 }
 0x16a   : > { %1971 = vrot.lane.b32.xlu0 %v1967_v57, %s3033_s15  ;;  %v1355_v15 = vadd.f32 %v1353_v62, %v1351_v7  ;;  %v2125_v57 = vstv %s3869_s28  ;;  %s4018_s28 = sld [smem:[#allocation2 + $0x60]] }
 0x16b   : > { %v1354_v17 = vadd.f32 %v1353_v62, %v1350_v9  ;;  %v1404_v21 = vpop.permute.xlu1 %1403  ;;  %v2127_v12 = vmul.f32 %v3892_v48, %v2125_v57 }
 0x16c   : > { %v1402_v22 = vpop.permute.xlu0 %1401  ;;  %v2924_v26 = vpack.c.bf16 %v1355_v15, %v1355_v15  ;;  %v1368_v27 = vsel %vm394_vm0, %v1355_v15, 0.0  ;;  %v1379_v28 = vmul.f32 %v1355_v15, %v1355_v15  ;;  %v1408_v18 = vadd.f32 %v1404_v21, %v1394_v19 }
 0x16d   : > { %v2923_v29 = vpack.c.bf16 %v1354_v17, %v1354_v17  ;;  %v1367_v30 = vsel %vm394_vm0, %v1354_v17, 0.0  ;;  %v1378_v31 = vmul.f32 %v1354_v17, %v1354_v17  ;;  %2112 = vrot.lane.b32.xlu1 %v2107_v13, %s3033_s15  ;;  %v1407_v32 = vadd.f32 %v1402_v22, %v1393_v20 }
 0x16e   : > { %2110 = vrot.lane.b32.xlu0 %v2106_v14, %s3033_s15  ;;  %2775 = vst.msk [vmem:[%s3325_s24 + $0x3c] sm:$0xf] %vm391_vm1, %v2924_v26  ;;  %v1381_v49 = vsel %vm394_vm0, %v1379_v28, 0.0  ;;  %v1369_v61 = vadd.f32 %v1368_v27, %v1367_v30  ;;  %v2126_v13 = vmul.f32 %v3898_v51, %v2125_v57  ;;  %v2264_v14 = vstv %s3889_s29  ;;  %s4031_s29 = sld [smem:[#allocation2 + $0x7d]] }
 0x16f   : > { %2774 = vst.msk [vmem:[%s3325_s24 + $0x38] sm:$0xf] %vm391_vm1, %v2923_v29  ;;  %v1380_v33 = vsel %vm394_vm0, %v1378_v31, 0.0  ;;  %v1418_v34 = vpop.permute.xlu1 %1417  ;;  %v2403_v28 = vstv %s3910_s30  ;;  %v1492_v29 = vstv %s3912_s6  ;;  %s4045_s30 = sld [smem:[#allocation2 + $0x86]]  ;;  %s4054_s6 = sld [smem:[#allocation2 + $0x63]] }
 0x170   : > { %v1416_v63 = vpop.permute.xlu0 %1415  ;;  %v1370_v35 = vrot.slane %v1369_v61, 4  ;;  %v1382_v36 = vadd.f32 %v1381_v49, %v1380_v33  ;;  %v1422_v37 = vadd.f32 %v1418_v34, %v1408_v18  ;;  %v1563_v18 = vstv %s3918_s7  ;;  %s4083_s7 = sld [smem:[#allocation2 + $0x69]] }
 0x171   : > { %v1421_v38 = vadd.f32 %v1416_v63, %v1407_v32  ;;  %2251 = vrot.lane.b32.xlu1 %v2246_v23, %s3033_s15  ;;  %v2405_v32 = vmul.f32 %v3892_v48, %v2403_v28  ;;  %v2404_v33 = vmul.f32 %v3898_v51, %v2403_v28  ;;  %v1565_v40 = vmul.f32 %v3892_v48, %v1563_v18 }
 0x172   : > { %2249 = vrot.lane.b32.xlu0 %v2245_v24, %s3033_s15  ;;  %v1371_v42 = vadd.f32 %v1370_v35, %v1369_v61  ;;  %v1383_v10 = vrot.slane %v1382_v36, 4  ;;  %v1428_v43 = vadd.f32 %v1426_v25, %v1422_v37  ;;  %v2266_v24 = vmul.f32 %v3892_v48, %v2264_v14 }
 0x173   : > { %v1427_v3 = vadd.f32 %v1425_v16, %v1421_v38  ;;  %v1438_v44 = vpop.permute.xlu1 %1437  ;;  %v2265_v25 = vmul.f32 %v3898_v51, %v2264_v14  ;;  %v1531_v16 = vstv %s3914_s19  ;;  %v2000_v61 = vstv %s3916_s13  ;;  %s4056_s19 = sld [smem:[#allocation2 + $0x8f]]  ;;  %s4058_s13 = sld [smem:[#allocation4 + $0xa]] }
 0x174   : > { %v1436_v5 = vpop.permute.xlu0 %1435  ;;  %v1372_v45 = vrot.slane %v1371_v42, 2  ;;  %v1384_v46 = vadd.f32 %v1383_v10, %v1382_v36  ;;  %v1442_v60 = vadd.f32 %v1438_v44, %v1428_v43  ;;  %v1533_v35 = vmul.f32 %v3880_v2, %v1531_v16 }
 0x175   : > { %2390 = vrot.lane.b32.xlu1 %v2385_v1, %s3033_s15  ;;  %v1441_v62 = vadd.f32 %v1436_v5, %v1427_v3  ;;  %v1532_v36 = vmul.f32 %v3884_v8, %v1531_v16  ;;  %v2002_v1 = vmul.f32 %v3892_v48, %v2000_v61  ;;  %v1564_v5 = vmul.f32 %v3898_v51, %v1563_v18 }
 0x176   : > { %2388 = vrot.lane.b32.xlu0 %v2384_v39, %s3033_s15  ;;  %v1373_v58 = vadd.f32 %v1372_v45, %v1371_v42  ;;  %v1385_v59 = vrot.slane %v1384_v46, 2  ;;  %v2001_v39 = vmul.f32 %v3898_v51, %v2000_v61  ;;  %v2139_v45 = vstv %s3931_s8  ;;  %s2842_s8 = sld [smem:[#allocation2 + $0x6c]] }
 0x177   : > { %v1452_v0 = vpop.permute.xlu1 %1451 }
 0x178   : > { %v1450_v4 = vpop.permute.xlu0 %1449  ;;  %v1374_v6 = vrot.slane %v1373_v58, 1  ;;  %v1386_v7 = vadd.f32 %v1385_v59, %v1384_v46  ;;  %v1456_v9 = vadd.f32 %v1452_v0, %v1442_v60 }
 0x179   : > { %v1455_v11 = vadd.f32 %v1450_v4, %v1441_v62  ;;  %1993 = vrot.lane.b32.xlu1 %v1988_v50, %s3034_s16  ;;  %v2141_v4 = vmul.f32 %v3892_v48, %v2139_v45 }
 0x17a   : > { %1991 = vrot.lane.b32.xlu0 %v1987_v52, %s3034_s16  ;;  %v1375_v15 = vadd.f32 %v1374_v6, %v1373_v58  ;;  %v1387_v17 = vrot.slane %v1386_v7, 1  ;;  %v1462_v19 = vadd.f32 %v1460_v54, %v1456_v9  ;;  %v2140_v6 = vmul.f32 %v3898_v51, %v2139_v45 }
 0x17b   : > { %v1461_v20 = vadd.f32 %v1459_v56, %v1455_v11  ;;  %v1472_v21 = vpop.permute.xlu1 %1471  ;;  %v1597_v9 = vstv %s3946_s11  ;;  %s2874_s11 = sld [smem:[#allocation2 + $0x7e]] }
 0x17c   : > { %v1470_v22 = vpop.permute.xlu0 %1469  ;;  %2776 = vst.msk [vmem:[%s3373_s9 + $0x7] sm:$0x1] %vm404_vm2, %v1375_v15  ;;  %v1388_v23 = vadd.f32 %v1387_v17, %v1386_v7  ;;  %v1476_v26 = vadd.f32 %v1472_v21, %v1462_v19  ;;  %v2278_v7 = vstv %s3944_s10  ;;  %s2858_s10 = sld [smem:[#allocation2 + $0x75]] }
 0x17d   : > { %2132 = vrot.lane.b32.xlu1 %v2127_v12, %s3034_s16  ;;  %v1475_v27 = vadd.f32 %v1470_v22, %v1461_v20  ;;  %v2280_v21 = vmul.f32 %v3892_v48, %v2278_v7  ;;  %v2279_v22 = vmul.f32 %v3898_v51, %v2278_v7 }
 0x17e   : > { %2130 = vrot.lane.b32.xlu0 %v2126_v13, %s3034_s16  ;;  %2777 = vst.msk [vmem:[%s3383_s12 + $0x7] sm:$0x1] %vm404_vm2, %v1388_v23  ;;  %v1599_v23 = vmul.f32 %v3902_v53, %v1597_v9 }
 0x17f   : > { %v1486_v30 = vpop.permute.xlu1 %1485 }
 0x180   : > { %v1484_v31 = vpop.permute.xlu0 %1483  ;;  %v1490_v47 = vadd.f32 %v1486_v30, %v1476_v26 }
 0x181   : > { %v1489_v49 = vadd.f32 %v1484_v31, %v1475_v27  ;;  %2271 = vrot.lane.b32.xlu1 %v2266_v24, %s3034_s16  ;;  %v1598_v24 = vmul.f32 %v3906_v55, %v1597_v9 }
 0x182   : > { %2269 = vrot.lane.b32.xlu0 %v2265_v25, %s3034_s16  ;;  %v1494_v34 = vadd.f32 %v1492_v29, %v1490_v47  ;;  %v2417_v25 = vstv %s3959_s14  ;;  %s4170_s14 = sld [smem:[#allocation2 + $0x87]] }
 0x183   : > { %v1493_v63 = vadd.f32 %v1492_v29, %v1489_v49  ;;  %v1543_v37 = vpop.permute.xlu1 %1542  ;;  %v2419_v18 = vmul.f32 %v3892_v48, %v2417_v25 }
 0x184   : > { %v1541_v38 = vpop.permute.xlu0 %1540  ;;  %v2926_v41 = vpack.c.bf16 %v1494_v34, %v1494_v34  ;;  %v1507_v42 = vsel %vm394_vm0, %v1494_v34, 0.0  ;;  %v1518_v10 = vmul.f32 %v1494_v34, %v1494_v34  ;;  %v1547_v52 = vadd.f32 %v1543_v37, %v1533_v35 }
 0x185   : > { %v2925_v43 = vpack.c.bf16 %v1493_v63, %v1493_v63  ;;  %v1506_v3 = vsel %vm394_vm0, %v1493_v63, 0.0  ;;  %v1517_v44 = vmul.f32 %v1493_v63, %v1493_v63  ;;  %2410 = vrot.lane.b32.xlu1 %v2405_v32, %s3034_s16  ;;  %v1546_v54 = vadd.f32 %v1541_v38, %v1532_v36 }
 0x186   : > { %2408 = vrot.lane.b32.xlu0 %v2404_v33, %s3034_s16  ;;  %2791 = vst.msk [vmem:[%s3325_s24 + $0x44] sm:$0xf] %vm391_vm1, %v2926_v41  ;;  %v1520_v46 = vsel %vm394_vm0, %v1518_v10, 0.0  ;;  %v1508_v50 = vadd.f32 %v1507_v42, %v1506_v3  ;;  %v2418_v32 = vmul.f32 %v3898_v51, %v2417_v25  ;;  %v2020_v33 = vstv %s3973_s17  ;;  %s4172_s17 = sld [smem:[#allocation2 + $0x6f]] }
 0x187   : > { %2790 = vst.msk [vmem:[%s3325_s24 + $0x40] sm:$0xf] %vm391_vm1, %v2925_v43  ;;  %v1519_v56 = vsel %vm394_vm0, %v1517_v44, 0.0  ;;  %v1557_v57 = vpop.permute.xlu1 %1556  ;;  %v2159_v10 = vstv %s3982_s20  ;;  %v1631_v43 = vstv %s3984_s21  ;;  %s4174_s20 = sld [smem:[#allocation2 + $0x78]]  ;;  %s4176_s21 = sld [smem:[#allocation2 + $0x81]] }
 0x188   : > { %v1555_v58 = vpop.permute.xlu0 %1554  ;;  %v1509_v59 = vrot.slane %v1508_v50, 4  ;;  %v1521_v60 = vadd.f32 %v1520_v46, %v1519_v56  ;;  %v1561_v62 = vadd.f32 %v1557_v57, %v1547_v52  ;;  %v1702_v52 = vstv %s3990_s25  ;;  %s4192_s25 = sld [smem:[#allocation2 + $0x7b]] }
 0x189   : > { %v1560_v0 = vadd.f32 %v1555_v58, %v1546_v54  ;;  %2007 = vrot.lane.b32.xlu1 %v2002_v1, %s3033_s15  ;;  %v2161_v54 = vmul.f32 %v3902_v53, %v2159_v10  ;;  %v2160_v56 = vmul.f32 %v3906_v55, %v2159_v10  ;;  %v1704_v7 = vmul.f32 %v3892_v48, %v1702_v52 }
 0x18a   : > { %2005 = vrot.lane.b32.xlu0 %v2001_v39, %s3033_s15  ;;  %v1510_v11 = vadd.f32 %v1509_v59, %v1508_v50  ;;  %v1522_v12 = vrot.slane %v1521_v60, 4  ;;  %v1567_v13 = vadd.f32 %v1565_v40, %v1561_v62  ;;  %v2022_v39 = vmul.f32 %v3902_v53, %v2020_v33 }
 0x18b   : > { %v1566_v14 = vadd.f32 %v1564_v5, %v1560_v0  ;;  %v1577_v15 = vpop.permute.xlu1 %1576  ;;  %v2021_v40 = vmul.f32 %v3906_v55, %v2020_v33  ;;  %v1670_v5 = vstv %s3986_s22  ;;  %v2298_v50 = vstv %s3988_s23  ;;  %s4178_s22 = sld [smem:[#allocation2 + $0x8a]] }
 0x18c   : > { %v1575_v17 = vpop.permute.xlu0 %1574  ;;  %v1511_v19 = vrot.slane %v1510_v11, 2  ;;  %v1523_v20 = vadd.f32 %v1522_v12, %v1521_v60  ;;  %v1581_v28 = vadd.f32 %v1577_v15, %v1567_v13  ;;  %v1672_v59 = vmul.f32 %v3880_v2, %v1670_v5  ;;  %s4186_s23 = sld [smem:[#allocation2 + $0x72]] }
 0x18d   : > { %2146 = vrot.lane.b32.xlu1 %v2141_v4, %s3033_s15  ;;  %v1580_v29 = vadd.f32 %v1575_v17, %v1566_v14  ;;  %v1671_v60 = vmul.f32 %v3884_v8, %v1670_v5  ;;  %v2300_v4 = vmul.f32 %v3902_v53, %v2298_v50  ;;  %v1703_v17 = vmul.f32 %v3898_v51, %v1702_v52 }
 0x18e   : > { %2144 = vrot.lane.b32.xlu0 %v2140_v6, %s3033_s15  ;;  %v1512_v26 = vadd.f32 %v1511_v19, %v1510_v11  ;;  %v1524_v27 = vrot.slane %v1523_v20, 2  ;;  %v2299_v6 = vmul.f32 %v3906_v55, %v2298_v50  ;;  %v2437_v19 = vstv %s4003_s26  ;;  %s4194_s26 = sld [smem:[#allocation2 + $0x84]] }
 0x18f   : > { %v1591_v30 = vpop.permute.xlu1 %1590 }
 0x190   : > { %v1589_v31 = vpop.permute.xlu0 %1588  ;;  %v1513_v16 = vrot.slane %v1512_v26, 1  ;;  %v1525_v47 = vadd.f32 %v1524_v27, %v1523_v20  ;;  %v1595_v49 = vadd.f32 %v1591_v30, %v1581_v28 }
 0x191   : > { %v1594_v61 = vadd.f32 %v1589_v31, %v1580_v29  ;;  %2285 = vrot.lane.b32.xlu1 %v2280_v21, %s3033_s15  ;;  %v2439_v31 = vmul.f32 %v3902_v53, %v2437_v19 }
 0x192   : > { %2283 = vrot.lane.b32.xlu0 %v2279_v22, %s3033_s15  ;;  %v1514_v34 = vadd.f32 %v1513_v16, %v1512_v26  ;;  %v1526_v63 = vrot.slane %v1525_v47, 1  ;;  %v1601_v35 = vadd.f32 %v1599_v23, %v1595_v49  ;;  %v2438_v16 = vmul.f32 %v3906_v55, %v2437_v19 }
 0x193   : > { %v1600_v36 = vadd.f32 %v1598_v24, %v1594_v61  ;;  %v1611_v37 = vpop.permute.xlu1 %1610  ;;  %v1736_v49 = vstv %s4018_s28  ;;  %s4250_s28 = sld [smem:[#allocation4 + $0xc]] }
 0x194   : > { %v1609_v38 = vpop.permute.xlu0 %1608  ;;  %2792 = vst.msk [vmem:[%s3373_s9 + $0x8] sm:$0x1] %vm404_vm2, %v1514_v34  ;;  %v1527_v1 = vadd.f32 %v1526_v63, %v1525_v47  ;;  %v1615_v41 = vadd.f32 %v1611_v37, %v1601_v35  ;;  %v2034_v47 = vstv %s4016_s27  ;;  %s4212_s27 = sld [smem:[#allocation2 + $0x8d]] }
 0x195   : > { %2424 = vrot.lane.b32.xlu1 %v2419_v18, %s3033_s15  ;;  %v1614_v42 = vadd.f32 %v1609_v38, %v1600_v36  ;;  %v2036_v37 = vmul.f32 %v3902_v53, %v2034_v47  ;;  %v2035_v38 = vmul.f32 %v3906_v55, %v2034_v47 }
 0x196   : > { %2422 = vrot.lane.b32.xlu0 %v2418_v32, %s3033_s15  ;;  %2793 = vst.msk [vmem:[%s3383_s12 + $0x8] sm:$0x1] %vm404_vm2, %v1527_v1  ;;  %v1738_v1 = vmul.f32 %v3902_v53, %v1736_v49 }
 0x197   : > { %v1625_v3 = vpop.permute.xlu1 %1624 }
 0x198   : > { %v1623_v44 = vpop.permute.xlu0 %1622  ;;  %v1629_v45 = vadd.f32 %v1625_v3, %v1615_v41 }
 0x199   : > { %v1628_v46 = vadd.f32 %v1623_v44, %v1614_v42  ;;  %2027 = vrot.lane.b32.xlu1 %v2022_v39, %s3034_s16  ;;  %v1737_v39 = vmul.f32 %v3906_v55, %v1736_v49 }
 0x19a   : > { %2025 = vrot.lane.b32.xlu0 %v2021_v40, %s3034_s16  ;;  %v1633_v57 = vadd.f32 %v1631_v43, %v1629_v45  ;;  %v2173_v40 = vstv %s4031_s29  ;;  %s4256_s29 = sld [smem:[#allocation4 + $0xd]] }
 0x19b   : > { %v1632_v58 = vadd.f32 %v1631_v43, %v1628_v46  ;;  %v1682_v62 = vpop.permute.xlu1 %1681  ;;  %v2175_v52 = vmul.f32 %v3902_v53, %v2173_v40 }
 0x19c   : > { %v1680_v0 = vpop.permute.xlu0 %1679  ;;  %v2928_v9 = vpack.c.bf16 %v1633_v57, %v1633_v57  ;;  %v1646_v11 = vsel %vm394_vm0, %v1633_v57, 0.0  ;;  %v1657_v12 = vmul.f32 %v1633_v57, %v1633_v57  ;;  %v1686_v22 = vadd.f32 %v1682_v62, %v1672_v59 }
 0x19d   : > { %v2927_v13 = vpack.c.bf16 %v1632_v58, %v1632_v58  ;;  %v1645_v14 = vsel %vm394_vm0, %v1632_v58, 0.0  ;;  %v1656_v15 = vmul.f32 %v1632_v58, %v1632_v58  ;;  %2166 = vrot.lane.b32.xlu1 %v2161_v54, %s3034_s16  ;;  %v1685_v23 = vadd.f32 %v1680_v0, %v1671_v60 }
 0x19e   : > { %2164 = vrot.lane.b32.xlu0 %v2160_v56, %s3034_s16  ;;  %2807 = vst.msk [vmem:[%s3325_s24 + $0x4c] sm:$0xf] %vm391_vm1, %v2928_v9  ;;  %v1659_v20 = vsel %vm394_vm0, %v1657_v12, 0.0  ;;  %v1647_v21 = vadd.f32 %v1646_v11, %v1645_v14  ;;  %v2174_v54 = vmul.f32 %v3906_v55, %v2173_v40  ;;  %v2312_v56 = vstv %s4045_s30  ;;  %s4260_s30 = sld [smem:[#allocation4 + $0xe]] }
 0x19f   : > { %2806 = vst.msk [vmem:[%s3325_s24 + $0x48] sm:$0xf] %vm391_vm1, %v2927_v13  ;;  %v1658_v24 = vsel %vm394_vm0, %v1656_v15, 0.0  ;;  %v1696_v25 = vpop.permute.xlu1 %1695  ;;  %v1809_v12 = vstv %s4054_s6  ;;  %v2451_v13 = vstv %s4056_s19  ;;  %v1770_v14 = vstv %s4058_s13  ;;  %s4262_s6 = sld [smem:[#allocation4 + $0xf]] }
 0x1a0   : > { %v1694_v26 = vpop.permute.xlu0 %1693  ;;  %v1648_v27 = vrot.slane %v1647_v21, 4  ;;  %v1660_v28 = vadd.f32 %v1659_v20, %v1658_v24  ;;  %v1700_v29 = vadd.f32 %v1696_v25, %v1686_v22  ;;  %v2453_v22 = vmul.f32 %v3902_v53, %v2451_v13 }
 0x1a1   : > { %v1699_v30 = vadd.f32 %v1694_v26, %v1685_v23  ;;  %2305 = vrot.lane.b32.xlu1 %v2300_v4, %s3034_s16  ;;  %v2452_v23 = vmul.f32 %v3906_v55, %v2451_v13  ;;  %v1810_v26 = vmul.f32 %v3884_v8, %v1809_v12 }
 0x1a2   : > { %2303 = vrot.lane.b32.xlu0 %v2299_v6, %s3034_s16  ;;  %v1649_v61 = vadd.f32 %v1648_v27, %v1647_v21  ;;  %v1661_v18 = vrot.slane %v1660_v28, 4  ;;  %v1706_v32 = vadd.f32 %v1704_v7, %v1700_v29  ;;  %v2314_v6 = vmul.f32 %v3902_v53, %v2312_v56 }
 0x1a3   : > { %v1705_v33 = vadd.f32 %v1703_v17, %v1699_v30  ;;  %v1716_v34 = vpop.permute.xlu1 %1715  ;;  %v2313_v7 = vmul.f32 %v3906_v55, %v2312_v56  ;;  %v1811_v21 = vmul.f32 %v3880_v2, %v1809_v12 }
 0x1a4   : > { %v1714_v63 = vpop.permute.xlu0 %1713  ;;  %v1650_v35 = vrot.slane %v1649_v61, 2  ;;  %v1662_v36 = vadd.f32 %v1661_v18, %v1660_v28  ;;  %v1720_v10 = vadd.f32 %v1716_v34, %v1706_v32 }
 0x1a5   : > { %2444 = vrot.lane.b32.xlu1 %v2439_v31, %s3034_s16  ;;  %v1719_v43 = vadd.f32 %v1714_v63, %v1705_v33 }
 0x1a6   : > { %2442 = vrot.lane.b32.xlu0 %v2438_v16, %s3034_s16  ;;  %v1651_v41 = vadd.f32 %v1650_v35, %v1649_v61  ;;  %v1663_v42 = vrot.slane %v1662_v36, 2  ;;  %s4065_s16 = sld [smem:[#allocation2 + $0x66]] }
 0x1a7   : > { %v1730_v3 = vpop.permute.xlu1 %1729 }
 0x1a8   : > { %v1728_v44 = vpop.permute.xlu0 %1727  ;;  %v1652_v5 = vrot.slane %v1651_v41, 1  ;;  %v1664_v45 = vadd.f32 %v1663_v42, %v1662_v36  ;;  %v1734_v46 = vadd.f32 %v1730_v3, %v1720_v10  ;;  %v1875_v42 = vstv %s4083_s7 }
 0x1a9   : > { %v1733_v50 = vadd.f32 %v1728_v44, %v1719_v43  ;;  %2041 = vrot.lane.b32.xlu1 %v2036_v37, %s3033_s15 }
 0x1aa   : > { %2039 = vrot.lane.b32.xlu0 %v2035_v38, %s3033_s15  ;;  %v1653_v57 = vadd.f32 %v1652_v5, %v1651_v41  ;;  %v1665_v58 = vrot.slane %v1664_v45, 1  ;;  %v1740_v59 = vadd.f32 %v1738_v1, %v1734_v46 }
 0x1ab   : > { %v1739_v60 = vadd.f32 %v1737_v39, %v1733_v50  ;;  %v1750_v62 = vpop.permute.xlu1 %1749 }
 0x1ac   : > { %v1748_v0 = vpop.permute.xlu0 %1747  ;;  %2808 = vst.msk [vmem:[%s3373_s9 + $0x9] sm:$0x1] %vm404_vm2, %v1653_v57  ;;  %v1666_v4 = vadd.f32 %v1665_v58, %v1664_v45  ;;  %v1754_v9 = vadd.f32 %v1750_v62, %v1740_v59  ;;  %v1841_v27 = vstv %s4065_s16 }
 0x1ad   : > { %2180 = vrot.lane.b32.xlu1 %v2175_v52, %s3033_s15  ;;  %v1753_v11 = vadd.f32 %v1748_v0, %v1739_v60  ;;  %v1843_v18 = vmul.f32 %v3892_v48, %v1841_v27  ;;  %v1842_v32 = vmul.f32 %v3898_v51, %v1841_v27  ;;  %v1877_v52 = vmul.f32 %v3902_v53, %v1875_v42 }
 0x1ae   : > { %2178 = vrot.lane.b32.xlu0 %v2174_v54, %s3033_s15  ;;  %2809 = vst.msk [vmem:[%s3383_s12 + $0x9] sm:$0x1] %vm404_vm2, %v1666_v4  ;;  %v1876_v54 = vmul.f32 %v3906_v55, %v1875_v42 }
 0x1af   : > { %v1764_v15 = vpop.permute.xlu1 %1763 }
 0x1b0   : > { %v1762_v17 = vpop.permute.xlu0 %1761  ;;  %v1768_v19 = vadd.f32 %v1764_v15, %v1754_v9 }
 0x1b1   : > { %v1767_v20 = vadd.f32 %v1762_v17, %v1753_v11  ;;  %2319 = vrot.lane.b32.xlu1 %v2314_v6, %s3033_s15 }
 0x1b2   : > { %2317 = vrot.lane.b32.xlu0 %v2313_v7, %s3033_s15  ;;  %v1772_v24 = vadd.f32 %v1770_v14, %v1768_v19 }
 0x1b3   : > { %v1771_v25 = vadd.f32 %v1770_v14, %v1767_v20  ;;  %v1821_v28 = vpop.permute.xlu1 %1820 }
 0x1b4   : > { %v1819_v29 = vpop.permute.xlu0 %1818  ;;  %v2930_v30 = vpack.c.bf16 %v1772_v24, %v1772_v24  ;;  %v1785_v31 = vsel %vm394_vm0, %v1772_v24, 0.0  ;;  %v1796_v16 = vmul.f32 %v1772_v24, %v1772_v24  ;;  %v1825_v63 = vadd.f32 %v1821_v28, %v1811_v21 }
 0x1b5   : > { %v2929_v47 = vpack.c.bf16 %v1771_v25, %v1771_v25  ;;  %v1784_v49 = vsel %vm394_vm0, %v1771_v25, 0.0  ;;  %v1795_v61 = vmul.f32 %v1771_v25, %v1771_v25  ;;  %2458 = vrot.lane.b32.xlu1 %v2453_v22, %s3033_s15  ;;  %v1824_v35 = vadd.f32 %v1819_v29, %v1810_v26 }
 0x1b6   : > { %2456 = vrot.lane.b32.xlu0 %v2452_v23, %s3033_s15  ;;  %2823 = vst.msk [vmem:[%s3325_s24 + $0x54] sm:$0xf] %vm391_vm1, %v2930_v30  ;;  %v1798_v33 = vsel %vm394_vm0, %v1796_v16, 0.0  ;;  %v1786_v34 = vadd.f32 %v1785_v31, %v1784_v49  ;;  %s2835_s15 = sld [smem:[#allocation4 + $0xb]] }
 0x1b7   : > { %2822 = vst.msk [vmem:[%s3325_s24 + $0x50] sm:$0xf] %vm391_vm1, %v2929_v47  ;;  %v1797_v36 = vsel %vm394_vm0, %v1795_v61, 0.0  ;;  %v1835_v37 = vpop.permute.xlu1 %1834 }
 0x1b8   : > { %v1833_v38 = vpop.permute.xlu0 %1832  ;;  %v1787_v1 = vrot.slane %v1786_v34, 4  ;;  %v1799_v39 = vadd.f32 %v1798_v33, %v1797_v36  ;;  %v1839_v40 = vadd.f32 %v1835_v37, %v1825_v63 }
 0x1b9   : > { %v1838_v41 = vadd.f32 %v1833_v38, %v1824_v35 }
 0x1ba   : > { %v1788_v10 = vadd.f32 %v1787_v1, %v1786_v34  ;;  %v1800_v43 = vrot.slane %v1799_v39, 4  ;;  %v1845_v3 = vadd.f32 %v1843_v18, %v1839_v40 }
 0x1bb   : > { %v1844_v44 = vadd.f32 %v1842_v32, %v1838_v41  ;;  %v1855_v5 = vpop.permute.xlu1 %1854 }
 0x1bc   : > { %v1853_v45 = vpop.permute.xlu0 %1852  ;;  %v1789_v46 = vrot.slane %v1788_v10, 2  ;;  %v1801_v50 = vadd.f32 %v1800_v43, %v1799_v39  ;;  %v1859_v58 = vadd.f32 %v1855_v5, %v1845_v3  ;;  %v1909_v21 = vstv %s2835_s15 }
 0x1bd   : > { %v1858_v59 = vadd.f32 %v1853_v45, %v1844_v44 }
 0x1be   : > { %v1790_v56 = vadd.f32 %v1789_v46, %v1788_v10  ;;  %v1802_v57 = vrot.slane %v1801_v50, 2 }
 0x1bf   : > { %v1869_v60 = vpop.permute.xlu1 %1868 }
 0x1c0   : > { %v1867_v62 = vpop.permute.xlu0 %1866  ;;  %v1791_v0 = vrot.slane %v1790_v56, 1  ;;  %v1803_v4 = vadd.f32 %v1802_v57, %v1801_v50  ;;  %v1873_v6 = vadd.f32 %v1869_v60, %v1859_v58 }
 0x1c1   : > { %v1872_v7 = vadd.f32 %v1867_v62, %v1858_v59 }
 0x1c2   : > { %v1792_v9 = vadd.f32 %v1791_v0, %v1790_v56  ;;  %v1804_v11 = vrot.slane %v1803_v4, 1  ;;  %v1879_v12 = vadd.f32 %v1877_v52, %v1873_v6 }
 0x1c3   : > { %v1878_v13 = vadd.f32 %v1876_v54, %v1872_v7  ;;  %v1889_v14 = vpop.permute.xlu1 %1888 }
 0x1c4   : > { %v1887_v15 = vpop.permute.xlu0 %1886  ;;  %2824 = vst.msk [vmem:[%s3373_s9 + $0xa] sm:$0x1] %vm404_vm2, %v1792_v9  ;;  %v1805_v17 = vadd.f32 %v1804_v11, %v1803_v4  ;;  %v1893_v19 = vadd.f32 %v1889_v14, %v1879_v12 }
 0x1c5   : > { %v1892_v20 = vadd.f32 %v1887_v15, %v1878_v13 }
 0x1c6   : > { %2825 = vst.msk [vmem:[%s3383_s12 + $0xa] sm:$0x1] %vm404_vm2, %v1805_v17 }
 0x1c7   : > { %v1903_v22 = vpop.permute.xlu1 %1902 }
 0x1c8   : > { %v1901_v23 = vpop.permute.xlu0 %1900  ;;  %v1907_v24 = vadd.f32 %v1903_v22, %v1893_v19 }
 0x1c9   : > { %v1906_v25 = vadd.f32 %v1901_v23, %v1892_v20  ;;  %v1948_v20 = vstv %s2842_s8 }
 0x1ca   : > { %v1911_v26 = vadd.f32 %v1909_v21, %v1907_v24  ;;  %v1950_v23 = vmul.f32 %v3880_v2, %v1948_v20  ;;  %v1949_v24 = vmul.f32 %v3884_v8, %v1948_v20 }
 0x1cb   : > { %v1910_v27 = vadd.f32 %v1909_v21, %v1906_v25  ;;  %v4106_v28 = vpop.permute.xlu1 %1959  ;;  %v2087_v25 = vstv %s2858_s10 }
 0x1cc   : > { %v4108_v29 = vpop.permute.xlu0 %1957  ;;  %v2932_v30 = vpack.c.bf16 %v1911_v26, %v1911_v26  ;;  %v1924_v31 = vsel %vm394_vm0, %v1911_v26, 0.0  ;;  %v1935_v16 = vmul.f32 %v1911_v26, %v1911_v26 }
 0x1cd   : > { %v2931_v47 = vpack.c.bf16 %v1910_v27, %v1910_v27  ;;  %v1923_v49 = vsel %vm394_vm0, %v1910_v27, 0.0  ;;  %v1934_v61 = vmul.f32 %v1910_v27, %v1910_v27 }
 0x1ce   : > { %2839 = vst.msk [vmem:[%s3325_s24 + $0x5c] sm:$0xf] %vm391_vm1, %v2932_v30  ;;  %v1937_v18 = vsel %vm394_vm0, %v1935_v16, 0.0  ;;  %v1925_v32 = vadd.f32 %v1924_v31, %v1923_v49  ;;  %v2226_v30 = vstv %s2874_s11  ;;  %v2365_v31 = vstv %s4170_s14 }
 0x1cf   : > { %2838 = vst.msk [vmem:[%s3325_s24 + $0x58] sm:$0xf] %vm391_vm1, %v2931_v47  ;;  %v1936_v33 = vsel %vm394_vm0, %v1934_v61, 0.0  ;;  %v4118_v34 = vpop.permute.xlu1 %2098  ;;  %v2089_v16 = vmul.f32 %v3880_v2, %v2087_v25  ;;  %v2088_v47 = vmul.f32 %v3884_v8, %v2087_v25  ;;  %v1980_v49 = vstv %s4172_s17 }
 0x1d0   : > { %v4120_v63 = vpop.permute.xlu0 %2096  ;;  %v1926_v35 = vrot.slane %v1925_v32, 4  ;;  %v1938_v36 = vadd.f32 %v1937_v18, %v1936_v33  ;;  %v1964_v61 = vadd.f32 %v4106_v28, %v1950_v23  ;;  %v1963_v18 = vadd.f32 %v4108_v29, %v1949_v24 }
 0x1d1   : > { %v2258_v33 = vstv %s4176_s21  ;;  %v1982_v29 = vmul.f32 %v3892_v48, %v1980_v49  ;;  %v2103_v20 = vadd.f32 %v4118_v34, %v2089_v16  ;;  %v2102_v23 = vadd.f32 %v4120_v63, %v2088_v47 }
 0x1d2   : > { %v1927_v37 = vadd.f32 %v1926_v35, %v1925_v32  ;;  %v1939_v38 = vrot.slane %v1938_v36, 4  ;;  %v2119_v32 = vstv %s4174_s20  ;;  %v2228_v35 = vmul.f32 %v3880_v2, %v2226_v30 }
 0x1d3   : > { %v4122_v1 = vpop.permute.xlu1 %2237  ;;  %v2153_v24 = vstv %s4192_s25 }
 0x1d4   : > { %v4124_v39 = vpop.permute.xlu0 %2235  ;;  %v1928_v40 = vrot.slane %v1927_v37, 2  ;;  %v1940_v41 = vadd.f32 %v1939_v38, %v1938_v36  ;;  %v2227_v36 = vmul.f32 %v3884_v8, %v2226_v30  ;;  %v2397_v38 = vstv %s4178_s22 }
 0x1d5   : > { %v2292_v30 = vstv %s4194_s26 }
 0x1d6   : > { %v1929_v42 = vadd.f32 %v1928_v40, %v1927_v37  ;;  %v1941_v10 = vrot.slane %v1940_v41, 2  ;;  %v2367_v37 = vmul.f32 %v3880_v2, %v2365_v31  ;;  %v2121_v2 = vmul.f32 %v3892_v48, %v2119_v32 }
 0x1d7   : > { %v4126_v43 = vpop.permute.xlu1 %2376 }
 0x1d8   : > { %v4128_v3 = vpop.permute.xlu0 %2374  ;;  %v1930_v44 = vrot.slane %v1929_v42, 1  ;;  %v1942_v5 = vadd.f32 %v1941_v10, %v1940_v41  ;;  %v1981_v10 = vmul.f32 %v3898_v51, %v1980_v49  ;;  %v2241_v49 = vadd.f32 %v4124_v39, %v2227_v36 }
 0x1d9   : > { %v2294_v36 = vmul.f32 %v3902_v53, %v2292_v30 }
 0x1da   : > { %v1931_v45 = vadd.f32 %v1930_v44, %v1929_v42  ;;  %v1943_v46 = vrot.slane %v1942_v5, 1  ;;  %v2366_v44 = vmul.f32 %v3884_v8, %v2365_v31  ;;  %v2242_v31 = vadd.f32 %v4122_v1, %v2228_v35 }
 0x1db   : > { %v1974_v50 = vpop.permute.xlu1 %1973 }
 0x1dc   : > { %v1972_v52 = vpop.permute.xlu0 %1971  ;;  %2840 = vst.msk [vmem:[%s3373_s9 + $0xb] sm:$0x1] %vm404_vm2, %v1931_v45  ;;  %v1944_v54 = vadd.f32 %v1943_v46, %v1942_v5  ;;  %v1978_v28 = vadd.f32 %v1974_v50, %v1964_v61  ;;  %v2120_v5 = vmul.f32 %v3898_v51, %v2119_v32  ;;  %v2260_v45 = vmul.f32 %v3892_v48, %v2258_v33 }
 0x1dd   : > { %v1977_v42 = vadd.f32 %v1972_v52, %v1963_v18  ;;  %v2259_v46 = vmul.f32 %v3898_v51, %v2258_v33  ;;  %v2398_v50 = vmul.f32 %v3898_v51, %v2397_v38  ;;  %v2014_v52 = vstv %s4186_s23 }
 0x1de   : > { %2841 = vst.msk [vmem:[%s3383_s12 + $0xb] sm:$0x1] %vm404_vm2, %v1944_v54  ;;  %v2399_v54 = vmul.f32 %v3892_v48, %v2397_v38  ;;  %v1984_v61 = vadd.f32 %v1982_v29, %v1978_v28  ;;  %v2381_v51 = vadd.f32 %v4126_v43, %v2367_v37  ;;  %v2380_v18 = vadd.f32 %v4128_v3, %v2366_v44 }
 0x1df   : > { %v4134_v56 = vpop.permute.xlu1 %2112  ;;  %v1983_v48 = vadd.f32 %v1981_v10, %v1977_v42  ;;  %v2016_v43 = vmul.f32 %v3902_v53, %v2014_v52 }
 0x1e0   : > { %v4136_v57 = vpop.permute.xlu0 %2110  ;;  %v2117_v34 = vadd.f32 %v4134_v56, %v2103_v20  ;;  %v2431_v56 = vstv %s4212_s27 }
 0x1e1   : > { %v2116_v63 = vadd.f32 %v4136_v57, %v2102_v23  ;;  %v2433_v38 = vmul.f32 %v3902_v53, %v2431_v56 }
 0x1e3   : > { %v4138_v58 = vpop.permute.xlu1 %2251 }
 0x1e4   : > { %v4140_v59 = vpop.permute.xlu0 %2249  ;;  %v2256_v16 = vadd.f32 %v4138_v58, %v2242_v31 }
 0x1e5   : > { %v2255_v47 = vadd.f32 %v4140_v59, %v2241_v49  ;;  %v2015_v59 = vmul.f32 %v3906_v55, %v2014_v52  ;;  %v2187_v49 = vstv %s4256_s29 }
 0x1e6   : > { %v2262_v37 = vadd.f32 %v2260_v45, %v2256_v16 }
 0x1e7   : > { %v4142_v60 = vpop.permute.xlu1 %2390 }
 0x1e8   : > { %v4144_v62 = vpop.permute.xlu0 %2388  ;;  %v2395_v39 = vadd.f32 %v4142_v60, %v2381_v51  ;;  %v2123_v60 = vadd.f32 %v2121_v2, %v2117_v34 }
 0x1e9   : > { %v2394_v33 = vadd.f32 %v4144_v62, %v2380_v18  ;;  %v2122_v62 = vadd.f32 %v2120_v5, %v2116_v63 }
 0x1ea   : > { %v2401_v29 = vadd.f32 %v2399_v54, %v2395_v39 }
 0x1eb   : > { %v4146_v0 = vpop.permute.xlu1 %1993  ;;  %v2400_v10 = vadd.f32 %v2398_v50, %v2394_v33 }
 0x1ec   : > { %v4148_v4 = vpop.permute.xlu0 %1991  ;;  %v1998_v32 = vadd.f32 %v4146_v0, %v1984_v61  ;;  %v2155_v0 = vmul.f32 %v3902_v53, %v2153_v24 }
 0x1ed   : > { %v1997_v1 = vadd.f32 %v4148_v4, %v1983_v48  ;;  %v2154_v4 = vmul.f32 %v3906_v55, %v2153_v24  ;;  %v2048_v24 = vstv %s4250_s28  ;;  %v2326_v48 = vstv %s4260_s30 }
 0x1ef   : > { %v4150_v6 = vpop.permute.xlu1 %2132 }
 0x1f0   : > { %v4152_v7 = vpop.permute.xlu0 %2130  ;;  %v2137_v28 = vadd.f32 %v4150_v6, %v2123_v60 }
 0x1f1   : > { %v2136_v42 = vadd.f32 %v4152_v7, %v2122_v62 }
 0x1f3   : > { %v4154_v9 = vpop.permute.xlu1 %2271 }
 0x1f4   : > { %v4156_v11 = vpop.permute.xlu0 %2269  ;;  %v2276_v5 = vadd.f32 %v4154_v9, %v2262_v37 }
 0x1f7   : > { %v4158_v12 = vpop.permute.xlu1 %2410 }
 0x1f8   : > { %v4160_v13 = vpop.permute.xlu0 %2408  ;;  %v2415_v20 = vadd.f32 %v4158_v12, %v2401_v29 }
 0x1f9   : > { %v2414_v53 = vadd.f32 %v4160_v13, %v2400_v10  ;;  %v2432_v13 = vmul.f32 %v3906_v55, %v2431_v56 }
 0x1fb   : > { %v4162_v14 = vpop.permute.xlu1 %2007 }
 0x1fc   : > { %v4164_v15 = vpop.permute.xlu0 %2005  ;;  %v2012_v57 = vadd.f32 %v4162_v14, %v1998_v32  ;;  %v2261_v14 = vadd.f32 %v2259_v46, %v2255_v47 }
 0x1fd   : > { %v2011_v58 = vadd.f32 %v4164_v15, %v1997_v1  ;;  %v2293_v15 = vmul.f32 %v3906_v55, %v2292_v30 }
 0x1fe   : > { %v2275_v52 = vadd.f32 %v4156_v11, %v2261_v14  ;;  %v2018_v45 = vadd.f32 %v2016_v43, %v2012_v57 }
 0x1ff   : > { %v4166_v17 = vpop.permute.xlu1 %2146  ;;  %v2017_v46 = vadd.f32 %v2015_v59, %v2011_v58 }
 0x200   : > { %v4168_v19 = vpop.permute.xlu0 %2144  ;;  %v2151_v6 = vadd.f32 %v4166_v17, %v2137_v28 }
 0x201   : > { %v2150_v7 = vadd.f32 %v4168_v19, %v2136_v42 }
 0x203   : > { %v4180_v21 = vpop.permute.xlu1 %2285  ;;  %v2156_v61 = vadd.f32 %v2154_v4, %v2150_v7 }
 0x204   : > { %v4182_v22 = vpop.permute.xlu0 %2283  ;;  %v2290_v54 = vadd.f32 %v4180_v21, %v2276_v5  ;;  %v2157_v21 = vadd.f32 %v2155_v0, %v2151_v6 }
 0x205   : > { %v2289_v50 = vadd.f32 %v4182_v22, %v2275_v52  ;;  %v2465_v22 = vstv %s4262_s6 }
 0x206   : > { %v2296_v51 = vadd.f32 %v2294_v36, %v2290_v54 }
 0x207   : > { %v4188_v26 = vpop.permute.xlu1 %2424 }
 0x208   : > { %v4190_v27 = vpop.permute.xlu0 %2422  ;;  %v2429_v23 = vadd.f32 %v4188_v26, %v2415_v20 }
 0x209   : > { %v2428_v12 = vadd.f32 %v4190_v27, %v2414_v53 }
 0x20a   : > { %v2435_v55 = vadd.f32 %v2433_v38, %v2429_v23 }
 0x20b   : > { %v4208_v40 = vpop.permute.xlu1 %2027  ;;  %v4289_v34 = vadd.f32 %v2432_v13, %v2428_v12 }
 0x20c   : > { %v4210_v41 = vpop.permute.xlu0 %2025  ;;  %v2032_v9 = vadd.f32 %v4208_v40, %v2018_v45  ;;  %v2295_v40 = vadd.f32 %v2293_v15, %v2289_v50 }
 0x20d   : > { %v2031_v11 = vadd.f32 %v4210_v41, %v2017_v46 }
 0x20f   : > { %v4227_v25 = vpop.permute.xlu1 %2166 }
 0x210   : > { %v4229_v8 = vpop.permute.xlu0 %2164  ;;  %v2171_v26 = vadd.f32 %v4227_v25, %v2157_v21 }
 0x211   : > { %v2170_v27 = vadd.f32 %v4229_v8, %v2156_v61 }
 0x213   : > { %v4245_v35 = vpop.permute.xlu1 %2305 }
 0x214   : > { %v4247_v3 = vpop.permute.xlu0 %2303  ;;  %v2310_v25 = vadd.f32 %v4245_v35, %v2296_v51 }
 0x215   : > { %v2309_v8 = vadd.f32 %v4247_v3, %v2295_v40 }
 0x217   : > { %v2445_v44 = vpop.permute.xlu1 %2444 }
 0x218   : > { %v4268_v2 = vpop.permute.xlu0 %2442  ;;  %v2449_v0 = vadd.f32 %v2445_v44, %v2435_v55 }
 0x21b   : > { %v2042_v17 = vpop.permute.xlu1 %2041 }
 0x21c   : > { %v2040_v30 = vpop.permute.xlu0 %2039  ;;  %v2046_v19 = vadd.f32 %v2042_v17, %v2032_v9 }
 0x21d   : > { %v2045_v31 = vadd.f32 %v2040_v30, %v2031_v11 }
 0x21e   : > { %v2050_v18 = vadd.f32 %v2048_v24, %v2046_v19 }
 0x21f   : > { %v2049_v41 = vadd.f32 %v2048_v24, %v2045_v31  ;;  %v2181_v63 = vpop.permute.xlu1 %2180 }
 0x220   : > { %v2179_v16 = vpop.permute.xlu0 %2178  ;;  %v2934_v47 = vpack.c.bf16 %v2050_v18, %v2050_v18  ;;  %v2063_v32 = vsel %vm394_vm0, %v2050_v18, 0.0  ;;  %v2074_v1 = vmul.f32 %v2050_v18, %v2050_v18  ;;  %v2185_v56 = vadd.f32 %v2181_v63, %v2171_v26 }
 0x221   : > { %v2933_v39 = vpack.c.bf16 %v2049_v41, %v2049_v41  ;;  %v2062_v33 = vsel %vm394_vm0, %v2049_v41, 0.0  ;;  %v2073_v43 = vmul.f32 %v2049_v41, %v2049_v41  ;;  %v2184_v57 = vadd.f32 %v2179_v16, %v2170_v27 }
 0x222   : > { %2855 = vst.msk [vmem:[%s3325_s24 + $0x64] sm:$0xf] %vm391_vm1, %v2934_v47  ;;  %v2076_v58 = vsel %vm394_vm0, %v2074_v1, 0.0  ;;  %v2064_v59 = vadd.f32 %v2063_v32, %v2062_v33  ;;  %v2189_v62 = vadd.f32 %v2187_v49, %v2185_v56 }
 0x223   : > { %2854 = vst.msk [vmem:[%s3325_s24 + $0x60] sm:$0xf] %vm391_vm1, %v2933_v39  ;;  %v2075_v60 = vsel %vm394_vm0, %v2073_v43, 0.0  ;;  %v2188_v4 = vadd.f32 %v2187_v49, %v2184_v57  ;;  %v2320_v36 = vpop.permute.xlu1 %2319  ;;  %v2448_v39 = vadd.f32 %v4268_v2, %v4289_v34 }
 0x224   : > { %v2318_v37 = vpop.permute.xlu0 %2317  ;;  %v2065_v14 = vrot.slane %v2064_v59, 4  ;;  %v2077_v35 = vadd.f32 %v2076_v58, %v2075_v60  ;;  %v2324_v15 = vadd.f32 %v2320_v36, %v2310_v25  ;;  %v2936_v38 = vpack.c.bf16 %v2189_v62, %v2189_v62 }
 0x225   : > { %v2323_v3 = vadd.f32 %v2318_v37, %v2309_v8  ;;  %v2202_v28 = vsel %vm394_vm0, %v2189_v62, 0.0  ;;  %v2213_v42 = vmul.f32 %v2189_v62, %v2189_v62  ;;  %v2935_v29 = vpack.c.bf16 %v2188_v4, %v2188_v4 }
 0x226   : > { %v2066_v10 = vadd.f32 %v2065_v14, %v2064_v59  ;;  %v2078_v5 = vrot.slane %v2077_v35, 4  ;;  %v2201_v44 = vsel %vm394_vm0, %v2188_v4, 0.0  ;;  %v2212_v52 = vmul.f32 %v2188_v4, %v2188_v4  ;;  %2871 = vst.msk [vmem:[%s3325_s24 + $0x6c] sm:$0xf] %vm391_vm1, %v2936_v38 }
 0x227   : > { %v2215_v45 = vsel %vm394_vm0, %v2213_v42, 0.0  ;;  %2870 = vst.msk [vmem:[%s3325_s24 + $0x68] sm:$0xf] %vm391_vm1, %v2935_v29  ;;  %v2203_v46 = vadd.f32 %v2202_v28, %v2201_v44  ;;  %v2328_v20 = vadd.f32 %v2326_v48, %v2324_v15  ;;  %v2327_v53 = vadd.f32 %v2326_v48, %v2323_v3  ;;  %v2459_v6 = vpop.permute.xlu1 %2458 }
 0x228   : > { %v2067_v7 = vrot.slane %v2066_v10, 2  ;;  %v2079_v54 = vadd.f32 %v2078_v5, %v2077_v35  ;;  %v2214_v50 = vsel %vm394_vm0, %v2212_v52, 0.0  ;;  %v2463_v9 = vadd.f32 %v2459_v6, %v2449_v0  ;;  %v2457_v1 = vpop.permute.xlu0 %2456 }
 0x229   : > { %v2204_v11 = vrot.slane %v2203_v46, 4  ;;  %v2216_v23 = vadd.f32 %v2215_v45, %v2214_v50  ;;  %v2938_v12 = vpack.c.bf16 %v2328_v20, %v2328_v20  ;;  %v2341_v13 = vsel %vm394_vm0, %v2328_v20, 0.0 }
 0x22a   : > { %v2068_v24 = vadd.f32 %v2067_v7, %v2066_v10  ;;  %v2080_v17 = vrot.slane %v2079_v54, 2  ;;  %v2352_v30 = vmul.f32 %v2328_v20, %v2328_v20  ;;  %v2937_v19 = vpack.c.bf16 %v2327_v53, %v2327_v53 }
 0x22b   : > { %v2205_v31 = vadd.f32 %v2204_v11, %v2203_v46  ;;  %v2217_v49 = vrot.slane %v2216_v23, 4  ;;  %2887 = vst.msk [vmem:[%s3325_s24 + $0x74] sm:$0xf] %vm391_vm1, %v2938_v12  ;;  %v2340_v21 = vsel %vm394_vm0, %v2327_v53, 0.0  ;;  %v2351_v61 = vmul.f32 %v2327_v53, %v2327_v53 }
 0x22c   : > { %v2069_v48 = vrot.slane %v2068_v24, 1  ;;  %v2081_v51 = vadd.f32 %v2080_v17, %v2079_v54  ;;  %v2354_v40 = vsel %vm394_vm0, %v2352_v30, 0.0  ;;  %2886 = vst.msk [vmem:[%s3325_s24 + $0x70] sm:$0xf] %vm391_vm1, %v2937_v19  ;;  %v2342_v18 = vadd.f32 %v2341_v13, %v2340_v21 }
 0x22d   : > { %v2206_v41 = vrot.slane %v2205_v31, 2  ;;  %v2218_v26 = vadd.f32 %v2217_v49, %v2216_v23  ;;  %v2353_v27 = vsel %vm394_vm0, %v2351_v61, 0.0  ;;  %v2467_v55 = vadd.f32 %v2465_v22, %v2463_v9 }
 0x22e   : > { %v2070_v63 = vadd.f32 %v2069_v48, %v2068_v24  ;;  %v2082_v16 = vrot.slane %v2081_v51, 1  ;;  %v2343_v47 = vrot.slane %v2342_v18, 4  ;;  %v2355_v32 = vadd.f32 %v2354_v40, %v2353_v27 }
 0x22f   : > { %v2207_v33 = vadd.f32 %v2206_v41, %v2205_v31  ;;  %v2219_v43 = vrot.slane %v2218_v26, 2  ;;  %v2940_v56 = vpack.c.bf16 %v2467_v55, %v2467_v55  ;;  %v2491_v58 = vmul.f32 %v2467_v55, %v2467_v55 }
 0x230   : > { %2856 = vst.msk [vmem:[%s3373_s9 + $0xc] sm:$0x1] %vm404_vm2, %v2070_v63  ;;  %v2083_v57 = vadd.f32 %v2082_v16, %v2081_v51  ;;  %v2344_v25 = vadd.f32 %v2343_v47, %v2342_v18  ;;  %v2356_v8 = vrot.slane %v2355_v32, 4  ;;  %v2462_v60 = vadd.f32 %v2457_v1, %v2448_v39 }
 0x231   : > { %v2208_v59 = vrot.slane %v2207_v33, 1  ;;  %v2220_v0 = vadd.f32 %v2219_v43, %v2218_v26  ;;  %2903 = vst.msk [vmem:[%s3325_s24 + $0x7c] sm:$0xf] %vm391_vm1, %v2940_v56  ;;  %v2480_v36 = vsel %vm394_vm0, %v2467_v55, 0.0  ;;  %v2493_v15 = vsel %vm394_vm0, %v2491_v58, 0.0 }
 0x232   : > { %2857 = vst.msk [vmem:[%s3383_s12 + $0xc] sm:$0x1] %vm404_vm2, %v2083_v57  ;;  %v2345_v62 = vrot.slane %v2344_v25, 2  ;;  %v2357_v2 = vadd.f32 %v2356_v8, %v2355_v32  ;;  %v2466_v37 = vadd.f32 %v2465_v22, %v2462_v60 }
 0x233   : > { %v2209_v34 = vadd.f32 %v2208_v59, %v2207_v33  ;;  %v2221_v4 = vrot.slane %v2220_v0, 1 }
 0x234   : > { %v2346_v14 = vadd.f32 %v2345_v62, %v2344_v25  ;;  %v2358_v35 = vrot.slane %v2357_v2, 2  ;;  %v2939_v38 = vpack.c.bf16 %v2466_v37, %v2466_v37  ;;  %v2479_v28 = vsel %vm394_vm0, %v2466_v37, 0.0 }
 0x235   : > { %2872 = vst.msk [vmem:[%s3373_s9 + $0xd] sm:$0x1] %vm404_vm2, %v2209_v34  ;;  %v2222_v3 = vadd.f32 %v2221_v4, %v2220_v0  ;;  %v2490_v42 = vmul.f32 %v2466_v37, %v2466_v37  ;;  %v2481_v5 = vadd.f32 %v2480_v36, %v2479_v28 }
 0x236   : > { %v2347_v29 = vrot.slane %v2346_v14, 1  ;;  %v2359_v10 = vadd.f32 %v2358_v35, %v2357_v2  ;;  %2902 = vst.msk [vmem:[%s3325_s24 + $0x78] sm:$0xf] %vm391_vm1, %v2939_v38 }
 0x237   : > { %2873 = vst.msk [vmem:[%s3383_s12 + $0xd] sm:$0x1] %vm404_vm2, %v2222_v3  ;;  %v2492_v22 = vsel %vm394_vm0, %v2490_v42, 0.0  ;;  %v2482_v45 = vrot.slane %v2481_v5, 4 }
 0x238   : > { %v2348_v44 = vadd.f32 %v2347_v29, %v2346_v14  ;;  %v2360_v52 = vrot.slane %v2359_v10, 1  ;;  %v2494_v46 = vadd.f32 %v2493_v15, %v2492_v22 }
 0x239   : > { %v2483_v53 = vadd.f32 %v2482_v45, %v2481_v5 }
 0x23a   : > { %2888 = vst.msk [vmem:[%s3373_s9 + $0xe] sm:$0x1] %vm404_vm2, %v2348_v44  ;;  %v2361_v20 = vadd.f32 %v2360_v52, %v2359_v10  ;;  %v2495_v6 = vrot.slane %v2494_v46, 4 }
 0x23b   : > { %v2484_v7 = vrot.slane %v2483_v53, 2 }
 0x23c   : > { %2889 = vst.msk [vmem:[%s3383_s12 + $0xe] sm:$0x1] %vm404_vm2, %v2361_v20  ;;  %v2496_v54 = vadd.f32 %v2495_v6, %v2494_v46 }
 0x23d   : > { %v2485_v50 = vadd.f32 %v2484_v7, %v2483_v53 }
 0x23e   : > { %v2497_v9 = vrot.slane %v2496_v54, 2 }
 0x23f   : > { %v2486_v11 = vrot.slane %v2485_v50, 1 }
 0x240   : > { %v2498_v23 = vadd.f32 %v2497_v9, %v2496_v54 }
 0x241   : > { %v2487_v12 = vadd.f32 %v2486_v11, %v2485_v50 }
 0x242   : > { %v2499_v13 = vrot.slane %v2498_v23, 1 }
 0x243   : > { %2904 = vst.msk [vmem:[%s3373_s9 + $0xf] sm:$0x1] %vm404_vm2, %v2487_v12 }
 0x244   : > { %v2500_v24 = vadd.f32 %v2499_v13, %v2498_v23 }
 0x246   : > { %2905 = vst.msk [vmem:[%s3383_s12 + $0xf] sm:$0x1] %vm404_vm2, %v2500_v24 }
 0x247 PF: > { %s18_s18 = sadd.s32 1, %s3029_s18  }
 0x248   : > { %p15_p5 = scmp.ge.s32.totalorder %s18_s18, 4  }
 0x24a   :  { %17 = sbr.rel (!%p15_p5) target bundleno = 2 (0x2), region = 140 }
 0x251   :  { %2552 = vsyncpa [#allocation3], 1 }
 0x252   :  { %2554 = vsyncpa [#allocation3 + $0x1], 1 }
 0x253   :  { %2555 = vsyncpa [#allocation5], 1 }

// kernel: tile.33
= control target key start
LH: loop header
LB: loop body
LE: loop exit
PB: predicated region body
PF: predicated region fallthrough
CT: control target
= control target key end

     0   :  { %s22_s0 = inlined_call_operand.vmem [shape: f32[32], index: 0, kind: input, shape index: {}]   ;;  %s23_s1 = inlined_call_operand.vmem [shape: f32[2,32], index: 1, kind: output, shape index: {}]  }
   0x1   :  { %v4_v0 = vld [vmem:[%s22_s0] ss:$0 sm:$0xff] }
   0x2   :  { %5 = vst [vmem:[%s23_s1] sm:$0x3] %v4_v0 }

// kernel: tile.34
= control target key start
LH: loop header
LB: loop body
LE: loop exit
PB: predicated region body
PF: predicated region fallthrough
CT: control target
= control target key end

     0   :  { %vm7_vm0 = vcmask 261120   ;;  %vm13_vm1 = vcmask 523520   ;;  %s39_s0 = inlined_call_operand.vmem [shape: f32[2,32], index: 0, kind: input, shape index: {}]   ;;  %s40_s1 = inlined_call_operand.vmem [shape: f32[1,1,1,64], index: 1, kind: output, shape index: {}]  }
   0x1   :  { %v4_v0 = vld [vmem:[%s39_s0] sm:$0x3]  ;;  %s22_s0 = smov 32  }
   0x2   :  { %5 = vst [vmem:[#allocation1] sm:$0x3] %v4_v0 }
   0x9   :  { %v10_v1 = vld [vmem:[#allocation1 + $0x1] sm:$0x1]   ;;  %v6_v2 = vld [vmem:[#allocation1] sm:$0x1]  }
   0xa   :  { %11 = vrot.lane.b32.xlu0 %v10_v1, %s22_s0  ;;  %8 = vst.msk [vmem:[#allocation0] sm:$0x1] %vm7_vm0, %v6_v2  }
  0x7c   :  { %v12_v3 = vpop.permute.xlu0 %11  }
  0x7d   :  { %14 = vst.msk [vmem:[#allocation0] sm:$0x1] %vm13_vm1, %v12_v3  }
  0x84   :  { %v18_v4 = vld [vmem:[#allocation0] sm:$0x1] }
  0x85   :  { %20 = vst [vmem:[%s40_s1] sm:$0x1] %v18_v4 }

// kernel: cnn_bn_forward.7
= control target key start
LH: loop header
LB: loop body
LE: loop exit
PB: predicated region body
PF: predicated region fallthrough
CT: control target
= control target key end

     0   :  { %s1366_s21 = smov 0   ;;  %s1368_s22 = smov 0   ;;  %s1612_s0 = inlined_call_operand.vmem [shape: bf16[2,96,80], index: 0, kind: input, shape index: {}]   ;;  %s1613_s1 = inlined_call_operand.vmem [shape: bf16[2,1,32,80], index: 1, kind: input, shape index: {}]   ;;  %s1614_s2 = inlined_call_operand.vmem [shape: bf16[400,32], index: 2, kind: input, shape index: {}]   ;;  %s1615_s3 = inlined_call_operand.vmem [shape: f32[1,32], index: 3, kind: input, shape index: {}]   ;;  %s1616_s4 = inlined_call_operand.vmem [shape: bf16[2,64,32], index: 4, kind: output, shape index: {0}]   ;;  %s1617_s5 = inlined_call_operand.vmem [shape: f32[2,1,1,32], index: 5, kind: output, shape index: {1}]   ;;  %s1618_s6 = inlined_call_operand.vmem [shape: f32[2,1,1,32], index: 6, kind: output, shape index: {2}]  }
   0x1   :  { %s1370_s23 = smov 0  }
   0x2 LB: > { %s29_s24 = sadd.s32 1, %s1320_s22  ;;  %p1139_p0 = scmp.ge.s32.totalorder %s1324_s23, 1  ;;  %s1324_s23 = sphi %s1370_s23, %s17_s23   ;;  %s1320_s22 = sphi %s1368_s22, %s1620_s22   ;;  %s1316_s21 = sphi %s1366_s21, %s1619_s21  }
   0x3   : > { %p31_p1 = scmp.ge.s32.totalorder %s29_s24, 2  ;;  %p266_p2 = scmp.lt.s32.totalorder %s1324_s23, 3 }
   0x5   : > { %s1622_s24 = smov (%p31_p1, %s29_s24), 0  ;;  %p267_p3 = pnand %p1139_p0, %p266_p2 }
   0x6   : > { %p334_p4 = scmp.lt.s32.totalorder (!%p267_p3), %s1316_s21, 1  ;;  %v1326_v0 = vmov (!%p267_p3), 0   ;;  %v1277_v1 = vld [vmem:[%s1614_s2 + $0x80] sm:$0xff] (!%p267_p3)   ;;  %v1278_v2 = vld [vmem:[%s1614_s2 + $0x88] sm:$0xff] (!%p267_p3)   ;;  %v1281_v5 = vld [vmem:[%s1614_s2 + $0x90] sm:$0xff] (!%p267_p3)   ;;  %vm421_vm0 = vcmask (!%p267_p3), 1043456  }
   0x7   : > { %270 = sbr.rel (%p267_p3) target bundleno = 408 (0x198), region = 36  ;;  %798 = vmatprep.subr.bf16.mxu1 (!%p267_p3), %v1326_v0  ;;  %v1279_v3 = vld [vmem:[%s1614_s2 + $0x40] sm:$0xff] (!%p267_p3)   ;;  %s1327_s19 = smov (!%p267_p3), 112   ;;  %v1282_v15 = vld [vmem:[%s1614_s2 + $0x48] sm:$0xff] (!%p267_p3)   ;;  %v1284_v17 = vld [vmem:[%s1614_s2 + $0x98] sm:$0xff] (!%p267_p3)   ;;  %vm724_vm1 = vcmask (!%p267_p3), 130048  }
   0x8   : > { %799 = vmatpush1.bf16.msra.mxu1 (!%p267_p3), %v1277_v1  ;;  %v1280_v4 = vld [vmem:[%s1614_s2] sm:$0xff] (!%p267_p3)   ;;  %1201 = vmatprep.subr.bf16.mxu0 (!%p267_p3), %v1279_v3  ;;  %s1328_s26 = smov (!%p267_p3), 80   ;;  %v1283_v16 = vld [vmem:[%s1614_s2 + $0x8] sm:$0xff] (!%p267_p3)   ;;  %v1285_v18 = vld [vmem:[%s1614_s2 + $0x50] sm:$0xff] (!%p267_p3)   ;;  %s1330_s12 = smov (!%p267_p3), 32   ;;  %vm504_vm2 = vcmask (!%p267_p3), 523264  }
   0x9   : > { %800 = vmatprep.subr.bf16.mxu1 (!%p267_p3), %v1326_v0  ;;  %1202 = vmatpush3.bf16.msra.mxu0 (!%p267_p3), %v1280_v4  ;;  %v1286_v19 = vld [vmem:[%s1614_s2 + $0x10] sm:$0xff] (!%p267_p3)   ;;  %v1287_v20 = vld [vmem:[%s1614_s2 + $0xa0] sm:$0xff] (!%p267_p3)   ;;  %v1288_v22 = vld [vmem:[%s1614_s2 + $0x58] sm:$0xff] (!%p267_p3)   ;;  %vm482_vm3 = vcmask (!%p267_p3), 261120   ;;  %vm491_vm4 = vcmask (!%p267_p3), 916480   ;;  %vm465_vm5 = vcmask (!%p267_p3), 654336  }
   0xa   : > { %1203 = vmatprep.subr.bf16.mxu0 (!%p267_p3), %v1282_v15  ;;  %v1289_v23 = vld [vmem:[%s1614_s2 + $0x18] sm:$0xff] (!%p267_p3)   ;;  %v1290_v24 = vld [vmem:[%s1614_s2 + $0xa8] sm:$0xff] (!%p267_p3)   ;;  %v1291_v25 = vld [vmem:[%s1614_s2 + $0x60] sm:$0xff] (!%p267_p3)   ;;  %vm895_vm6 = vcmask (!%p267_p3), 257024   ;;  %vm925_vm7 = vcmask (!%p267_p3), 253952  }
   0xb   : > { %v1292_v28 = vld [vmem:[%s1614_s2 + $0x20] sm:$0xff] (!%p267_p3)   ;;  %v1293_v29 = vld [vmem:[%s1614_s2 + $0xb0] sm:$0xff] (!%p267_p3)   ;;  %v1294_v30 = vld [vmem:[%s1614_s2 + $0x68] sm:$0xff] (!%p267_p3)  }
   0xc   : > { %801 = vmatpush1.bf16.msra.mxu1 (!%p267_p3), %v1278_v2  ;;  %v1295_v32 = vld [vmem:[%s1614_s2 + $0x28] sm:$0xff] (!%p267_p3)   ;;  %v1296_v33 = vld [vmem:[%s1614_s2 + $0xb8] sm:$0xff] (!%p267_p3)   ;;  %v1297_v34 = vld [vmem:[%s1614_s2 + $0x70] sm:$0xff] (!%p267_p3)  }
   0xd   : > { %802 = vmatprep.subr.bf16.mxu1 (!%p267_p3), %v1326_v0  ;;  %1204 = vmatpush3.bf16.msra.mxu0 (!%p267_p3), %v1283_v16  ;;  %v1298_v37 = vld [vmem:[%s1614_s2 + $0x30] sm:$0xff] (!%p267_p3)   ;;  %v1299_v38 = vld [vmem:[%s1614_s2 + $0xc0] sm:$0xff] (!%p267_p3)   ;;  %v1300_v39 = vld [vmem:[%s1614_s2 + $0x78] sm:$0xff] (!%p267_p3)  }
   0xe   : > { %s1624_s21 = smov (!%p334_p4, %s1316_s21), 1  ;;  %1205 = vmatprep.subr.bf16.mxu0 %v1285_v18  ;;  %v1301_v41 = vld [vmem:[%s1614_s2 + $0x38] sm:$0xff]  }
   0xf   : > { %s1241_s9 = smul.u32 48, %s1624_s21  ;;  %s1191_s10 = sshll.u32 %s1624_s21, 4 }
  0x10   : > { %s1405_s13 = scalar_lea.vmem %s1613_s1, %s1191_s10  ;;  %803 = vmatpush1.bf16.msra.mxu1 %v1281_v5  ;;  %s371_s17 = scalar_lea.vmem %s1617_s5, %s1624_s21 }
  0x11   : > { %s341_s16 = scalar_lea.vmem %s1612_s0, %s1241_s9  ;;  %804 = vmatprep.subr.bf16.mxu1 %v1326_v0  ;;  %s1329_s9 = smov 64   ;;  %1206 = vmatpush3.bf16.msra.mxu0 %v1286_v19  ;;  %v1275_v27 = vld [vmem:[%s1405_s13] sm:$0xff]   ;;  %v1276_v36 = vld [vmem:[%s1405_s13 + $0x8] sm:$0xff]  }
  0x12   : > { %v1413_v6 = vld [vmem:[%s341_s16 + $0x8] sm:$0xff]   ;;  %v1415_v7 = vld [vmem:[%s341_s16 + $0x10] sm:$0xff]   ;;  %v1418_v8 = vld [vmem:[%s341_s16] sm:$0xff]   ;;  %1207 = vmatprep.subr.bf16.mxu0 %v1288_v22  ;;  %v429_v31 = vrot.slane %v1275_v27, 4  ;;  %v447_v40 = vrot.slane %v1276_v36, 4  ;;  %s377_s25 = scalar_lea.vmem %s1618_s6, %s1624_s21 }
  0x13   : > { %v423_v9 = vrot.slane %v1413_v6, 4  ;;  %v425_v10 = vrot.slane %v1415_v7, 4  ;;  %v422_v11 = vrot.slane %v1418_v8, 4  ;;  %v1427_v14 = vld [vmem:[%s341_s16 + $0x18] sm:$0xff]  }
  0x14   : > { %805 = vmatpush1.bf16.msra.mxu1 %v1284_v17  ;;  %v427_v21 = vrot.slane %v1427_v14, 4  ;;  %v448_v42 = vsel %vm421_vm0, %v429_v31, %v447_v40  ;;  %v1547_v17 = vld [vmem:[%s1615_s3] ss:$0 sm:$0xff] }
  0x15   : > { %v426_v12 = vsel %vm421_vm0, %v423_v9, %v425_v10  ;;  %v424_v13 = vsel %vm421_vm0, %v422_v11, %v423_v9  ;;  %806 = vmatprep.subr.bf16.mxu1 %v1326_v0  ;;  %1208 = vmatpush3.bf16.msra.mxu0 %v1289_v23 }
  0x16   : > { %449 = vrot.lane.b32.xlu1 %v426_v12, %s1327_s19  ;;  %431 = vrot.lane.b32.xlu0 %v424_v13, %s1328_s26  ;;  %v428_v26 = vsel %vm421_vm0, %v425_v10, %v427_v21  ;;  %v430_v35 = vsel %vm421_vm0, %v427_v21, %v429_v31 }
  0x17   : > { %1209 = vmatprep.subr.bf16.mxu0 %v1291_v25 }
  0x18   : > { %807 = vmatpush1.bf16.msra.mxu1 %v1287_v20 }
  0x19   : > { %808 = vmatprep.subr.bf16.mxu1 %v1326_v0  ;;  %1210 = vmatpush3.bf16.msra.mxu0 %v1292_v28 }
  0x1a   : > { %457 = vrot.lane.b32.xlu1 %v1415_v7, %s1329_s9  ;;  %439 = vrot.lane.b32.xlu0 %v1413_v6, %s1330_s12 }
  0x1b   : > { %1211 = vmatprep.subr.bf16.mxu0 %v1294_v30 }
  0x1c   : > { %809 = vmatpush1.bf16.msra.mxu1 %v1290_v24 }
  0x1d   : > { %810 = vmatprep.subr.bf16.mxu1 %v1326_v0  ;;  %1212 = vmatpush3.bf16.msra.mxu0 %v1295_v32 }
  0x1e   : > { %441 = vrot.lane.b32.xlu1 %v1415_v7, %s1330_s12  ;;  %433 = vrot.lane.b32.xlu0 %v426_v12, %s1328_s26 }
  0x1f   : > { %1213 = vmatprep.subr.bf16.mxu0 %v1297_v34 }
  0x20   : > { %811 = vmatpush1.bf16.msra.mxu1 %v1293_v29 }
  0x21   : > { %812 = vmatprep.subr.bf16.mxu1 %v1326_v0  ;;  %1214 = vmatpush3.bf16.msra.mxu0 %v1298_v37 }
  0x22   : > { %459 = vrot.lane.b32.xlu1 %v1427_v14, %s1329_s9  ;;  %451 = vrot.lane.b32.xlu0 %v428_v26, %s1327_s19 }
  0x23   : > { %1215 = vmatprep.subr.bf16.mxu0 %v1300_v39 }
  0x24   : > { %813 = vmatpush1.bf16.msra.mxu1 %v1296_v33 }
  0x25   : > { %814 = vmatprep.subr.bf16.mxu1 %v1326_v0  ;;  %1216 = vmatpush3.bf16.msra.mxu0 %v1301_v41 }
  0x26   : > { %443 = vrot.lane.b32.xlu1 %v1427_v14, %s1330_s12  ;;  %435 = vrot.lane.b32.xlu0 %v428_v26, %s1328_s26 }
  0x28   : > { %815 = vmatpush1.bf16.msra.mxu1 %v1299_v38 }
  0x2a   : > { %461 = vrot.lane.b32.xlu1 %v1275_v27, %s1329_s9  ;;  %453 = vrot.lane.b32.xlu0 %v430_v35, %s1327_s19 }
  0x2e   : > { %445 = vrot.lane.b32.xlu1 %v1275_v27, %s1330_s12  ;;  %437 = vrot.lane.b32.xlu0 %v430_v35, %s1328_s26 }
  0x32   : > { %463 = vrot.lane.b32.xlu1 %v1276_v36, %s1329_s9  ;;  %455 = vrot.lane.b32.xlu0 %v448_v42, %s1327_s19  ;;  %s1192_s9 = sshll.u32 %s1624_s21, 5 }
  0x33   : > { %s1555_s14 = scalar_lea.vmem %s1616_s4, %s1192_s9 }
  0x88   : > { %v450_v43 = vpop.permute.xlu1 %449  ;;  %v432_v44 = vpop.permute.xlu0 %431 }
  0x89   : > { %v468_v51 = vsel %vm465_vm5, %v1418_v8, %v432_v44 }
  0x8c   : > { %v458_v45 = vpop.permute.xlu1 %457  ;;  %v440_v46 = vpop.permute.xlu0 %439 }
  0x8d   : > { %1177 = vmatprep.mubr.msk.bf16.mxu1 %vm724_vm1, %v458_v45  ;;  %v506_v47 = vsel %vm504_vm2, %v450_v43, %v458_v45  ;;  %v484_v48 = vsel %vm482_vm3, %v432_v44, %v440_v46 }
  0x8e   : > { %831 = vmatmul.mubr.bf16.vlgmr.msra.gmra.mrb[0].mxu1 %v506_v47  ;;  %v493_v49 = vsel %vm491_vm4, %v484_v48, %v450_v43 }
  0x8f   : > { %765 = vmatprep.mubr.bf16.mxu0 %v493_v49 }
  0x90   : > { %v442_v50 = vpop.permute.xlu1 %441  ;;  %766 = vmatmul.mubr.bf16.vlgmr.msra.gmra.mrb[0].mxu0 %v468_v51  ;;  %v434_v52 = vpop.permute.xlu0 %433 }
  0x91   : > { %v486_v54 = vsel %vm482_vm3, %v434_v52, %v442_v50  ;;  %v472_v59 = vsel %vm465_vm5, %v1413_v6, %v434_v52 }
  0x94   : > { %v460_v53 = vpop.permute.xlu1 %459  ;;  %v452_v55 = vpop.permute.xlu0 %451 }
  0x95   : > { %1178 = vmatprep.mubr.msk.bf16.mxu1 %vm724_vm1, %v460_v53  ;;  %v496_v56 = vsel %vm491_vm4, %v486_v54, %v452_v55  ;;  %v509_v57 = vsel %vm504_vm2, %v452_v55, %v460_v53 }
  0x96   : > { %773 = vmatprep.mubr.bf16.mxu0 %v496_v56  ;;  %839 = vmatmul.mubr.bf16.gmra.mrb[4].mxu1 %v509_v57 }
  0x98   : > { %v444_v58 = vpop.permute.xlu1 %443  ;;  %774 = vmatmul.mubr.bf16.gmra.mrb[4].mxu0 %v472_v59  ;;  %v436_v60 = vpop.permute.xlu0 %435 }
  0x99   : > { %v488_v62 = vsel %vm482_vm3, %v436_v60, %v444_v58  ;;  %v476_v3 = vsel %vm465_vm5, %v1415_v7, %v436_v60 }
  0x9c   : > { %v462_v61 = vpop.permute.xlu1 %461  ;;  %v454_v63 = vpop.permute.xlu0 %453 }
  0x9d   : > { %1179 = vmatprep.mubr.msk.bf16.mxu1 %vm724_vm1, %v462_v61  ;;  %v499_v0 = vsel %vm491_vm4, %v488_v62, %v454_v63  ;;  %v512_v1 = vsel %vm504_vm2, %v454_v63, %v462_v61 }
  0x9e   : > { %781 = vmatprep.mubr.bf16.mxu0 %v499_v0  ;;  %847 = vmatmul.mubr.bf16.gmra.mrb[8].mxu1 %v512_v1 }
  0xa0   : > { %v446_v2 = vpop.permute.xlu1 %445  ;;  %782 = vmatmul.mubr.bf16.gmra.mrb[8].mxu0 %v476_v3  ;;  %v438_v4 = vpop.permute.xlu0 %437 }
  0xa1   : > { %v490_v6 = vsel %vm482_vm3, %v438_v4, %v446_v2  ;;  %v480_v11 = vsel %vm465_vm5, %v1427_v14, %v438_v4 }
  0xa4   : > { %v464_v5 = vpop.permute.xlu1 %463  ;;  %v456_v8 = vpop.permute.xlu0 %455 }
  0xa5   : > { %1180 = vmatprep.mubr.msk.bf16.mxu1 %vm724_vm1, %v464_v5  ;;  %v502_v9 = vsel %vm491_vm4, %v490_v6, %v456_v8  ;;  %v515_v10 = vsel %vm504_vm2, %v456_v8, %v464_v5 }
  0xa6   : > { %789 = vmatprep.mubr.bf16.mxu0 %v502_v9  ;;  %855 = vmatmul.mubr.bf16.gmra.mrb[12].mxu1 %v515_v10 }
  0xa8   : > { %790 = vmatmul.mubr.bf16.gmra.mrb[12].mxu0 %v480_v11 }
 0x161   : > { %v832_v7 = vpop.f32.mrb[0].mxu1 }
 0x162   : > { %v834_v12 = vpop.f32.mrb[1].mxu1 }
 0x163   : > { %v835_v13 = vpop.f32.mrb[2].mxu1  ;;  %v1217_v15 = vpop.f32.mrb[0].mxu0 }
 0x164   : > { %v837_v16 = vpop.f32.mrb[3].mxu1  ;;  %v1218_v18 = vpop.f32.mrb[1].mxu0 }
 0x165   : > { %v1219_v19 = vadd.f32 %v1218_v18, %v1217_v15  ;;  %v1220_v20 = vpop.f32.mrb[2].mxu0 }
 0x166   : > { %v1221_v21 = vpop.f32.mrb[3].mxu0 }
 0x167   : > { %v768_v22 = vadd.f32 %v1219_v19, %v1547_v17  ;;  %v1222_v23 = vadd.f32 %v1221_v21, %v1220_v20 }
 0x169   : > { %v833_v14 = vadd.f32 %v832_v7, %v768_v22  ;;  %v771_v24 = vadd.f32 %v1222_v23, %v1547_v17  ;;  %v840_v25 = vpop.f32.mrb[4].mxu1 }
 0x16a   : > { %v842_v26 = vpop.f32.mrb[5].mxu1 }
 0x16b   : > { %v1193_v27 = vpack.c.bf16 %v833_v14, %v833_v14  ;;  %v927_v28 = vmul.f32 %v833_v14, %v833_v14  ;;  %v836_v29 = vadd.f32 %v835_v13, %v771_v24  ;;  %v1223_v30 = vpop.f32.mrb[4].mxu0  ;;  %v843_v31 = vpop.f32.mrb[6].mxu1  ;;  %v904_v34 = vsel %vm482_vm3, %v833_v14, 0.0 }
 0x16c   : > { %v1224_v32 = vpop.f32.mrb[5].mxu0  ;;  %v845_v33 = vpop.f32.mrb[7].mxu1 }
 0x16d   : > { %896 = vst.msk [vmem:[%s1555_s14] sm:$0xf] %vm895_vm6, %v1193_v27  ;;  %v1194_v35 = vpack.c.bf16 %v836_v29, %v836_v29  ;;  %v905_v36 = vsel %vm482_vm3, %v836_v29, 0.0  ;;  %v928_v37 = vmul.f32 %v836_v29, %v836_v29  ;;  %v1226_v38 = vpop.f32.mrb[6].mxu0  ;;  %v1225_v40 = vadd.f32 %v1224_v32, %v1223_v30 }
 0x16e   : > { %v906_v39 = vadd.f32 %v905_v36, %v904_v34  ;;  %v1227_v41 = vpop.f32.mrb[7].mxu0  ;;  %v935_v42 = vsel %vm482_vm3, %v927_v28, 0.0 }
 0x16f   : > { %897 = vst.msk [vmem:[%s1555_s14 + $0x4] sm:$0xf] %vm895_vm6, %v1194_v35  ;;  %v936_v43 = vsel %vm482_vm3, %v928_v37, 0.0  ;;  %v1228_v44 = vadd.f32 %v1227_v41, %v1226_v38  ;;  %v776_v46 = vadd.f32 %v1225_v40, %v1547_v17 }
 0x170   : > { %v937_v45 = vadd.f32 %v936_v43, %v935_v42 }
 0x171   : > { %v779_v47 = vadd.f32 %v1228_v44, %v1547_v17  ;;  %v848_v48 = vpop.f32.mrb[8].mxu1  ;;  %v841_v49 = vadd.f32 %v840_v25, %v776_v46 }
 0x172   : > { %v850_v50 = vpop.f32.mrb[9].mxu1 }
 0x173   : > { %v844_v51 = vadd.f32 %v843_v31, %v779_v47  ;;  %v1229_v52 = vpop.f32.mrb[8].mxu0  ;;  %v851_v53 = vpop.f32.mrb[10].mxu1  ;;  %v1195_v54 = vpack.c.bf16 %v841_v49, %v841_v49  ;;  %v907_v55 = vsel %vm482_vm3, %v841_v49, 0.0  ;;  %v929_v56 = vmul.f32 %v841_v49, %v841_v49 }
 0x174   : > { %v1230_v57 = vpop.f32.mrb[9].mxu0  ;;  %v853_v58 = vpop.f32.mrb[11].mxu1  ;;  %v908_v59 = vadd.f32 %v907_v55, %v906_v39 }
 0x175   : > { %v1196_v60 = vpack.c.bf16 %v844_v51, %v844_v51  ;;  %v909_v61 = vsel %vm482_vm3, %v844_v51, 0.0  ;;  %v930_v62 = vmul.f32 %v844_v51, %v844_v51  ;;  %v1232_v63 = vpop.f32.mrb[10].mxu0  ;;  %898 = vst.msk [vmem:[%s1555_s14 + $0x8] sm:$0xf] %vm895_vm6, %v1195_v54  ;;  %v938_v0 = vsel %vm482_vm3, %v929_v56, 0.0 }
 0x176   : > { %v1231_v1 = vadd.f32 %v1230_v57, %v1229_v52  ;;  %v1233_v2 = vpop.f32.mrb[11].mxu0  ;;  %v939_v3 = vadd.f32 %v938_v0, %v937_v45  ;;  %v910_v4 = vadd.f32 %v909_v61, %v908_v59 }
 0x177   : > { %899 = vst.msk [vmem:[%s1555_s14 + $0xc] sm:$0xf] %vm895_vm6, %v1196_v60  ;;  %v940_v5 = vsel %vm482_vm3, %v930_v62, 0.0  ;;  %v1234_v6 = vadd.f32 %v1233_v2, %v1232_v63 }
 0x178   : > { %v784_v8 = vadd.f32 %v1231_v1, %v1547_v17  ;;  %v941_v9 = vadd.f32 %v940_v5, %v939_v3 }
 0x179   : > { %v787_v10 = vadd.f32 %v1234_v6, %v1547_v17  ;;  %v856_v11 = vpop.f32.mrb[12].mxu1 }
 0x17a   : > { %v849_v7 = vadd.f32 %v848_v48, %v784_v8  ;;  %v858_v12 = vpop.f32.mrb[13].mxu1 }
 0x17b   : > { %v852_v13 = vadd.f32 %v851_v53, %v787_v10  ;;  %v1235_v15 = vpop.f32.mrb[12].mxu0  ;;  %v859_v16 = vpop.f32.mrb[14].mxu1 }
 0x17c   : > { %v1197_v18 = vpack.c.bf16 %v849_v7, %v849_v7  ;;  %v911_v19 = vsel %vm482_vm3, %v849_v7, 0.0  ;;  %v931_v20 = vmul.f32 %v849_v7, %v849_v7  ;;  %v1236_v21 = vpop.f32.mrb[13].mxu0  ;;  %v861_v22 = vpop.f32.mrb[15].mxu1 }
 0x17d   : > { %v912_v23 = vadd.f32 %v911_v19, %v910_v4  ;;  %v1198_v14 = vpack.c.bf16 %v852_v13, %v852_v13  ;;  %v913_v24 = vsel %vm482_vm3, %v852_v13, 0.0  ;;  %v932_v25 = vmul.f32 %v852_v13, %v852_v13  ;;  %v1238_v26 = vpop.f32.mrb[14].mxu0 }
 0x17e   : > { %900 = vst.msk [vmem:[%s1555_s14 + $0x10] sm:$0xf] %vm895_vm6, %v1197_v18  ;;  %v942_v27 = vsel %vm482_vm3, %v931_v20, 0.0  ;;  %v1237_v28 = vadd.f32 %v1236_v21, %v1235_v15  ;;  %v1239_v29 = vpop.f32.mrb[15].mxu0 }
 0x17f   : > { %v943_v30 = vadd.f32 %v942_v27, %v941_v9  ;;  %901 = vst.msk [vmem:[%s1555_s14 + $0x14] sm:$0xf] %vm895_vm6, %v1198_v14  ;;  %v914_v31 = vadd.f32 %v913_v24, %v912_v23  ;;  %v944_v32 = vsel %vm482_vm3, %v932_v25, 0.0  ;;  %v1240_v33 = vadd.f32 %v1239_v29, %v1238_v26 }
 0x180   : > { %v792_v34 = vadd.f32 %v1237_v28, %v1547_v17 }
 0x181   : > { %v945_v35 = vadd.f32 %v944_v32, %v943_v30  ;;  %v795_v36 = vadd.f32 %v1240_v33, %v1547_v17 }
 0x182   : > { %v857_v37 = vadd.f32 %v856_v11, %v792_v34 }
 0x183   : > { %v860_v38 = vadd.f32 %v859_v16, %v795_v36 }
 0x184   : > { %v1199_v39 = vpack.c.bf16 %v857_v37, %v857_v37  ;;  %v915_v40 = vsel %vm482_vm3, %v857_v37, 0.0  ;;  %v933_v41 = vmul.f32 %v857_v37, %v857_v37 }
 0x185   : > { %v916_v42 = vadd.f32 %v915_v40, %v914_v31  ;;  %v1200_v43 = vpack.c.bf16 %v860_v38, %v860_v38  ;;  %v917_v44 = vsel %vm482_vm3, %v860_v38, 0.0  ;;  %v934_v45 = vmul.f32 %v860_v38, %v860_v38 }
 0x186   : > { %902 = vst.msk [vmem:[%s1555_s14 + $0x18] sm:$0xf] %vm895_vm6, %v1199_v39  ;;  %v946_v46 = vsel %vm482_vm3, %v933_v41, 0.0 }
 0x187   : > { %v947_v47 = vadd.f32 %v946_v46, %v945_v35  ;;  %903 = vst.msk [vmem:[%s1555_s14 + $0x1c] sm:$0xf] %vm895_vm6, %v1200_v43  ;;  %v918_v17 = vadd.f32 %v917_v44, %v916_v42  ;;  %v948_v48 = vsel %vm482_vm3, %v934_v45, 0.0 }
 0x189   : > { %v919_v49 = vrot.slane %v918_v17, 4  ;;  %v949_v50 = vadd.f32 %v948_v48, %v947_v47 }
 0x18b   : > { %v920_v51 = vadd.f32 %v919_v49, %v918_v17  ;;  %v950_v52 = vrot.slane %v949_v50, 4 }
 0x18d   : > { %v921_v53 = vrot.slane %v920_v51, 2  ;;  %v951_v54 = vadd.f32 %v950_v52, %v949_v50 }
 0x18f   : > { %v922_v55 = vadd.f32 %v921_v53, %v920_v51  ;;  %v952_v56 = vrot.slane %v951_v54, 2 }
 0x191   : > { %v923_v57 = vrot.slane %v922_v55, 1  ;;  %v953_v58 = vadd.f32 %v952_v56, %v951_v54 }
 0x193   : > { %v924_v59 = vadd.f32 %v923_v57, %v922_v55  ;;  %v954_v60 = vrot.slane %v953_v58, 1 }
 0x195   : > { %926 = vst.msk [vmem:[%s371_s17] sm:$0x1] %vm925_vm7, %v924_v59  ;;  %v955_v61 = vadd.f32 %v954_v60, %v953_v58 }
 0x197   : > { %956 = vst.msk [vmem:[%s377_s25] sm:$0x1] %vm925_vm7, %v955_v61 }
 0x198 PF: > { %s17_s23 = sadd.s32 1, %s1324_s23   ;;  %s1619_s21 = smov %s1320_s22 }
 0x199   : > { %p14_p5 = scmp.ge.s32.totalorder %s17_s23, 4   ;;  %s1620_s22 = smov %s1622_s24 }
 0x19b   :  { %16 = sbr.rel (!%p14_p5) target bundleno = 2 (0x2), region = 93 }

// kernel: cnn_bn_forward.8
= control target key start
LH: loop header
LB: loop body
LE: loop exit
PB: predicated region body
PF: predicated region fallthrough
CT: control target
= control target key end

     0   :  { %s383_s12 = smov 0   ;;  %s410_s0 = inlined_call_operand.vmem [shape: bf16[8,2,4,64], index: 0, kind: input, shape index: {}]   ;;  %s411_s1 = inlined_call_operand.vmem [shape: f32[1,1,1,64], index: 1, kind: input, shape index: {}]   ;;  %s412_s2 = inlined_call_operand.vmem [shape: f32[1,1,1,64], index: 2, kind: input, shape index: {}]   ;;  %s413_s3 = inlined_call_operand.vmem [shape: bf16[8,4,32], index: 3, kind: output, shape index: {}]  }
   0x1 LB: > { %s320_s13 = sadd.s32 4294967295, %s360_s12   ;;  %p324_p0 = scmp.ge.s32.totalorder %s360_s12, 1  ;;  %s360_s12 = sphi %s383_s12, %s13_s12  }
   0x2   : > { %p139_p1 = scmp.lt.s32.totalorder %s360_s12, 3 }
   0x4   : > { %p140_p2 = pnand %p324_p0, %p139_p1 }
   0x5   : > { %s325_s14 = sshll.u32 (!%p140_p2), %s320_s13, 2  ;;  %v330_v0 = vld [vmem:[%s411_s1] ss:$0 sm:$0xff] (!%p140_p2)  ;;  %s362_s23 = smov (!%p140_p2), 96   ;;  %vm259_vm0 = vcmask (!%p140_p2), 254976  }
   0x6   : > { %143 = sbr.rel (%p140_p2) target bundleno = 156 (0x9c), region = 32  ;;  %p165_p3 = scmp.lt.s32.totalorder (!%p140_p2), %s325_s14, 7  ;;  %v331_v11 = vld [vmem:[%s412_s2] ss:$0 sm:$0xff] (!%p140_p2) }
   0xd   : > { %s415_s14 = smov (!%p165_p3, %s325_s14), 7 }
   0xe   : > { %s334_s15 = sshll.u32 %s415_s14, 2  ;;  %s329_s24 = sshll.u32 %s415_s14, 1 }
   0xf   : > { %s169_s18 = scalar_lea.vmem %s410_s0, %s334_s15  ;;  %s175_s27 = scalar_lea.vmem %s413_s3, %s329_s24 }
  0x10   : > { %v177_v1 = vld [vmem:[%s169_s18] sm:$0x3]  ;;  %v178_v2 = vld [vmem:[%s169_s18 + $0x2] sm:$0x3]  ;;  %v179_v3 = vld [vmem:[%s169_s18 + $0x4] sm:$0x3] }
  0x11   : > { %v180_v4 = vld [vmem:[%s169_s18 + $0x6] sm:$0x3]  ;;  %v185_v5 = vunpack.c.l.bf16 %v177_v1  ;;  %v186_v6 = vunpack.c.l.bf16 %v178_v2  ;;  %v187_v7 = vunpack.c.l.bf16 %v179_v3  ;;  %v181_v8 = vld [vmem:[%s169_s18 + $0x8] sm:$0x3]  ;;  %v182_v9 = vld [vmem:[%s169_s18 + $0xa] sm:$0x3] }
  0x12   : > { %v188_v10 = vunpack.c.l.bf16 %v180_v4  ;;  %v183_v12 = vld [vmem:[%s169_s18 + $0xc] sm:$0x3]  ;;  %v184_v13 = vld [vmem:[%s169_s18 + $0xe] sm:$0x3]  ;;  %v189_v14 = vunpack.c.l.bf16 %v181_v8  ;;  %v190_v15 = vunpack.c.l.bf16 %v182_v9 }
  0x13   : > { %v200_v16 = vmul.f32 %v330_v0, %v185_v5  ;;  %v201_v17 = vmul.f32 %v330_v0, %v186_v6  ;;  %v202_v18 = vmul.f32 %v330_v0, %v187_v7  ;;  %v191_v19 = vunpack.c.l.bf16 %v183_v12 }
  0x14   : > { %v203_v20 = vmul.f32 %v330_v0, %v188_v10  ;;  %v192_v21 = vunpack.c.l.bf16 %v184_v13  ;;  %v204_v22 = vmul.f32 %v330_v0, %v189_v14  ;;  %v205_v23 = vmul.f32 %v330_v0, %v190_v15 }
  0x15   : > { %v215_v24 = vadd.f32 %v331_v11, %v200_v16  ;;  %v216_v25 = vadd.f32 %v331_v11, %v201_v17  ;;  %v217_v26 = vadd.f32 %v331_v11, %v202_v18  ;;  %v206_v27 = vmul.f32 %v330_v0, %v191_v19 }
  0x16   : > { %v218_v28 = vadd.f32 %v331_v11, %v203_v20  ;;  %v207_v29 = vmul.f32 %v330_v0, %v192_v21  ;;  %v219_v30 = vadd.f32 %v331_v11, %v204_v22  ;;  %v220_v31 = vadd.f32 %v331_v11, %v205_v23 }
  0x17   : > { %v223_v32 = vmax.f32 %v215_v24, 0.0  ;;  %v224_v33 = vmax.f32 %v216_v25, 0.0  ;;  %v225_v34 = vmax.f32 %v217_v26, 0.0  ;;  %v221_v35 = vadd.f32 %v331_v11, %v206_v27 }
  0x18   : > { %v226_v36 = vmax.f32 %v218_v28, 0.0  ;;  %v222_v37 = vadd.f32 %v331_v11, %v207_v29  ;;  %v227_v38 = vmax.f32 %v219_v30, 0.0  ;;  %v228_v39 = vmax.f32 %v220_v31, 0.0 }
  0x19   : > { %v231_v40 = vmax.f32 %v223_v32, %v224_v33  ;;  %v229_v41 = vmax.f32 %v221_v35, 0.0 }
  0x1a   : > { %v232_v42 = vmax.f32 %v225_v34, %v226_v36  ;;  %v230_v43 = vmax.f32 %v222_v37, 0.0  ;;  %v233_v44 = vmax.f32 %v227_v38, %v228_v39 }
  0x1c   : > { %v344_v45 = vpack.i.bf16 %v232_v42, %v231_v40  ;;  %v234_v46 = vmax.f32 %v229_v41, %v230_v43 }
  0x1e   : > { %345 = vrot.lane.b32.xlu0 %v344_v45, %s362_s23  ;;  %v349_v47 = vpack.i.bf16 %v234_v46, %v233_v44 }
  0x22   : > { %350 = vrot.lane.b32.xlu0 %v349_v47, %s362_s23 }
  0x90   : > { %v346_v48 = vpop.permute.xlu0 %345 }
  0x91   : > { %v348_v49 = vunpack.i.h.bf16 %v346_v48  ;;  %v347_v50 = vunpack.i.l.bf16 %v346_v48 }
  0x93   : > { %v252_v51 = vmax.f32 %v232_v42, %v348_v49  ;;  %v251_v52 = vmax.f32 %v231_v40, %v347_v50 }
  0x94   : > { %v351_v53 = vpop.permute.xlu0 %350 }
  0x95   : > { %v256_v54 = vpack.c.bf16 %v252_v51, %v252_v51  ;;  %v255_v55 = vpack.c.bf16 %v251_v52, %v251_v52  ;;  %v353_v56 = vunpack.i.h.bf16 %v351_v53  ;;  %v352_v57 = vunpack.i.l.bf16 %v351_v53 }
  0x97   : > { %260 = vst.msk [vmem:[%s175_s27] sm:$0x3] %vm259_vm0, %v255_v55  ;;  %v254_v58 = vmax.f32 %v234_v46, %v353_v56  ;;  %v253_v59 = vmax.f32 %v233_v44, %v352_v57  ;;  %261 = vst.msk [vmem:[%s175_s27 + $0x2] sm:$0x3] %vm259_vm0, %v256_v54 }
  0x99   : > { %v258_v60 = vpack.c.bf16 %v254_v58, %v254_v58  ;;  %v257_v61 = vpack.c.bf16 %v253_v59, %v253_v59 }
  0x9b   : > { %262 = vst.msk [vmem:[%s175_s27 + $0x4] sm:$0x3] %vm259_vm0, %v257_v61  ;;  %263 = vst.msk [vmem:[%s175_s27 + $0x6] sm:$0x3] %vm259_vm0, %v258_v60 }
  0x9c PF: > { %s13_s12 = sadd.s32 1, %s360_s12  }
  0x9d   : > { %p10_p4 = scmp.ge.s32.totalorder %s13_s12, 4  }
  0x9f   :  { %12 = sbr.rel (!%p10_p4) target bundleno = 1 (0x1), region = 62 }

// kernel: cnn_bn_forward.9
= control target key start
LH: loop header
LB: loop body
LE: loop exit
PB: predicated region body
PF: predicated region fallthrough
CT: control target
= control target key end

     0   :  { %v37_v1 = vlaneseq  ;;  %v204_v2 = vmov 1983009808   ;;  %v205_v5 = vmov 1966171168   ;;  %s248_s0 = inlined_call_operand.vmem [shape: bf16[2,512], index: 0, kind: input, shape index: {}]   ;;  %s249_s1 = inlined_call_operand.vmem [shape: bf16[4,512], index: 1, kind: input, shape index: {}]   ;;  %s250_s2 = inlined_call_operand.vmem [shape: f32[1,4], index: 2, kind: input, shape index: {}]   ;;  %s251_s3 = inlined_call_operand.hbm [shape: f32[2,4], index: 3, kind: output, shape index: {}]  }
   0x1   :  { %v17_v0 = vld [vmem:[%s249_s1] sm:$0xff]  ;;  %v57_v3 = vunpack.c.l.s4 %v204_v2  ;;  %v35_v6 = vunpack.c.l.s4 %v205_v5 }
   0x2   :  { %v173_v4 = vld.sshfl [vmem:[%s248_s0] sm:$0x33 pattern:$0x75316420]  ;;  %v38_v7 = vshrl.u32 %v37_v1, 7 }
   0x3   :  { %8 = vsyncpa [#allocation3], 0  ;;  %v58_v8 = vunpack.c.0.s8 %v57_v3  ;;  %v55_v9 = vcombine.high %v17_v0, %v17_v0  ;;  %v33_v10 = vcombine.high %v173_v4, %v173_v4  ;;  %v36_v11 = vunpack.c.0.s8 %v35_v6  ;;  %v172_v22 = vld [vmem:[%s250_s2] ss:$0 sm:$0xff]  ;;  %s206_s16 = smov [#allocation2]  }
   0x4   :  { %s164_s17 = sshll.u32 %s206_s16, 4  ;;  %vm156_vm0 = vcmask 25600   ;;  %s165_s17 = int_to_ptr.vmem [resolvable:$true] %s164_s17 }
   0x5   :  { %v61_v12 = vsub.s32 %v58_v8, %v38_v7  ;;  %v39_v13 = vsub.s32 %v36_v11, %v38_v7  ;;  %s180_s18 = scalar_lea.vmem %s165_s17, 32  ;;  %p185_p1 = scmp.lt.s32.totalorder %s165_s17, %s165_s17 }
   0x6   :  { %p181_p0 = scmp.ne.s32.totalorder %s165_s17, %s180_s18  ;;  %p186_p2 = scmp.lt.s32.totalorder %s180_s18, %s180_s18 }
   0x7   :  { %v62_v14 = vrot.slane %v17_v0, %v61_v12  ;;  %v69_v15 = vrot.slane %v55_v9, %v61_v12  ;;  %v47_v16 = vrot.slane %v33_v10, %v39_v13  ;;  %v40_v20 = vrot.slane %v173_v4, %v39_v13 }
   0x8   :  { %p187_p3 = por %p186_p2, %p185_p1 }
   0x9   :  { %v70_v17 = vcombine.high %v62_v14, %v62_v14  ;;  %v71_v18 = vcombine.high %v69_v15, %v69_v15  ;;  %108 = vmatprep.mubr.bf16.mxu1 %v47_v16  ;;  %v49_v19 = vcombine.high %v47_v16, %v47_v16  ;;  %v48_v21 = vcombine.high %v40_v20, %v40_v20 }
   0xa   :  { %p188_p4 = pnand %p187_p3, %p181_p0 }
   0xb   :  { %76 = vmatprep.subr.bf16.mxu1 %v70_v17  ;;  %116 = vmatprep.subr.bf16.mxu0 %v71_v18 }
   0xc   :  { %77 = vmatpush1.bf16.xpose.msra.mxu1 %v62_v14  ;;  %117 = vmatpush1.bf16.xpose.msra.mxu0 %v69_v15 }
   0xd   :  { %148 = vmatprep.mubr.bf16.mxu0 %v49_v19 }
  0x13   :  { %109 = vmatmul.mubr.bf16.vlgmr.msra.gmra.mrb[0].mxu1 %v40_v20  ;;  %149 = vmatmul.mubr.bf16.vlgmr.msra.gmra.mrb[0].mxu0 %v48_v21 }
  0xe6   :  { %v110_v23 = vpop.f32.mrb[0].mxu1  ;;  %v150_v24 = vpop.f32.mrb[0].mxu0 }
  0xe7   :  { %v111_v25 = vadd.f32 %v172_v22, %v110_v23  ;;  %v112_v26 = vpop.f32.mrb[1].mxu1  ;;  %v152_v27 = vpop.f32.mrb[1].mxu0 }
  0xe8   :  { %v113_v28 = vpop.f32.mrb[2].mxu1  ;;  %v153_v29 = vpop.f32.mrb[2].mxu0 }
  0xe9   :  { %v151_v30 = vadd.f32 %v150_v24, %v111_v25  ;;  %v114_v31 = vpop.f32.mrb[3].mxu1  ;;  %v154_v32 = vpop.f32.mrb[3].mxu0 }
  0xeb   :  { %157 = vst.msk [vmem:[#allocation2] sm:$0x3] %vm156_vm0, %v151_v30 }
  0xec   :  { %191 = shalt.err (!%p188_p4)
}
  0xed   :  { %s192_s20 = scalar_lea.hbm %s251_s3, 32 }
  0xee   :  { %p193_p5 = scmp.ne.s32.totalorder %s251_s3, %s192_s20  ;;  %p196_p6 = scmp.lt.u32.totalorder %s192_s20, %s251_s3 }
  0xf0   :  { %p198_p7 = pnand %p196_p6, %p193_p5 }
  0xf2   :  { %201 = shalt.err (!%p198_p7)
}
  0xf3   :  { %167 = dma.vmem_to_hbm [thread:$0]  %s165_s17, 32, %s251_s3, [#allocation3]  }
  0xf4   :  { %202 = dma.done.wait [#allocation3], 32  }
  0xf5   :  { %203 = vsyncadd [#allocation3], 4294967264 }
  0xf6   :  { %171 = vsyncpa [#allocation3], 1 }

</bundles_post_ra>
